<compile_context>
chip_gen: v6e
topology: v6e:2x2x1
jax: 0.10.0
libtpu: 0.0.40
codegen_flags: <defaults>
</compile_context>

<pallas_src>
import functools
import math

import jax
import jax.numpy as jnp
from jax import lax
from jax.experimental import pallas as pl
from jax.experimental.pallas import tpu as pltpu  # noqa: F401  (TPU backend)

_BF16 = jnp.bfloat16
_F32 = jnp.float32

# Batched-matmul dimension_numbers (leading batch dim on both operands).
_DN_CONTRACT_LAST = (((2,), (2,)), ((0,), (0,)))  # (b,m,k) x (b,n,k) -> (b,m,n)
_DN_CONTRACT_MID = (((2,), (1,)), ((0,), (0,)))   # (b,m,k) x (b,k,n) -> (b,m,n)


# ---------------------------------------------------------------------------
# Kernel: one invocation handles the whole (tiny) batch.
# ---------------------------------------------------------------------------
def _fused_mha_kernel(
    x1_ref,   # (L, N, E)  f32   query & key input (native torch layout)
    x2_ref,   # (S, N, E)  f32   value input
    wqk_ref,  # (2H, Dh, E) bf16 per-head Q (pre-scaled) and K weights
    bqk_ref,  # (2H, 1, Dh) f32
    wv_ref,   # (H, Dh, E)  bf16
    bv_ref,   # (H, 1, Dh)  f32
    wo_ref,   # (H, Dh, E)  bf16 out-proj weight, head-major permutation
    bo_ref,   # (1, E)      f32
    y1_ref,   # (L, N, E)   f32  attention output
    y2_ref,   # (N, L, S)   f32  head-averaged attention weights
    *,
    num_heads,
):
    L, N, E = x1_ref.shape
    S = x2_ref.shape[0]
    H = num_heads

    # Load weights once; reused for every batch element.
    wqk = wqk_ref[...]
    bqk = bqk_ref[...]
    wv = wv_ref[...]
    bv = bv_ref[...]
    wo = wo_ref[...]
    bo = bo_ref[...]

    for n in range(N):  # static unroll; N is tiny (2)
        x1 = x1_ref[:, n, :].astype(_BF16)  # (L, E)
        x2 = x2_ref[:, n, :].astype(_BF16)  # (S, E)

        # Head-batched projections: broadcast the activations over the head
        # dim and contract E against per-head (Dh, E) weight slabs.  Q and K
        # are fused along the batch axis (first H slabs = Q, last H = K);
        # the 1/sqrt(Dh) scale is folded into the Q weights/bias at prep time.
        x1b = jnp.broadcast_to(x1[None], (2 * H, L, E))
        x2b = jnp.broadcast_to(x2[None], (H, S, E))
        qk = lax.dot_general(x1b, wqk, _DN_CONTRACT_LAST,
                             preferred_element_type=_F32) + bqk  # (2H, L, Dh)
        v = lax.dot_general(x2b, wv, _DN_CONTRACT_LAST,
                            preferred_element_type=_F32) + bv    # (H, S, Dh)
        q = qk[:H]  # (H, L, Dh)  leading-axis slices: no lane shuffles
        k = qk[H:]  # (H, L, Dh)

        # Scores for all heads in one batched MXU pass, then exact softmax
        # (the probabilities are a model output -> no approx reciprocal).
        s = lax.dot_general(q.astype(_BF16), k.astype(_BF16),
                            _DN_CONTRACT_LAST,
                            preferred_element_type=_F32)         # (H, L, S)
        p = jnp.exp(s - jnp.max(s, axis=-1, keepdims=True))
        p = p / jnp.sum(p, axis=-1, keepdims=True)

        # Head-averaged attention weights.
        y2_ref[n, :, :] = (jnp.sum(p, axis=0) * (1.0 / H)).astype(y2_ref.dtype)

        # Per-head context, then the output projection with the head dim kept
        # as a batch dim (wo pre-permuted to (H, Dh, E)).  The head reduction
        # is a cheap leading-axis sum instead of a lane concatenate.
        ctx = lax.dot_general(p.astype(_BF16), v.astype(_BF16),
                              _DN_CONTRACT_MID,
                              preferred_element_type=_F32)       # (H, L, Dh)
        yh = lax.dot_general(ctx.astype(_BF16), wo,
                             _DN_CONTRACT_MID,
                             preferred_element_type=_F32)        # (H, L, E)
        y1_ref[:, n, :] = (jnp.sum(yh, axis=0) + bo).astype(y1_ref.dtype)


# ---------------------------------------------------------------------------
# Parameters (PyTorch layout) and one-time kernel packing.
# ---------------------------------------------------------------------------
def init_params(key, embed_dim, num_heads):
    k1, k2, k3, k4 = jax.random.split(key, 4)
    bound = 1.0 / math.sqrt(embed_dim)
    return {
        "in_proj_weight": jax.random.uniform(
            k1, (3 * embed_dim, embed_dim), _F32, -bound, bound),
        "in_proj_bias": jax.random.uniform(
            k2, (3 * embed_dim,), _F32, -bound, bound),
        "out_proj_weight": jax.random.uniform(
            k3, (embed_dim, embed_dim), _F32, -bound, bound),
        "out_proj_bias": jax.random.uniform(
            k4, (embed_dim,), _F32, -bound, bound),
        "num_heads": num_heads,
    }


def prepare_params(params):
    """One-time packing: per-head layout, folded Q scale, bf16 weights."""
    H = params["num_heads"]
    W = params["in_proj_weight"]   # (3E, E)
    b = params["in_proj_bias"]     # (3E,)
    E = W.shape[1]
    Dh = E // H
    scale = 1.0 / math.sqrt(Dh)
    wq = (W[:E] * scale).reshape(H, Dh, E)
    wk = W[E:2 * E].reshape(H, Dh, E)
    wv = W[2 * E:].reshape(H, Dh, E)
    bq = (b[:E] * scale).reshape(H, 1, Dh)
    bk = b[E:2 * E].reshape(H, 1, Dh)
    bv = b[2 * E:].reshape(H, 1, Dh)
    return {
        "num_heads": H,
        "wqk": jnp.concatenate([wq, wk], axis=0).astype(_BF16),  # (2H, Dh, E)
        "bqk": jnp.concatenate([bq, bk], axis=0).astype(_F32),   # (2H, 1, Dh)
        "wv": wv.astype(_BF16),                                  # (H, Dh, E)
        "bv": bv.astype(_F32),                                   # (H, 1, Dh)
        # out_proj weight permuted so the kernel contracts Dh per head.
        "wo": params["out_proj_weight"].T.reshape(H, Dh, E).astype(_BF16),
        "bo": params["out_proj_bias"].reshape(1, E).astype(_F32),
    }


def make_mha_forward(prep):
    H = prep["num_heads"]
    wqk, bqk, wv, bv, wo, bo = (prep[k] for k in ("wqk", "bqk", "wv", "bv", "wo", "bo"))
    Dh, E = wo.shape[1], wo.shape[2]
    kernel = functools.partial(_fused_mha_kernel, num_heads=H)

    @jax.jit
    def forward(x1, x2):
        """x1: (L, N, E) query & key; x2: (S, N, E) value -> (y1 (L,N,E), y2 (N,L,S))."""
        L, N, E1 = x1.shape
        S, N2, E2 = x2.shape
        assert E1 == E and E2 == E and N2 == N
        # key = x1  =>  value seq length must equal query/key length (PyTorch constraint).
        assert S == L, "value sequence length must equal query/key length here"

        weight_bytes = (wqk.size + wv.size + wo.size) * 2 + (bqk.size + bv.size + bo.size) * 4
        act_bytes = (x1.size + x2.size + L * N * E + N * L * S) * 4
        flops = 2 * N * (2 * L * E * E + S * E * E + 2 * H * L * S * Dh + H * L * Dh * E)

        y1, y2 = pl.pallas_call(
            kernel,
            out_shape=(
                jax.ShapeDtypeStruct((L, N, E), x1.dtype),
                jax.ShapeDtypeStruct((N, L, S), jnp.float32),
            ),
            cost_estimate=pl.CostEstimate(
                flops=flops,
                transcendentals=N * H * L * S,
                bytes_accessed=weight_bytes + act_bytes,
            ),
        )(x1, x2, wqk, bqk, wv, bv, wo, bo)
        return y1, y2

    return forward


# ---------------------------------------------------------------------------
# Pure-JAX f32 reference (PyTorch MHA semantics) for a sanity check.
# ---------------------------------------------------------------------------
def reference_forward(params, x1, x2):
    L, N, E = x1.shape
    S = x2.shape[0]
    H = params["num_heads"]
    Dh = E // H
    W = params["in_proj_weight"]
    b = params["in_proj_bias"]
    q = x1 @ W[:E].T + b[:E]
    k = x1 @ W[E:2 * E].T + b[E:2 * E]
    v = x2 @ W[2 * E:].T + b[2 * E:]
    q = q.reshape(L, N, H, Dh).transpose(1, 2, 0, 3) / math.sqrt(Dh)
    k = k.reshape(L, N, H, Dh).transpose(1, 2, 0, 3)
    v = v.reshape(S, N, H, Dh).transpose(1, 2, 0, 3)
    scores = jnp.einsum("nhld,nhsd->nhls", q, k)
    p = jax.nn.softmax(scores, axis=-1)
    o = jnp.einsum("nhls,nhsd->nhld", p, v)
    o = o.transpose(2, 0, 1, 3).reshape(L * N, E)
    y1 = (o @ params["out_proj_weight"].T + params["out_proj_bias"]).reshape(L, N, E)
    y2 = p.mean(axis=1)
    return y1, y2


if __name__ == "__main__":
    # Shapes consistent with the module: d_model=256, nhead=8, seq=8, batch=2.
    # (The original script's x1=(2,6,15)/x2=(2,14,15) are incompatible with
    #  embed_dim=256 and with key/value length matching, so consistent small
    #  shapes are used instead.)
    L, N, E, H = 8, 2, 256, 8
    key = jax.random.PRNGKey(0)
    k_p, k_x1, k_x2 = jax.random.split(key, 3)

    params = init_params(k_p, E, H)
    x1 = jax.random.normal(k_x1, (L, N, E), dtype=jnp.float32)
    x2 = jax.random.normal(k_x2, (L, N, E), dtype=jnp.float32)

    forward = make_mha_forward(prepare_params(params))
    y1, y2 = forward(x1, x2)
    jax.block_until_ready((y1, y2))

    r1, r2 = reference_forward(params, x1, x2)
    assert y1.shape == (L, N, E) and y2.shape == (N, L, L)
    # Tolerances account for bf16 weights / bf16 MXU inputs (f32 accumulation,
    # exact softmax normalization).
    assert jnp.allclose(y1, r1, rtol=3e-2, atol=3e-2), float(jnp.max(jnp.abs(y1 - r1)))
    assert jnp.allclose(y2, r2, rtol=1e-2, atol=1e-2), float(jnp.max(jnp.abs(y2 - r2)))

    print("KERNEL_OK")
</pallas_src>

<mosaic_0001>
module attributes {stable_mosaic.version = 11 : i64} {
  func.func @_fused_mha_kernel(%arg0: memref<8x2x256xf32, #tpu.memory_space<vmem>>, %arg1: memref<8x2x256xf32, #tpu.memory_space<vmem>>, %arg2: memref<16x32x256xbf16, #tpu.memory_space<vmem>>, %arg3: memref<16x1x32xf32, #tpu.memory_space<vmem>>, %arg4: memref<8x32x256xbf16, #tpu.memory_space<vmem>>, %arg5: memref<8x1x32xf32, #tpu.memory_space<vmem>>, %arg6: memref<8x32x256xbf16, #tpu.memory_space<vmem>>, %arg7: memref<1x256xf32, #tpu.memory_space<vmem>>, %arg8: memref<8x2x256xf32, #tpu.memory_space<vmem>>, %arg9: memref<2x8x8xf32, #tpu.memory_space<vmem>>) attributes {dimension_semantics = [], scalar_prefetch = 0 : i64, scratch_operands = 0 : i64, tpu.core_type = #tpu.core_type<tc>} {
    %c0 = arith.constant 0 : index
    %c0_0 = arith.constant 0 : index
    %c0_1 = arith.constant 0 : index
    %0 = vector.load %arg2[%c0, %c0_0, %c0_1] : memref<16x32x256xbf16, #tpu.memory_space<vmem>>, vector<16x32x256xbf16>
    %c0_2 = arith.constant 0 : index
    %c0_3 = arith.constant 0 : index
    %c0_4 = arith.constant 0 : index
    %1 = vector.load %arg3[%c0_2, %c0_3, %c0_4] : memref<16x1x32xf32, #tpu.memory_space<vmem>>, vector<16x1x32xf32>
    %c0_5 = arith.constant 0 : index
    %c0_6 = arith.constant 0 : index
    %c0_7 = arith.constant 0 : index
    %2 = vector.load %arg4[%c0_5, %c0_6, %c0_7] : memref<8x32x256xbf16, #tpu.memory_space<vmem>>, vector<8x32x256xbf16>
    %c0_8 = arith.constant 0 : index
    %c0_9 = arith.constant 0 : index
    %c0_10 = arith.constant 0 : index
    %3 = vector.load %arg5[%c0_8, %c0_9, %c0_10] : memref<8x1x32xf32, #tpu.memory_space<vmem>>, vector<8x1x32xf32>
    %c0_11 = arith.constant 0 : index
    %c0_12 = arith.constant 0 : index
    %c0_13 = arith.constant 0 : index
    %4 = vector.load %arg6[%c0_11, %c0_12, %c0_13] : memref<8x32x256xbf16, #tpu.memory_space<vmem>>, vector<8x32x256xbf16>
    %c0_14 = arith.constant 0 : index
    %c0_15 = arith.constant 0 : index
    %5 = vector.load %arg7[%c0_14, %c0_15] : memref<1x256xf32, #tpu.memory_space<vmem>>, vector<1x256xf32>
    %c0_16 = arith.constant 0 : index
    %c0_17 = arith.constant 0 : index
    %c0_18 = arith.constant 0 : index
    %6 = vector.load %arg0[%c0_16, %c0_17, %c0_18] : memref<8x2x256xf32, #tpu.memory_space<vmem>>, vector<8x1x256xf32>
    %7 = vector.shape_cast %6 : vector<8x1x256xf32> to vector<8x256xf32>
    %8 = arith.truncf %7 : vector<8x256xf32> to vector<8x256xbf16>
    %c0_19 = arith.constant 0 : index
    %c0_20 = arith.constant 0 : index
    %c0_21 = arith.constant 0 : index
    %9 = vector.load %arg1[%c0_19, %c0_20, %c0_21] : memref<8x2x256xf32, #tpu.memory_space<vmem>>, vector<8x1x256xf32>
    %10 = vector.shape_cast %9 : vector<8x1x256xf32> to vector<8x256xf32>
    %11 = arith.truncf %10 : vector<8x256xf32> to vector<8x256xbf16>
    %12 = vector.shape_cast %8 : vector<8x256xbf16> to vector<1x8x256xbf16>
    %13 = vector.shape_cast %12 : vector<1x8x256xbf16> to vector<1x8x256xbf16>
    %14 = vector.broadcast %13 : vector<1x8x256xbf16> to vector<16x8x256xbf16>
    %15 = vector.shape_cast %11 : vector<8x256xbf16> to vector<1x8x256xbf16>
    %16 = vector.shape_cast %15 : vector<1x8x256xbf16> to vector<1x8x256xbf16>
    %17 = vector.broadcast %16 : vector<1x8x256xbf16> to vector<8x8x256xbf16>
    %cst = arith.constant dense<0.000000e+00> : vector<16x8x32xf32>
    %18 = tpu.matmul %14, %0, %cst {dimension_numbers = #tpu.dot_dimension_numbers<[2], [2], [1], [1], [0, 0, 0, 1, 1, 1], [0], [0]>} : vector<16x8x256xbf16>, vector<16x32x256xbf16>, vector<16x8x32xf32> -> vector<16x8x32xf32>
    %19 = vector.broadcast %1 : vector<16x1x32xf32> to vector<16x8x32xf32>
    %20 = arith.addf %18, %19 : vector<16x8x32xf32>
    %cst_22 = arith.constant dense<0.000000e+00> : vector<8x8x32xf32>
    %21 = tpu.matmul %17, %2, %cst_22 {dimension_numbers = #tpu.dot_dimension_numbers<[2], [2], [1], [1], [0, 0, 0, 1, 1, 1], [0], [0]>} : vector<8x8x256xbf16>, vector<8x32x256xbf16>, vector<8x8x32xf32> -> vector<8x8x32xf32>
    %22 = vector.broadcast %3 : vector<8x1x32xf32> to vector<8x8x32xf32>
    %23 = arith.addf %21, %22 : vector<8x8x32xf32>
    %24 = vector.extract_strided_slice %20 {offsets = [0, 0, 0], sizes = [8, 8, 32], strides = [1, 1, 1]} : vector<16x8x32xf32> to vector<8x8x32xf32>
    %25 = vector.extract_strided_slice %20 {offsets = [8, 0, 0], sizes = [8, 8, 32], strides = [1, 1, 1]} : vector<16x8x32xf32> to vector<8x8x32xf32>
    %26 = arith.truncf %24 : vector<8x8x32xf32> to vector<8x8x32xbf16>
    %27 = arith.truncf %25 : vector<8x8x32xf32> to vector<8x8x32xbf16>
    %cst_23 = arith.constant dense<0.000000e+00> : vector<8x8x8xf32>
    %28 = tpu.matmul %26, %27, %cst_23 {dimension_numbers = #tpu.dot_dimension_numbers<[2], [2], [1], [1], [0, 0, 0, 1, 1, 1], [0], [0]>} : vector<8x8x32xbf16>, vector<8x8x32xbf16>, vector<8x8x8xf32> -> vector<8x8x8xf32>
    %cst_24 = arith.constant dense<0xFF800000> : vector<8x8xf32>
    %29 = vector.multi_reduction <maximumf>, %28, %cst_24 [2] : vector<8x8x8xf32> to vector<8x8xf32>
    %30 = vector.shape_cast %29 : vector<8x8xf32> to vector<8x8x1xf32>
    %31 = vector.broadcast %30 : vector<8x8x1xf32> to vector<8x8x8xf32>
    %32 = arith.subf %28, %31 : vector<8x8x8xf32>
    %33 = math.exp %32 : vector<8x8x8xf32>
    %cst_25 = arith.constant dense<0.000000e+00> : vector<8x8xf32>
    %34 = vector.multi_reduction <add>, %33, %cst_25 [2] : vector<8x8x8xf32> to vector<8x8xf32>
    %35 = vector.shape_cast %34 : vector<8x8xf32> to vector<8x8x1xf32>
    %36 = vector.broadcast %35 : vector<8x8x1xf32> to vector<8x8x8xf32>
    %37 = arith.divf %33, %36 : vector<8x8x8xf32>
    %cst_26 = arith.constant dense<0.000000e+00> : vector<8x8xf32>
    %38 = vector.multi_reduction <add>, %37, %cst_26 [0] : vector<8x8x8xf32> to vector<8x8xf32>
    %cst_27 = arith.constant 1.250000e-01 : f32
    %39 = vector.broadcast %cst_27 : f32 to vector<8x8xf32>
    %40 = arith.mulf %38, %39 : vector<8x8xf32>
    %c0_28 = arith.constant 0 : index
    %c0_29 = arith.constant 0 : index
    %c0_30 = arith.constant 0 : index
    %41 = vector.load %arg9[%c0_28, %c0_29, %c0_30] : memref<2x8x8xf32, #tpu.memory_space<vmem>>, vector<1x8x8xf32>
    %42 = vector.shape_cast %41 : vector<1x8x8xf32> to vector<8x8xf32>
    %43 = vector.shape_cast %40 : vector<8x8xf32> to vector<1x8x8xf32>
    tpu.vector_store %arg9[%c0_28, %c0_29, %c0_30], %43 {strides = array<i32>} : memref<2x8x8xf32, #tpu.memory_space<vmem>>, vector<1x8x8xf32>,
    %44 = arith.truncf %37 : vector<8x8x8xf32> to vector<8x8x8xbf16>
    %45 = arith.truncf %23 : vector<8x8x32xf32> to vector<8x8x32xbf16>
    %cst_31 = arith.constant dense<0.000000e+00> : vector<8x8x32xf32>
    %46 = tpu.matmul %44, %45, %cst_31 {dimension_numbers = #tpu.dot_dimension_numbers<[2], [1], [1], [2], [0, 0, 0, 1, 1, 2], [0], [0]>} : vector<8x8x8xbf16>, vector<8x8x32xbf16>, vector<8x8x32xf32> -> vector<8x8x32xf32>
    %47 = arith.truncf %46 : vector<8x8x32xf32> to vector<8x8x32xbf16>
    %cst_32 = arith.constant dense<0.000000e+00> : vector<8x8x256xf32>
    %48 = tpu.matmul %47, %4, %cst_32 {dimension_numbers = #tpu.dot_dimension_numbers<[2], [1], [1], [2], [0, 0, 0, 1, 1, 2], [0], [0]>} : vector<8x8x32xbf16>, vector<8x32x256xbf16>, vector<8x8x256xf32> -> vector<8x8x256xf32>
    %cst_33 = arith.constant dense<0.000000e+00> : vector<8x256xf32>
    %49 = vector.multi_reduction <add>, %48, %cst_33 [0] : vector<8x8x256xf32> to vector<8x256xf32>
    %50 = vector.broadcast %5 : vector<1x256xf32> to vector<8x256xf32>
    %51 = arith.addf %49, %50 : vector<8x256xf32>
    %c0_34 = arith.constant 0 : index
    %c0_35 = arith.constant 0 : index
    %c0_36 = arith.constant 0 : index
    %52 = vector.load %arg8[%c0_34, %c0_35, %c0_36] : memref<8x2x256xf32, #tpu.memory_space<vmem>>, vector<8x1x256xf32>
    %53 = vector.shape_cast %52 : vector<8x1x256xf32> to vector<8x256xf32>
    %54 = vector.shape_cast %51 : vector<8x256xf32> to vector<8x1x256xf32>
    tpu.vector_store %arg8[%c0_34, %c0_35, %c0_36], %54 {strides = array<i32>} : memref<8x2x256xf32, #tpu.memory_space<vmem>>, vector<8x1x256xf32>,
    %c0_37 = arith.constant 0 : index
    %c1 = arith.constant 1 : index
    %c0_38 = arith.constant 0 : index
    %55 = vector.load %arg0[%c0_37, %c1, %c0_38] : memref<8x2x256xf32, #tpu.memory_space<vmem>>, vector<8x1x256xf32>
    %56 = vector.shape_cast %55 : vector<8x1x256xf32> to vector<8x256xf32>
    %57 = arith.truncf %56 : vector<8x256xf32> to vector<8x256xbf16>
    %c0_39 = arith.constant 0 : index
    %c1_40 = arith.constant 1 : index
    %c0_41 = arith.constant 0 : index
    %58 = vector.load %arg1[%c0_39, %c1_40, %c0_41] : memref<8x2x256xf32, #tpu.memory_space<vmem>>, vector<8x1x256xf32>
    %59 = vector.shape_cast %58 : vector<8x1x256xf32> to vector<8x256xf32>
    %60 = arith.truncf %59 : vector<8x256xf32> to vector<8x256xbf16>
    %61 = vector.shape_cast %57 : vector<8x256xbf16> to vector<1x8x256xbf16>
    %62 = vector.shape_cast %61 : vector<1x8x256xbf16> to vector<1x8x256xbf16>
    %63 = vector.broadcast %62 : vector<1x8x256xbf16> to vector<16x8x256xbf16>
    %64 = vector.shape_cast %60 : vector<8x256xbf16> to vector<1x8x256xbf16>
    %65 = vector.shape_cast %64 : vector<1x8x256xbf16> to vector<1x8x256xbf16>
    %66 = vector.broadcast %65 : vector<1x8x256xbf16> to vector<8x8x256xbf16>
    %cst_42 = arith.constant dense<0.000000e+00> : vector<16x8x32xf32>
    %67 = tpu.matmul %63, %0, %cst_42 {dimension_numbers = #tpu.dot_dimension_numbers<[2], [2], [1], [1], [0, 0, 0, 1, 1, 1], [0], [0]>} : vector<16x8x256xbf16>, vector<16x32x256xbf16>, vector<16x8x32xf32> -> vector<16x8x32xf32>
    %68 = vector.broadcast %1 : vector<16x1x32xf32> to vector<16x8x32xf32>
    %69 = arith.addf %67, %68 : vector<16x8x32xf32>
    %cst_43 = arith.constant dense<0.000000e+00> : vector<8x8x32xf32>
    %70 = tpu.matmul %66, %2, %cst_43 {dimension_numbers = #tpu.dot_dimension_numbers<[2], [2], [1], [1], [0, 0, 0, 1, 1, 1], [0], [0]>} : vector<8x8x256xbf16>, vector<8x32x256xbf16>, vector<8x8x32xf32> -> vector<8x8x32xf32>
    %71 = vector.broadcast %3 : vector<8x1x32xf32> to vector<8x8x32xf32>
    %72 = arith.addf %70, %71 : vector<8x8x32xf32>
    %73 = vector.extract_strided_slice %69 {offsets = [0, 0, 0], sizes = [8, 8, 32], strides = [1, 1, 1]} : vector<16x8x32xf32> to vector<8x8x32xf32>
    %74 = vector.extract_strided_slice %69 {offsets = [8, 0, 0], sizes = [8, 8, 32], strides = [1, 1, 1]} : vector<16x8x32xf32> to vector<8x8x32xf32>
    %75 = arith.truncf %73 : vector<8x8x32xf32> to vector<8x8x32xbf16>
    %76 = arith.truncf %74 : vector<8x8x32xf32> to vector<8x8x32xbf16>
    %cst_44 = arith.constant dense<0.000000e+00> : vector<8x8x8xf32>
    %77 = tpu.matmul %75, %76, %cst_44 {dimension_numbers = #tpu.dot_dimension_numbers<[2], [2], [1], [1], [0, 0, 0, 1, 1, 1], [0], [0]>} : vector<8x8x32xbf16>, vector<8x8x32xbf16>, vector<8x8x8xf32> -> vector<8x8x8xf32>
    %cst_45 = arith.constant dense<0xFF800000> : vector<8x8xf32>
    %78 = vector.multi_reduction <maximumf>, %77, %cst_45 [2] : vector<8x8x8xf32> to vector<8x8xf32>
    %79 = vector.shape_cast %78 : vector<8x8xf32> to vector<8x8x1xf32>
    %80 = vector.broadcast %79 : vector<8x8x1xf32> to vector<8x8x8xf32>
    %81 = arith.subf %77, %80 : vector<8x8x8xf32>
    %82 = math.exp %81 : vector<8x8x8xf32>
    %cst_46 = arith.constant dense<0.000000e+00> : vector<8x8xf32>
    %83 = vector.multi_reduction <add>, %82, %cst_46 [2] : vector<8x8x8xf32> to vector<8x8xf32>
    %84 = vector.shape_cast %83 : vector<8x8xf32> to vector<8x8x1xf32>
    %85 = vector.broadcast %84 : vector<8x8x1xf32> to vector<8x8x8xf32>
    %86 = arith.divf %82, %85 : vector<8x8x8xf32>
    %cst_47 = arith.constant dense<0.000000e+00> : vector<8x8xf32>
    %87 = vector.multi_reduction <add>, %86, %cst_47 [0] : vector<8x8x8xf32> to vector<8x8xf32>
    %cst_48 = arith.constant 1.250000e-01 : f32
    %88 = vector.broadcast %cst_48 : f32 to vector<8x8xf32>
    %89 = arith.mulf %87, %88 : vector<8x8xf32>
    %c1_49 = arith.constant 1 : index
    %c0_50 = arith.constant 0 : index
    %c0_51 = arith.constant 0 : index
    %90 = vector.load %arg9[%c1_49, %c0_50, %c0_51] : memref<2x8x8xf32, #tpu.memory_space<vmem>>, vector<1x8x8xf32>
    %91 = vector.shape_cast %90 : vector<1x8x8xf32> to vector<8x8xf32>
    %92 = vector.shape_cast %89 : vector<8x8xf32> to vector<1x8x8xf32>
    tpu.vector_store %arg9[%c1_49, %c0_50, %c0_51], %92 {strides = array<i32>} : memref<2x8x8xf32, #tpu.memory_space<vmem>>, vector<1x8x8xf32>,
    %93 = arith.truncf %86 : vector<8x8x8xf32> to vector<8x8x8xbf16>
    %94 = arith.truncf %72 : vector<8x8x32xf32> to vector<8x8x32xbf16>
    %cst_52 = arith.constant dense<0.000000e+00> : vector<8x8x32xf32>
    %95 = tpu.matmul %93, %94, %cst_52 {dimension_numbers = #tpu.dot_dimension_numbers<[2], [1], [1], [2], [0, 0, 0, 1, 1, 2], [0], [0]>} : vector<8x8x8xbf16>, vector<8x8x32xbf16>, vector<8x8x32xf32> -> vector<8x8x32xf32>
    %96 = arith.truncf %95 : vector<8x8x32xf32> to vector<8x8x32xbf16>
    %cst_53 = arith.constant dense<0.000000e+00> : vector<8x8x256xf32>
    %97 = tpu.matmul %96, %4, %cst_53 {dimension_numbers = #tpu.dot_dimension_numbers<[2], [1], [1], [2], [0, 0, 0, 1, 1, 2], [0], [0]>} : vector<8x8x32xbf16>, vector<8x32x256xbf16>, vector<8x8x256xf32> -> vector<8x8x256xf32>
    %cst_54 = arith.constant dense<0.000000e+00> : vector<8x256xf32>
    %98 = vector.multi_reduction <add>, %97, %cst_54 [0] : vector<8x8x256xf32> to vector<8x256xf32>
    %99 = vector.broadcast %5 : vector<1x256xf32> to vector<8x256xf32>
    %100 = arith.addf %98, %99 : vector<8x256xf32>
    %c0_55 = arith.constant 0 : index
    %c1_56 = arith.constant 1 : index
    %c0_57 = arith.constant 0 : index
    %101 = vector.load %arg8[%c0_55, %c1_56, %c0_57] : memref<8x2x256xf32, #tpu.memory_space<vmem>>, vector<8x1x256xf32>
    %102 = vector.shape_cast %101 : vector<8x1x256xf32> to vector<8x256xf32>
    %103 = vector.shape_cast %100 : vector<8x256xf32> to vector<8x1x256xf32>
    tpu.vector_store %arg8[%c0_55, %c1_56, %c0_57], %103 {strides = array<i32>} : memref<8x2x256xf32, #tpu.memory_space<vmem>>, vector<8x1x256xf32>,
    return
  }
}

</mosaic_0001>

<bundles_post_ra>
// kernel: forward.1
= control target key start
LH: loop header
LB: loop body
LE: loop exit
PB: predicated region body
PF: predicated region fallthrough
CT: control target
= control target key end

     0   :  { %15 = vsyncpa [#allocation3], 0  ;;  %s8346_s0 = inlined_call_operand.hbm [shape: f32[8,2,256], index: 0, kind: input, shape index: {}]   ;;  %s8347_s1 = inlined_call_operand.hbm [shape: f32[8,2,256], index: 1, kind: input, shape index: {}]   ;;  %s8348_s2 = inlined_call_operand.hbm [shape: bf16[16,32,256], index: 2, kind: input, shape index: {}]   ;;  %s8349_s3 = inlined_call_operand.hbm [shape: f32[16,1,32], index: 3, kind: input, shape index: {}]   ;;  %s8350_s4 = inlined_call_operand.hbm [shape: bf16[8,32,256], index: 4, kind: input, shape index: {}]   ;;  %s8351_s5 = inlined_call_operand.vmem [shape: f32[8,1,32], index: 5, kind: input, shape index: {}]   ;;  %s8352_s6 = inlined_call_operand.hbm [shape: bf16[8,32,256], index: 6, kind: input, shape index: {}]   ;;  %s8353_s7 = inlined_call_operand.vmem [shape: f32[1,256], index: 7, kind: input, shape index: {}]   ;;  %s8354_s8 = inlined_call_operand.hbm [shape: f32[8,2,256], index: 8, kind: output, shape index: {0}]   ;;  %s8355_s9 = inlined_call_operand.hbm [shape: f32[2,8,8], index: 9, kind: output, shape index: {1}]  }
   0x1   :  { %16 = vsyncpa [#allocation6], 0 }
   0x2   :  { %17 = vsyncpa [#allocation9], 0 }
   0x3   :  { %18 = vsyncpa [#allocation12], 0 }
   0x4   :  { %19 = vsyncpa [#allocation4], 0 }
   0x5   :  { %20 = vsyncpa [#allocation15], 0  ;;  %s7472_s30 = smov [#allocation5]   ;;  %s7473_s11 = smov [#allocation8]  }
   0x6   :  { %s38_s10 = sshll.u32 %s7472_s30, 4  ;;  %s62_s12 = sshll.u32 %s7473_s11, 4  ;;  %s39_s10 = int_to_ptr.vmem [resolvable:$true] %s38_s10  ;;  %s63_s12 = int_to_ptr.vmem [resolvable:$true] %s62_s12 }
   0x7   :  { %s7308_s13 = scalar_lea.vmem %s39_s10, 512  ;;  %p7313_p1 = scmp.lt.s32.totalorder %s39_s10, %s39_s10 }
   0x8   :  { %p7309_p0 = scmp.ne.s32.totalorder %s39_s10, %s7308_s13  ;;  %p7314_p2 = scmp.lt.s32.totalorder %s7308_s13, %s7308_s13 }
   0xa   :  { %p7315_p3 = por %p7314_p2, %p7313_p1 }
   0xc   :  { %p7316_p4 = pnand %p7315_p3, %p7309_p0 }
   0xe   :  { %7319 = shalt.err (!%p7316_p4)
}
   0xf   :  { %s7474_s14 = smov 64   ;;  %s7475_s15 = smov 4  }
  0x10   :  { %44 = dma.hbm_to_vmem [thread:$0]  %s8347_s1, 512, %s39_s10, [#allocation6], %s7474_s14, %s7474_s14, %s7475_s15  }
  0x11   :  { %s7328_s18 = scalar_lea.vmem %s63_s12, 256  ;;  %p7333_p6 = scmp.lt.s32.totalorder %s63_s12, %s63_s12 }
  0x12   :  { %p7329_p5 = scmp.ne.s32.totalorder %s63_s12, %s7328_s18  ;;  %p7334_p7 = scmp.lt.s32.totalorder %s7328_s18, %s7328_s18 }
  0x14   :  { %p7335_p8 = por %p7334_p7, %p7333_p6 }
  0x16   :  { %p7336_p9 = pnand %p7335_p8, %p7329_p5 }
  0x18   :  { %7339 = shalt.err (!%p7336_p9)
}
  0x19   :  { %s7476_s19 = smov 16   ;;  %s7477_s20 = smov 1  }
  0x1a   :  { %68 = dma.hbm_to_vmem [thread:$0]  %s8349_s3, 256, %s63_s12, [#allocation9], %s7476_s19, %s7476_s19, %s7477_s20  }
  0x1b   :  { %s7478_s23 = smov [#allocation2]   ;;  %s7479_s25 = smov [#allocation7]  }
  0x1c   :  { %s26_s24 = sshll.u32 %s7478_s23, 4  ;;  %s50_s26 = sshll.u32 %s7479_s25, 4  ;;  %s27_s24 = int_to_ptr.vmem [resolvable:$true] %s26_s24  ;;  %s51_s26 = int_to_ptr.vmem [resolvable:$true] %s50_s26 }
  0x1d   :  { %s7348_s1 = scalar_lea.vmem %s27_s24, 512  ;;  %p7353_p11 = scmp.lt.s32.totalorder %s27_s24, %s27_s24 }
  0x1e   :  { %p7349_p10 = scmp.ne.s32.totalorder %s27_s24, %s7348_s1  ;;  %p7354_p12 = scmp.lt.s32.totalorder %s7348_s1, %s7348_s1 }
  0x20   :  { %p7355_p13 = por %p7354_p12, %p7353_p11 }
  0x22   :  { %p7356_p0 = pnand %p7355_p13, %p7349_p10 }
  0x24   :  { %7359 = shalt.err (!%p7356_p0)
}
  0x25   :  { %32 = dma.hbm_to_vmem [thread:$0]  %s8346_s0, 512, %s27_s24, [#allocation3], %s7474_s14, %s7474_s14, %s7475_s15  }
  0x26   :  { %s7368_s3 = scalar_lea.vmem %s51_s26, 8192  ;;  %p7373_p2 = scmp.lt.s32.totalorder %s51_s26, %s51_s26 }
  0x27   :  { %p7369_p1 = scmp.ne.s32.totalorder %s51_s26, %s7368_s3  ;;  %p7374_p3 = scmp.lt.s32.totalorder %s7368_s3, %s7368_s3 }
  0x29   :  { %p7375_p4 = por %p7374_p3, %p7373_p2 }
  0x2b   :  { %p7376_p5 = pnand %p7375_p4, %p7369_p1 }
  0x2d   :  { %7379 = shalt.err (!%p7376_p5)
}
  0x2e   :  { %s7480_s29 = smov 128   ;;  %s7481_s30 = smov 8  }
  0x2f   :  { %56 = dma.hbm_to_vmem [thread:$0]  %s8348_s2, 8192, %s51_s26, [#allocation6], %s7480_s29, %s7480_s29, %s7481_s30  }
  0x30   :  { %s7482_s12 = smov [#allocation10]   ;;  %s7483_s16 = smov [#allocation11]  }
  0x31   :  { %s74_s13 = sshll.u32 %s7482_s12, 4  ;;  %s88_s0 = sshll.u32 %s7483_s16, 4  ;;  %s75_s13 = int_to_ptr.vmem [resolvable:$true] %s74_s13  ;;  %s89_s0 = int_to_ptr.vmem [resolvable:$true] %s88_s0 }
  0x32   :  { %s7388_s17 = scalar_lea.vmem %s75_s13, 4096  ;;  %p7393_p7 = scmp.lt.s32.totalorder %s75_s13, %s75_s13 }
  0x33   :  { %p7389_p6 = scmp.ne.s32.totalorder %s75_s13, %s7388_s17  ;;  %p7394_p8 = scmp.lt.s32.totalorder %s7388_s17, %s7388_s17 }
  0x35   :  { %p7395_p9 = por %p7394_p8, %p7393_p7 }
  0x37   :  { %p7396_p10 = pnand %p7395_p9, %p7389_p6 }
  0x39   :  { %7399 = shalt.err (!%p7396_p10)
}
  0x3a   :  { %80 = dma.hbm_to_vmem [thread:$0]  %s8350_s4, 4096, %s75_s13, [#allocation9], %s7480_s29, %s7480_s29, %s7481_s30  }
  0x3b   :  { %s7408_s2 = scalar_lea.vmem %s89_s0, 4096  ;;  %p7413_p12 = scmp.lt.s32.totalorder %s89_s0, %s89_s0 }
  0x3c   :  { %p7409_p11 = scmp.ne.s32.totalorder %s89_s0, %s7408_s2  ;;  %p7414_p13 = scmp.lt.s32.totalorder %s7408_s2, %s7408_s2 }
  0x3e   :  { %p7415_p0 = por %p7414_p13, %p7413_p12 }
  0x40   :  { %p7416_p1 = pnand %p7415_p0, %p7409_p11 }
  0x42   :  { %7419 = shalt.err (!%p7416_p1)
}
  0x43   :  { %94 = dma.hbm_to_vmem [thread:$0]  %s8352_s6, 4096, %s89_s0, [#allocation12], %s7480_s29, %s7480_s29, %s7481_s30  }
  0x44   :  { %7460 = dma.done.wait [#allocation3], 512  }
  0x45   :  { %7461 = vsyncadd [#allocation3], 4294966784 }
  0x46   :  { %7462 = dma.done.wait [#allocation6], 8704  }
  0x47   :  { %7463 = vsyncadd [#allocation6], 4294958592 }
  0x48   :  { %7464 = dma.done.wait [#allocation9], 4352  }
  0x49   :  { %7465 = vsyncadd [#allocation9], 4294962944 }
  0x4a   :  { %7466 = dma.done.wait [#allocation12], 4096  }
  0x4b   :  { %7467 = vsyncadd [#allocation12], 4294963200  ;;  %v292_v0 = vlaneseq  ;;  %v6892_v2 = vld [vmem:[#allocation7 + $0x14] ss:$8 sps:$4 sm:$0xff]   ;;  %v6896_v4 = vld [vmem:[#allocation7 + $0x10] ss:$8 sps:$4 sm:$0xff]  }
  0x4c   :  { %v6894_v3 = vld [vmem:[#allocation7 + $0x34] ss:$8 sps:$4 sm:$0xff]   ;;  %706 = vmatprep.subr.bf16.mxu0 %v6892_v2  ;;  %v6897_v5 = vld [vmem:[#allocation7 + $0x30] ss:$8 sps:$4 sm:$0xff]   ;;  %v6898_v6 = vld [vmem:[#allocation7 + $0x4] ss:$8 sps:$4 sm:$0xff]  }
  0x4d   :  { %v7574_v1 = vshrl.u32 %v292_v0, 7  ;;  %766 = vmatprep.subr.bf16.mxu1 %v6894_v3  ;;  %707 = vmatpush1.bf16.xpose.msra.mxu0 %v6896_v4  ;;  %v6900_v9 = vld [vmem:[#allocation7 + $0x24] ss:$8 sps:$4 sm:$0xff]   ;;  %v269_v10 = vld [vmem:[#allocation2] ss:$2 sm:$0x3] }
  0x4e   :  { %767 = vmatpush1.bf16.xpose.msra.mxu1 %v6897_v5  ;;  %708 = vmatprep.subr.bf16.mxu0 %v6898_v6  ;;  %vm636_vm0 = vcmask 1041409   ;;  %vm639_vm1 = vcmask 1042434   ;;  %v6902_v11 = vld [vmem:[#allocation7] ss:$8 sps:$4 sm:$0xff]   ;;  %vm642_vm2 = vcmask 1043459   ;;  %vm645_vm3 = vcmask 1044484  }
  0x4f   :  { %v7577_v7 = vsub.s32 1, %v7574_v1  ;;  %v7580_v8 = vsub.s32 0, %v7574_v1  ;;  %768 = vmatprep.subr.bf16.mxu1 %v6900_v9  ;;  %v6903_v12 = vld [vmem:[#allocation7 + $0x20] ss:$8 sps:$4 sm:$0xff]   ;;  %vm648_vm4 = vcmask 1045509   ;;  %vm651_vm5 = vcmask 1046534  }
  0x50   :  { %v271_v13 = vld [vmem:[#allocation2 + $0x4] ss:$2 sm:$0x3]  ;;  %v273_v14 = vld [vmem:[#allocation2 + $0x8] ss:$2 sm:$0x3] }
  0x51   :  { %v299_v15 = vrot.slane %v269_v10, %v7577_v7  ;;  %v7584_v16 = vrot.slane %v269_v10, %v7580_v8  ;;  %v275_v17 = vld [vmem:[#allocation2 + $0xc] ss:$2 sm:$0x3]  ;;  %v277_v18 = vld [vmem:[#allocation2 + $0x10] ss:$2 sm:$0x3]  ;;  %v307_v19 = vrot.slane %v271_v13, %v7577_v7  ;;  %v315_v20 = vrot.slane %v273_v14, %v7577_v7 }
  0x52   :  { %v303_v21 = vrot.slane %v271_v13, %v7580_v8  ;;  %v7590_v22 = vrot.slane %v273_v14, %v7580_v8  ;;  %v279_v23 = vld [vmem:[#allocation2 + $0x14] ss:$2 sm:$0x3]  ;;  %v281_v24 = vld [vmem:[#allocation2 + $0x18] ss:$2 sm:$0x3]  ;;  %v323_v25 = vrot.slane %v275_v17, %v7577_v7  ;;  %v331_v26 = vrot.slane %v277_v18, %v7577_v7 }
  0x53   :  { %v373_v27 = vpack.c.bf16 %v299_v15, %v299_v15  ;;  %v319_v28 = vrot.slane %v275_v17, %v7580_v8  ;;  %v283_v29 = vld [vmem:[#allocation2 + $0x1c] ss:$2 sm:$0x3]  ;;  %v339_v30 = vrot.slane %v279_v23, %v7577_v7  ;;  %v347_v31 = vrot.slane %v281_v24, %v7577_v7 }
  0x54   :  { %v375_v32 = vpack.c.bf16 %v307_v19, %v307_v19  ;;  %v377_v33 = vpack.c.bf16 %v315_v20, %v315_v20  ;;  %v355_v34 = vrot.slane %v283_v29, %v7577_v7  ;;  %v379_v35 = vpack.c.bf16 %v323_v25, %v323_v25  ;;  %v6906_v38 = vld [vmem:[#allocation7 + $0x54] ss:$8 sps:$4 sm:$0xff]  }
  0x55   :  { %v381_v36 = vpack.c.bf16 %v331_v26, %v331_v26  ;;  %v620_v37 = vunpack.c.l.b16 %v373_v27  ;;  %vm654_vm6 = vcmask 1047559   ;;  %v383_v39 = vpack.c.bf16 %v339_v30, %v339_v30  ;;  %v6909_v43 = vld [vmem:[#allocation7 + $0x74] ss:$8 sps:$4 sm:$0xff]   ;;  %709 = vmatpush1.bf16.xpose.msra.mxu0 %v6902_v11 }
  0x56   :  { %v385_v40 = vpack.c.bf16 %v347_v31, %v347_v31  ;;  %v622_v41 = vunpack.c.l.b16 %v375_v32  ;;  %v624_v42 = vunpack.c.l.b16 %v377_v33  ;;  %769 = vmatpush1.bf16.xpose.msra.mxu1 %v6903_v12  ;;  %v387_v44 = vpack.c.bf16 %v355_v34, %v355_v34  ;;  %826 = vmatprep.subr.bf16.mxu0 %v6906_v38  ;;  %v6904_v38 = vld [vmem:[#allocation7 + $0x50] ss:$8 sps:$4 sm:$0xff]  }
  0x57   :  { %v626_v45 = vunpack.c.l.b16 %v379_v35  ;;  %v628_v46 = vunpack.c.l.b16 %v381_v36  ;;  %v327_v47 = vrot.slane %v277_v18, %v7580_v8  ;;  %v630_v48 = vunpack.c.l.b16 %v383_v39  ;;  %886 = vmatprep.subr.bf16.mxu1 %v6909_v43  ;;  %v6915_v43 = vld [vmem:[#allocation7 + $0x64] ss:$8 sps:$4 sm:$0xff]  }
  0x58   :  { %v632_v49 = vunpack.c.l.b16 %v385_v40  ;;  %v656_v50 = vrot.slane %v622_v41, 7  ;;  %v658_v51 = vrot.slane %v624_v42, 6  ;;  %v634_v52 = vunpack.c.l.b16 %v387_v44  ;;  %v6907_v40 = vld [vmem:[#allocation7 + $0x70] ss:$8 sps:$4 sm:$0xff]   ;;  %v6912_v42 = vld [vmem:[#allocation7 + $0x44] ss:$8 sps:$4 sm:$0xff]  }
  0x59   :  { %v660_v53 = vrot.slane %v626_v45, 5  ;;  %v662_v54 = vrot.slane %v628_v46, 4  ;;  %v335_v55 = vrot.slane %v279_v23, %v7580_v8  ;;  %v664_v57 = vrot.slane %v630_v48, 3  ;;  %v6910_v44 = vld [vmem:[#allocation7 + $0x40] ss:$8 sps:$4 sm:$0xff]  }
  0x5a   :  { %v657_v56 = vsel %vm636_vm0, %v656_v50, %v620_v37  ;;  %v666_v58 = vrot.slane %v632_v49, 2  ;;  %v343_v59 = vrot.slane %v281_v24, %v7580_v8  ;;  %v668_v61 = vrot.slane %v634_v52, 1  ;;  %v6913_v45 = vld [vmem:[#allocation7 + $0x60] ss:$8 sps:$4 sm:$0xff]   ;;  %v6918_v46 = vld [vmem:[#allocation7 + $0x94] ss:$8 sps:$4 sm:$0xff]  }
  0x5b   :  { %v659_v60 = vsel %vm639_vm1, %v658_v51, %v657_v56  ;;  %v351_v62 = vrot.slane %v283_v29, %v7580_v8  ;;  %v372_v63 = vpack.c.bf16 %v7584_v16, %v7584_v16  ;;  %v374_v3 = vpack.c.bf16 %v303_v21, %v303_v21  ;;  %v6916_v48 = vld [vmem:[#allocation7 + $0x90] ss:$8 sps:$4 sm:$0xff]   ;;  %v6924_v50 = vld [vmem:[#allocation7 + $0x84] ss:$8 sps:$4 sm:$0xff]   ;;  %v6922_v52 = vld [vmem:[#allocation7 + $0x80] ss:$8 sps:$4 sm:$0xff]  }
  0x5c   :  { %v661_v2 = vsel %vm642_vm2, %v660_v53, %v659_v60  ;;  %v376_v4 = vpack.c.bf16 %v7590_v22, %v7590_v22  ;;  %v378_v5 = vpack.c.bf16 %v319_v28, %v319_v28  ;;  %v380_v9 = vpack.c.bf16 %v327_v47, %v327_v47  ;;  %v6921_v47 = vld [vmem:[#allocation7 + $0xb4] ss:$8 sps:$4 sm:$0xff]   ;;  %v6919_v49 = vld [vmem:[#allocation7 + $0xb0] ss:$8 sps:$4 sm:$0xff]   ;;  %v6927_v51 = vld [vmem:[#allocation7 + $0xa4] ss:$8 sps:$4 sm:$0xff]  }
  0x5d   :  { %v663_v6 = vsel %vm645_vm3, %v662_v54, %v661_v2  ;;  %v382_v10 = vpack.c.bf16 %v335_v55, %v335_v55  ;;  %v384_v11 = vpack.c.bf16 %v343_v59, %v343_v59  ;;  %v386_v13 = vpack.c.bf16 %v351_v62, %v351_v62  ;;  %v6925_v53 = vld [vmem:[#allocation7 + $0xa0] ss:$8 sps:$4 sm:$0xff]   ;;  %v6930_v54 = vld [vmem:[#allocation7 + $0xd4] ss:$8 sps:$4 sm:$0xff]   ;;  %v6928_v56 = vld [vmem:[#allocation7 + $0xd0] ss:$8 sps:$4 sm:$0xff]  }
  0x5e   :  { %v665_v12 = vsel %vm648_vm4, %v664_v57, %v663_v6  ;;  %v619_v14 = vunpack.c.l.b16 %v372_v63  ;;  %v621_v15 = vunpack.c.l.b16 %v374_v3  ;;  %v623_v16 = vunpack.c.l.b16 %v376_v4  ;;  %v6933_v55 = vld [vmem:[#allocation7 + $0xf4] ss:$8 sps:$4 sm:$0xff]   ;;  %v6931_v57 = vld [vmem:[#allocation7 + $0xf0] ss:$8 sps:$4 sm:$0xff]   ;;  %v6939_v59 = vld [vmem:[#allocation7 + $0xe4] ss:$8 sps:$4 sm:$0xff]  }
  0x5f   :  { %v667_v17 = vsel %vm651_vm5, %v666_v58, %v665_v12  ;;  %v625_v18 = vunpack.c.l.b16 %v378_v5  ;;  %v627_v19 = vunpack.c.l.b16 %v380_v9  ;;  %v629_v21 = vunpack.c.l.b16 %v382_v10  ;;  %v6936_v58 = vld [vmem:[#allocation7 + $0xc4] ss:$8 sps:$4 sm:$0xff]   ;;  %v6934_v60 = vld [vmem:[#allocation7 + $0xc0] ss:$8 sps:$4 sm:$0xff]   ;;  %v6942_v62 = vld [vmem:[#allocation7 + $0x114] ss:$8 sps:$4 sm:$0xff]  }
  0x60   :  { %v669_v20 = vsel %vm654_vm6, %v668_v61, %v667_v17  ;;  %v631_v22 = vunpack.c.l.b16 %v384_v11  ;;  %v633_v23 = vunpack.c.l.b16 %v386_v13  ;;  %v635_v25 = vrot.slane %v621_v15, 7  ;;  %v6937_v61 = vld [vmem:[#allocation7 + $0xe0] ss:$8 sps:$4 sm:$0xff]   ;;  %v6945_v63 = vld [vmem:[#allocation7 + $0x134] ss:$8 sps:$4 sm:$0xff]  }
  0x61   :  { %v7613_v24 = vpack.c.b16 %v669_v20, %v669_v20  ;;  %v638_v26 = vrot.slane %v623_v16, 6  ;;  %v641_v27 = vrot.slane %v625_v18, 5  ;;  %v644_v28 = vrot.slane %v627_v19, 4  ;;  %v6940_v2 = vld [vmem:[#allocation7 + $0x110] ss:$8 sps:$4 sm:$0xff]  }
  0x62   :  { %v637_v29 = vsel %vm636_vm0, %v635_v25, %v619_v14  ;;  %v647_v30 = vrot.slane %v629_v21, 3  ;;  %v650_v32 = vrot.slane %v631_v22, 2  ;;  %v653_v34 = vrot.slane %v633_v23, 1  ;;  %v6943_v3 = vld [vmem:[#allocation7 + $0x130] ss:$8 sps:$4 sm:$0xff]  }
  0x63   :  { %726 = vmatprep.mubr.bf16.mxu0 %v7613_v24  ;;  %786 = vmatprep.mubr.bf16.mxu1 %v7613_v24  ;;  %v640_v31 = vsel %vm639_vm1, %v638_v26, %v637_v29  ;;  %v6948_v4 = vld [vmem:[#allocation7 + $0x104] ss:$8 sps:$4 sm:$0xff]   ;;  %v6946_v6 = vld [vmem:[#allocation7 + $0x100] ss:$8 sps:$4 sm:$0xff]   ;;  %v6954_v10 = vld [vmem:[#allocation7 + $0x154] ss:$8 sps:$4 sm:$0xff]  }
  0x64   :  { %v643_v33 = vsel %vm642_vm2, %v641_v27, %v640_v31  ;;  %v6951_v5 = vld [vmem:[#allocation7 + $0x124] ss:$8 sps:$4 sm:$0xff]   ;;  %v6949_v9 = vld [vmem:[#allocation7 + $0x120] ss:$8 sps:$4 sm:$0xff]   ;;  %v6957_v11 = vld [vmem:[#allocation7 + $0x174] ss:$8 sps:$4 sm:$0xff]  }
  0x65   :  { %v646_v35 = vsel %vm645_vm3, %v644_v28, %v643_v33  ;;  %v6952_v12 = vld [vmem:[#allocation7 + $0x150] ss:$8 sps:$4 sm:$0xff]   ;;  %v6960_v14 = vld [vmem:[#allocation7 + $0x144] ss:$8 sps:$4 sm:$0xff]   ;;  %v6958_v17 = vld [vmem:[#allocation7 + $0x140] ss:$8 sps:$4 sm:$0xff]  }
  0x66   :  { %v649_v36 = vsel %vm648_vm4, %v647_v30, %v646_v35  ;;  %v6955_v13 = vld [vmem:[#allocation7 + $0x170] ss:$8 sps:$4 sm:$0xff]   ;;  %v6963_v15 = vld [vmem:[#allocation7 + $0x164] ss:$8 sps:$4 sm:$0xff]   ;;  %v6961_v16 = vld [vmem:[#allocation7 + $0x160] ss:$8 sps:$4 sm:$0xff]  }
  0x67   :  { %v652_v37 = vsel %vm651_vm5, %v650_v32, %v649_v36  ;;  %v6966_v18 = vld [vmem:[#allocation7 + $0x194] ss:$8 sps:$4 sm:$0xff]   ;;  %v390_v20 = vld [vmem:[#allocation5 + $0x4] ss:$2 sm:$0x3]  ;;  %vm7485_vm7 = vmmov 0  }
  0x68   :  { %v655_v39 = vsel %vm654_vm6, %v653_v34, %v652_v37  ;;  %v6969_v19 = vld [vmem:[#allocation7 + $0x1b4] ss:$8 sps:$4 sm:$0xff]   ;;  %v392_v21 = vld [vmem:[#allocation5 + $0x8] ss:$2 sm:$0x3]  ;;  %v426_v22 = vrot.slane %v390_v20, %v7577_v7  ;;  %vm2242_vm8 = vcmask 261120  }
  0x69   :  { %v7624_v41 = vpack.c.b16 %v655_v39, %v655_v39  ;;  %v388_v23 = vld [vmem:[#allocation5] ss:$2 sm:$0x3]  ;;  %v6964_v25 = vld [vmem:[#allocation7 + $0x190] ss:$8 sps:$4 sm:$0xff]   ;;  %v434_v28 = vrot.slane %v392_v21, %v7577_v7  ;;  %vm2736_vm9 = vcmask 1043456  }
  0x6a   :  { %v6967_v26 = vld [vmem:[#allocation7 + $0x1b0] ss:$8 sps:$4 sm:$0xff]   ;;  %v394_v27 = vld [vmem:[#allocation5 + $0xc] ss:$2 sm:$0x3]  ;;  %v418_v31 = vrot.slane %v388_v23, %v7577_v7  ;;  %v494_v32 = vpack.c.bf16 %v426_v22, %v426_v22  ;;  %vm2611_vm10 = vcmask 64512  }
  0x6b   :  { %727 = vmatmul.mubr.bf16.vlgmr.msra.gmra.mxu0 %v7624_v41  ;;  %787 = vmatmul.mubr.bf16.vlgmr.msra.gmra.mxu1 %v7624_v41  ;;  %v6972_v29 = vld [vmem:[#allocation7 + $0x184] ss:$8 sps:$4 sm:$0xff]   ;;  %v396_v33 = vld [vmem:[#allocation5 + $0x10] ss:$2 sm:$0x3]  ;;  %v442_v34 = vrot.slane %v394_v27, %v7577_v7  ;;  %v496_v35 = vpack.c.bf16 %v434_v28, %v434_v28  ;;  %vm8087_vm11 = vcmp.lt.s32.totalorder %v292_v0, 256 }
  0x6c   :  { %827 = vmatpush1.bf16.xpose.msra.mxu0 %v6904_v38  ;;  %887 = vmatpush1.bf16.xpose.msra.mxu1 %v6907_v40  ;;  %v6975_v30 = vld [vmem:[#allocation7 + $0x1a4] ss:$8 sps:$4 sm:$0xff]   ;;  %v492_v36 = vpack.c.bf16 %v418_v31, %v418_v31  ;;  %v1701_v37 = vunpack.c.l.b16 %v494_v32  ;;  %v398_v38 = vld [vmem:[#allocation5 + $0x14] ss:$2 sm:$0x3]  ;;  %v450_v39 = vrot.slane %v396_v33, %v7577_v7 }
  0x6d   :  { %828 = vmatprep.subr.bf16.mxu0 %v6912_v42  ;;  %888 = vmatprep.subr.bf16.mxu1 %v6915_v43  ;;  %v498_v40 = vpack.c.bf16 %v442_v34, %v442_v34  ;;  %v6970_v42 = vld [vmem:[#allocation7 + $0x180] ss:$8 sps:$4 sm:$0xff]  }
  0x6e   :  { %846 = vmatprep.mubr.bf16.mxu0 %v7613_v24  ;;  %906 = vmatprep.mubr.bf16.mxu1 %v7613_v24  ;;  %v6973_v43 = vld [vmem:[#allocation7 + $0x1a0] ss:$8 sps:$4 sm:$0xff]  }
  0x6f   :  { %v6982_v31 = vld [vmem:[#allocation7 + $0x1c0] ss:$8 sps:$4 sm:$0xff]  }
  0x70   :  { %v6985_v32 = vld [vmem:[#allocation7 + $0x1e0] ss:$8 sps:$4 sm:$0xff]  }
  0x74   :  { %829 = vmatpush1.bf16.xpose.msra.mxu0 %v6910_v44  ;;  %889 = vmatpush1.bf16.xpose.msra.mxu1 %v6913_v45  ;;  %v6978_v44 = vld [vmem:[#allocation7 + $0x1d4] ss:$8 sps:$4 sm:$0xff]   ;;  %v1703_v45 = vunpack.c.l.b16 %v496_v35  ;;  %v6990_v35 = vld [vmem:[#allocation10 + $0x14] ss:$8 sps:$4 sm:$0xff]  }
  0x75   :  { %946 = vmatprep.subr.bf16.mxu0 %v6918_v46  ;;  %1006 = vmatprep.subr.bf16.mxu1 %v6921_v47  ;;  %v6981_v46 = vld [vmem:[#allocation7 + $0x1f4] ss:$8 sps:$4 sm:$0xff]   ;;  %v7655_v47 = vld [vmem:[#allocation5 + $0x18] ss:$2 sm:$0x3] }
  0x7b   :  { %847 = vmatmul.mubr.bf16.vlgmr.msra.gmra.mxu0 %v7624_v41  ;;  %907 = vmatmul.mubr.bf16.vlgmr.msra.gmra.mxu1 %v7624_v41 }
  0x7c   :  { %947 = vmatpush1.bf16.xpose.msra.mxu0 %v6916_v48  ;;  %1007 = vmatpush1.bf16.xpose.msra.mxu1 %v6919_v49  ;;  %v458_v48 = vrot.slane %v398_v38, %v7577_v7  ;;  %v1699_v49 = vunpack.c.l.b16 %v492_v36  ;;  %v6993_v36 = vld [vmem:[#allocation10 + $0x34] ss:$8 sps:$4 sm:$0xff]  }
  0x7d   :  { %948 = vmatprep.subr.bf16.mxu0 %v6924_v50  ;;  %1008 = vmatprep.subr.bf16.mxu1 %v6927_v51  ;;  %v1728_v50 = vrot.slane %v1701_v37, 7  ;;  %v500_v51 = vpack.c.bf16 %v450_v39, %v450_v39  ;;  %v462_v39 = vrot.slane %v7655_v47, %v7580_v8 }
  0x7e   :  { %966 = vmatprep.mubr.bf16.mxu0 %v7613_v24  ;;  %1026 = vmatprep.mubr.bf16.mxu1 %v7613_v24 }
  0x84   :  { %949 = vmatpush1.bf16.xpose.msra.mxu0 %v6922_v52  ;;  %1009 = vmatpush1.bf16.xpose.msra.mxu1 %v6925_v53  ;;  %v422_v52 = vrot.slane %v390_v20, %v7580_v8  ;;  %v1705_v53 = vunpack.c.l.b16 %v498_v40 }
  0x85   :  { %1066 = vmatprep.subr.bf16.mxu0 %v6930_v54  ;;  %1126 = vmatprep.subr.bf16.mxu1 %v6933_v55  ;;  %v7659_v54 = vld [vmem:[#allocation5 + $0x1c] ss:$2 sm:$0x3]  ;;  %v466_v55 = vrot.slane %v7655_v47, %v7577_v7 }
  0x8b   :  { %967 = vmatmul.mubr.bf16.vlgmr.msra.gmra.mxu0 %v7624_v41  ;;  %1027 = vmatmul.mubr.bf16.vlgmr.msra.gmra.mxu1 %v7624_v41 }
  0x8c   :  { %1067 = vmatpush1.bf16.xpose.msra.mxu0 %v6928_v56  ;;  %1127 = vmatpush1.bf16.xpose.msra.mxu1 %v6931_v57  ;;  %v1730_v56 = vrot.slane %v1703_v45, 6  ;;  %v502_v57 = vpack.c.bf16 %v458_v48, %v458_v48  ;;  %v470_v45 = vrot.slane %v7659_v54, %v7580_v8  ;;  %v503_v48 = vpack.c.bf16 %v462_v39, %v462_v39 }
  0x8d   :  { %1068 = vmatprep.subr.bf16.mxu0 %v6936_v58  ;;  %1128 = vmatprep.subr.bf16.mxu1 %v6939_v59  ;;  %v1729_v58 = vsel %vm636_vm0, %v1728_v50, %v1699_v49  ;;  %v430_v59 = vrot.slane %v392_v21, %v7580_v8 }
  0x8e   :  { %1086 = vmatprep.mubr.bf16.mxu0 %v7613_v24  ;;  %1146 = vmatprep.mubr.bf16.mxu1 %v7613_v24 }
  0x94   :  { %1069 = vmatpush1.bf16.xpose.msra.mxu0 %v6934_v60  ;;  %1129 = vmatpush1.bf16.xpose.msra.mxu1 %v6937_v61  ;;  %v1707_v60 = vunpack.c.l.b16 %v500_v51  ;;  %v414_v61 = vrot.slane %v388_v23, %v7580_v8 }
  0x95   :  { %1186 = vmatprep.subr.bf16.mxu0 %v6942_v62  ;;  %1246 = vmatprep.subr.bf16.mxu1 %v6945_v63  ;;  %v493_v62 = vpack.c.bf16 %v422_v52, %v422_v52  ;;  %v474_v63 = vrot.slane %v7659_v54, %v7577_v7  ;;  %v6988_v52 = vld [vmem:[#allocation10 + $0x10] ss:$8 sps:$4 sm:$0xff]  }
  0x9b   :  { %1087 = vmatmul.mubr.bf16.vlgmr.msra.gmra.mxu0 %v7624_v41  ;;  %1147 = vmatmul.mubr.bf16.vlgmr.msra.gmra.mxu1 %v7624_v41 }
  0x9c   :  { %1187 = vmatpush1.bf16.xpose.msra.mxu0 %v6940_v2  ;;  %1247 = vmatpush1.bf16.xpose.msra.mxu1 %v6943_v3  ;;  %v1732_v2 = vrot.slane %v1705_v53, 5  ;;  %v6976_v3 = vld [vmem:[#allocation7 + $0x1d0] ss:$8 sps:$4 sm:$0xff]   ;;  %v6991_v53 = vld [vmem:[#allocation10 + $0x30] ss:$8 sps:$4 sm:$0xff]  }
  0x9d   :  { %1188 = vmatprep.subr.bf16.mxu0 %v6948_v4  ;;  %1248 = vmatprep.subr.bf16.mxu1 %v6951_v5  ;;  %v6979_v4 = vld [vmem:[#allocation7 + $0x1f0] ss:$8 sps:$4 sm:$0xff]   ;;  %v504_v5 = vpack.c.bf16 %v466_v55, %v466_v55  ;;  %v505_v55 = vpack.c.bf16 %v470_v45, %v470_v45 }
  0x9e   :  { %1206 = vmatprep.mubr.bf16.mxu0 %v7613_v24  ;;  %1266 = vmatprep.mubr.bf16.mxu1 %v7613_v24 }
  0x9f   :  { %v1711_v20 = vunpack.c.l.b16 %v504_v5 }
  0xa4   :  { %1189 = vmatpush1.bf16.xpose.msra.mxu0 %v6946_v6  ;;  %1249 = vmatpush1.bf16.xpose.msra.mxu1 %v6949_v9  ;;  %v1731_v6 = vsel %vm639_vm1, %v1730_v56, %v1729_v58  ;;  %v438_v9 = vrot.slane %v394_v27, %v7580_v8  ;;  %v6999_v58 = vld [vmem:[#allocation10 + $0x24] ss:$8 sps:$4 sm:$0xff]  }
  0xa5   :  { %1306 = vmatprep.subr.bf16.mxu0 %v6954_v10  ;;  %1366 = vmatprep.subr.bf16.mxu1 %v6957_v11  ;;  %v6984_v10 = vld [vmem:[#allocation7 + $0x1c4] ss:$8 sps:$4 sm:$0xff]  }
  0xa6   :  { %v6987_v11 = vld [vmem:[#allocation7 + $0x1e4] ss:$8 sps:$4 sm:$0xff]   ;;  %v497_v21 = vpack.c.bf16 %v438_v9, %v438_v9 }
  0xa7   :  { %v7005_v9 = vld [vmem:[#allocation10 + $0x74] ss:$8 sps:$4 sm:$0xff]  }
  0xa8   :  { %v1704_v34 = vunpack.c.l.b16 %v497_v21  ;;  %v7015_v21 = vld [vmem:[#allocation10 + $0xb0] ss:$8 sps:$4 sm:$0xff]  }
  0xab   :  { %1207 = vmatmul.mubr.bf16.vlgmr.msra.gmra.mxu0 %v7624_v41  ;;  %1267 = vmatmul.mubr.bf16.vlgmr.msra.gmra.mxu1 %v7624_v41 }
  0xac   :  { %1307 = vmatpush1.bf16.xpose.msra.mxu0 %v6952_v12  ;;  %1367 = vmatpush1.bf16.xpose.msra.mxu1 %v6955_v13  ;;  %v1709_v12 = vunpack.c.l.b16 %v502_v57  ;;  %v495_v13 = vpack.c.bf16 %v430_v59, %v430_v59  ;;  %v6996_v57 = vld [vmem:[#allocation10 + $0x4] ss:$8 sps:$4 sm:$0xff]   ;;  %v1710_v59 = vunpack.c.l.b16 %v503_v48 }
  0xad   :  { %1308 = vmatprep.subr.bf16.mxu0 %v6960_v14  ;;  %1368 = vmatprep.subr.bf16.mxu1 %v6963_v15  ;;  %v1734_v14 = vrot.slane %v1707_v60, 4  ;;  %v491_v15 = vpack.c.bf16 %v414_v61, %v414_v61 }
  0xae   :  { %1326 = vmatprep.mubr.bf16.mxu0 %v7613_v24  ;;  %1386 = vmatprep.mubr.bf16.mxu1 %v7613_v24  ;;  %v1736_v22 = vrot.slane %v1709_v12, 3  ;;  %v1702_v23 = vunpack.c.l.b16 %v495_v13  ;;  %v7000_v12 = vld [vmem:[#allocation10 + $0x50] ss:$8 sps:$4 sm:$0xff]  }
  0xaf   :  { %v1698_v27 = vunpack.c.l.b16 %v491_v15  ;;  %v7003_v13 = vld [vmem:[#allocation10 + $0x70] ss:$8 sps:$4 sm:$0xff]   ;;  %v7011_v15 = vld [vmem:[#allocation10 + $0x64] ss:$8 sps:$4 sm:$0xff]  }
  0xb4   :  { %1309 = vmatpush1.bf16.xpose.msra.mxu0 %v6958_v17  ;;  %1369 = vmatpush1.bf16.xpose.msra.mxu1 %v6961_v16  ;;  %v1700_v17 = vunpack.c.l.b16 %v493_v62  ;;  %v506_v16 = vpack.c.bf16 %v474_v63, %v474_v63  ;;  %v1712_v62 = vunpack.c.l.b16 %v505_v55  ;;  %v1724_v63 = vrot.slane %v1710_v59, 2 }
  0xb5   :  { %1426 = vmatprep.subr.bf16.mxu0 %v6966_v18  ;;  %1486 = vmatprep.subr.bf16.mxu1 %v6969_v19  ;;  %v1733_v18 = vsel %vm642_vm2, %v1732_v2, %v1731_v6  ;;  %v446_v19 = vrot.slane %v396_v33, %v7580_v8  ;;  %v1738_v33 = vrot.slane %v1711_v20, 2  ;;  %v7002_v6 = vld [vmem:[#allocation10 + $0x54] ss:$8 sps:$4 sm:$0xff]   ;;  %v7012_v20 = vld [vmem:[#allocation10 + $0x90] ss:$8 sps:$4 sm:$0xff]  }
  0xb6   :  { %v1714_v28 = vrot.slane %v1700_v17, 7  ;;  %v1726_v5 = vrot.slane %v1712_v62, 1  ;;  %v7006_v17 = vld [vmem:[#allocation10 + $0x40] ss:$8 sps:$4 sm:$0xff]  }
  0xbb   :  { %1327 = vmatmul.mubr.bf16.vlgmr.msra.gmra.mxu0 %v7624_v41  ;;  %1387 = vmatmul.mubr.bf16.vlgmr.msra.gmra.mxu1 %v7624_v41 }
  0xbc   :  { %1427 = vmatpush1.bf16.xpose.msra.mxu0 %v6964_v25  ;;  %1487 = vmatpush1.bf16.xpose.msra.mxu1 %v6967_v26  ;;  %v1735_v25 = vsel %vm645_vm3, %v1734_v14, %v1733_v18  ;;  %v454_v26 = vrot.slane %v398_v38, %v7580_v8  ;;  %v7008_v14 = vld [vmem:[#allocation10 + $0x44] ss:$8 sps:$4 sm:$0xff]   ;;  %v7014_v18 = vld [vmem:[#allocation10 + $0x94] ss:$8 sps:$4 sm:$0xff]  }
  0xbd   :  { %1428 = vmatprep.subr.bf16.mxu0 %v6972_v29  ;;  %1488 = vmatprep.subr.bf16.mxu1 %v6975_v30  ;;  %v1713_v29 = vunpack.c.l.b16 %v506_v16  ;;  %v499_v30 = vpack.c.bf16 %v446_v19, %v446_v19  ;;  %v1737_v37 = vsel %vm648_vm4, %v1736_v22, %v1735_v25  ;;  %v7009_v16 = vld [vmem:[#allocation10 + $0x60] ss:$8 sps:$4 sm:$0xff]   ;;  %v7017_v19 = vld [vmem:[#allocation10 + $0xb4] ss:$8 sps:$4 sm:$0xff]   ;;  %v7020_v22 = vld [vmem:[#allocation10 + $0x84] ss:$8 sps:$4 sm:$0xff]  }
  0xbe   :  { %1446 = vmatprep.mubr.bf16.mxu0 %v7613_v24  ;;  %1506 = vmatprep.mubr.bf16.mxu1 %v7613_v24  ;;  %v501_v40 = vpack.c.bf16 %v454_v26, %v454_v26  ;;  %v7018_v25 = vld [vmem:[#allocation10 + $0x80] ss:$8 sps:$4 sm:$0xff]  }
  0xbf   :  { %v1740_v38 = vrot.slane %v1713_v29, 1  ;;  %v7021_v26 = vld [vmem:[#allocation10 + $0xa0] ss:$8 sps:$4 sm:$0xff]   ;;  %v7024_v29 = vld [vmem:[#allocation10 + $0xd0] ss:$8 sps:$4 sm:$0xff]  }
  0xc0   :  { %v1708_v47 = vunpack.c.l.b16 %v501_v40 }
  0xc2   :  { %v1722_v54 = vrot.slane %v1708_v47, 3 }
  0xc4   :  { %1429 = vmatpush1.bf16.xpose.msra.mxu0 %v6970_v42  ;;  %1489 = vmatpush1.bf16.xpose.msra.mxu1 %v6973_v43  ;;  %v1715_v42 = vsel %vm636_vm0, %v1714_v28, %v1698_v27  ;;  %v1706_v43 = vunpack.c.l.b16 %v499_v30  ;;  %v7026_v27 = vld [vmem:[#allocation10 + $0xd4] ss:$8 sps:$4 sm:$0xff]   ;;  %v7027_v30 = vld [vmem:[#allocation10 + $0xf0] ss:$8 sps:$4 sm:$0xff]  }
  0xc5   :  { %1546 = vmatprep.subr.bf16.mxu0 %v6978_v44  ;;  %1606 = vmatprep.subr.bf16.mxu1 %v6981_v46  ;;  %v1739_v44 = vsel %vm651_vm5, %v1738_v33, %v1737_v37  ;;  %v1718_v46 = vrot.slane %v1704_v34, 5  ;;  %v7029_v28 = vld [vmem:[#allocation10 + $0xf4] ss:$8 sps:$4 sm:$0xff]   ;;  %v7030_v33 = vld [vmem:[#allocation10 + $0xc0] ss:$8 sps:$4 sm:$0xff]  }
  0xc6   :  { %v1741_v50 = vsel %vm654_vm6, %v1740_v38, %v1739_v44  ;;  %v1720_v51 = vrot.slane %v1706_v43, 4  ;;  %v7033_v34 = vld [vmem:[#allocation10 + $0xe0] ss:$8 sps:$4 sm:$0xff]  }
  0xc7   :  { %v7688_v60 = vpack.c.b16 %v1741_v50, %v1741_v50 }
  0xcb   :  { %1447 = vmatmul.mubr.bf16.vlgmr.msra.gmra.mxu0 %v7624_v41  ;;  %1507 = vmatmul.mubr.bf16.vlgmr.msra.gmra.mxu1 %v7624_v41 }
  0xcc   :  { %1547 = vmatpush1.bf16.xpose.msra.mxu0 %v6976_v3  ;;  %1607 = vmatpush1.bf16.xpose.msra.mxu1 %v6979_v4  ;;  %v6994_v3 = vld [vmem:[#allocation10] ss:$8 sps:$4 sm:$0xff]  }
  0xcd   :  { %1548 = vmatprep.subr.bf16.mxu0 %v6984_v10  ;;  %1608 = vmatprep.subr.bf16.mxu1 %v6987_v11  ;;  %v6997_v4 = vld [vmem:[#allocation10 + $0x20] ss:$8 sps:$4 sm:$0xff]  }
  0xce   :  { %1566 = vmatprep.mubr.bf16.mxu0 %v7613_v24  ;;  %1626 = vmatprep.mubr.bf16.mxu1 %v7613_v24  ;;  %v1716_v24 = vrot.slane %v1702_v23, 6  ;;  %v7023_v23 = vld [vmem:[#allocation10 + $0xa4] ss:$8 sps:$4 sm:$0xff]  }
  0xd0   :  { %v1717_v49 = vsel %vm639_vm1, %v1716_v24, %v1715_v42 }
  0xd1   :  { %v1719_v56 = vsel %vm642_vm2, %v1718_v46, %v1717_v49 }
  0xd2   :  { %v1721_v61 = vsel %vm645_vm3, %v1720_v51, %v1719_v56 }
  0xd3   :  { %v1723_v2 = vsel %vm648_vm4, %v1722_v54, %v1721_v61 }
  0xd4   :  { %1549 = vmatpush1.bf16.xpose.msra.mxu0 %v6982_v31  ;;  %1609 = vmatpush1.bf16.xpose.msra.mxu1 %v6985_v32  ;;  %v7032_v31 = vld [vmem:[#allocation10 + $0xc4] ss:$8 sps:$4 sm:$0xff]  }
  0xd5   :  { %1778 = vmatprep.subr.bf16.mxu0 %v6990_v35  ;;  %1838 = vmatprep.subr.bf16.mxu1 %v6993_v36  ;;  %v7035_v32 = vld [vmem:[#allocation10 + $0xe4] ss:$8 sps:$4 sm:$0xff]   ;;  %v7484_v35 = vmov 0.0  }
  0xdb   :  { %1567 = vmatmul.mubr.bf16.vlgmr.msra.gmra.mxu0 %v7624_v41  ;;  %1627 = vmatmul.mubr.bf16.vlgmr.msra.gmra.mxu1 %v7624_v41  ;;  %v1725_v41 = vsel %vm651_vm5, %v1724_v63, %v1723_v2 }
  0xdc   :  { %1779 = vmatpush1.bf16.xpose.msra.mxu0 %v6988_v52  ;;  %1839 = vmatpush1.bf16.xpose.msra.mxu1 %v6991_v53  ;;  %v1727_v10 = vsel %vm654_vm6, %v1726_v5, %v1725_v41 }
  0xdd   :  { %1780 = vmatprep.subr.bf16.mxu0 %v6996_v57  ;;  %1840 = vmatprep.subr.bf16.mxu1 %v6999_v58  ;;  %v1742_v11 = vpack.c.b16 %v1727_v10, %v1727_v10 }
  0xde   :  { %1798 = vmatprep.mubr.bf16.mxu0 %v7688_v60  ;;  %1858 = vmatprep.mubr.bf16.mxu1 %v7688_v60 }
  0xe4   :  { %1781 = vmatpush1.bf16.xpose.msra.mxu0 %v6994_v3  ;;  %1841 = vmatpush1.bf16.xpose.msra.mxu1 %v6997_v4 }
  0xe5   :  { %1898 = vmatprep.subr.bf16.mxu0 %v7002_v6  ;;  %1958 = vmatprep.subr.bf16.mxu1 %v7005_v9  ;;  %v6426_v6 = vld [vmem:[#allocation8 + $0x8] ss:$0 sm:$0xff]  ;;  %v6427_v9 = vld [vmem:[#allocation8 + $0x9] ss:$0 sm:$0xff] }
  0xeb   :  { %1799 = vmatmul.mubr.bf16.vlgmr.msra.gmra.mxu0 %v1742_v11  ;;  %1859 = vmatmul.mubr.bf16.vlgmr.msra.gmra.mxu1 %v1742_v11 }
  0xec   :  { %1899 = vmatpush1.bf16.xpose.msra.mxu0 %v7000_v12  ;;  %1959 = vmatpush1.bf16.xpose.msra.mxu1 %v7003_v13 }
  0xed   :  { %1900 = vmatprep.subr.bf16.mxu0 %v7008_v14  ;;  %1960 = vmatprep.subr.bf16.mxu1 %v7011_v15 }
  0xee   :  { %1918 = vmatprep.mubr.bf16.mxu0 %v7688_v60  ;;  %1978 = vmatprep.mubr.bf16.mxu1 %v7688_v60 }
  0xf4   :  { %1901 = vmatpush1.bf16.xpose.msra.mxu0 %v7006_v17  ;;  %1961 = vmatpush1.bf16.xpose.msra.mxu1 %v7009_v16  ;;  %v6418_v16 = vld [vmem:[#allocation8] ss:$0 sm:$0xff] }
  0xf5   :  { %2018 = vmatprep.subr.bf16.mxu0 %v7014_v18  ;;  %2078 = vmatprep.subr.bf16.mxu1 %v7017_v19  ;;  %v6419_v18 = vld [vmem:[#allocation8 + $0x1] ss:$0 sm:$0xff] }
  0xfb   :  { %1919 = vmatmul.mubr.bf16.vlgmr.msra.gmra.mxu0 %v1742_v11  ;;  %1979 = vmatmul.mubr.bf16.vlgmr.msra.gmra.mxu1 %v1742_v11 }
  0xfc   :  { %2019 = vmatpush1.bf16.xpose.msra.mxu0 %v7012_v20  ;;  %2079 = vmatpush1.bf16.xpose.msra.mxu1 %v7015_v21 }
  0xfd   :  { %2020 = vmatprep.subr.bf16.mxu0 %v7020_v22  ;;  %2080 = vmatprep.subr.bf16.mxu1 %v7023_v23 }
  0xfe   :  { %2038 = vmatprep.mubr.bf16.mxu0 %v7688_v60  ;;  %2098 = vmatprep.mubr.bf16.mxu1 %v7688_v60 }
 0x104   :  { %2021 = vmatpush1.bf16.xpose.msra.mxu0 %v7018_v25  ;;  %2081 = vmatpush1.bf16.xpose.msra.mxu1 %v7021_v26 }
 0x105   :  { %2138 = vmatprep.subr.bf16.mxu0 %v7026_v27  ;;  %2198 = vmatprep.subr.bf16.mxu1 %v7029_v28 }
 0x10b   :  { %2039 = vmatmul.mubr.bf16.vlgmr.msra.gmra.mxu0 %v1742_v11  ;;  %2099 = vmatmul.mubr.bf16.vlgmr.msra.gmra.mxu1 %v1742_v11 }
 0x10c   :  { %2139 = vmatpush1.bf16.xpose.msra.mxu0 %v7024_v29  ;;  %2199 = vmatpush1.bf16.xpose.msra.mxu1 %v7027_v30  ;;  %v6428_v30 = vld [vmem:[#allocation8 + $0xa] ss:$0 sm:$0xff] }
 0x10d   :  { %2140 = vmatprep.subr.bf16.mxu0 %v7032_v31  ;;  %2200 = vmatprep.subr.bf16.mxu1 %v7035_v32  ;;  %v6429_v31 = vld [vmem:[#allocation8 + $0xb] ss:$0 sm:$0xff] }
 0x10e   :  { %2158 = vmatprep.mubr.bf16.mxu0 %v7688_v60  ;;  %2218 = vmatprep.mubr.bf16.mxu1 %v7688_v60 }
 0x114   :  { %2141 = vmatpush1.bf16.xpose.msra.mxu0 %v7030_v33  ;;  %2201 = vmatpush1.bf16.xpose.msra.mxu1 %v7033_v34 }
 0x115   :  { %6682 = vmatprep.subr.bf16.mxu0 %v7484_v35  ;;  %6688 = vmatprep.subr.bf16.mxu1 %v7484_v35 }
 0x11b   :  { %2159 = vmatmul.mubr.bf16.vlgmr.msra.gmra.mxu0 %v1742_v11  ;;  %2219 = vmatmul.mubr.bf16.vlgmr.msra.gmra.mxu1 %v1742_v11 }
 0x11c   :  { %6684 = vmatprep.mubr.msk.bf16.mxu0 %vm7485_vm7, %v7484_v35  ;;  %6690 = vmatprep.mubr.msk.bf16.mxu1 %vm7485_vm7, %v7484_v35 }
 0x12b   :  { %v728_v36 = vpop.f32.mrf.mxu0  ;;  %v788_v37 = vpop.f32.mrf.mxu1 }
 0x12c   :  { %v729_v26 = vadd.f32 %v6418_v16, %v728_v36  ;;  %v789_v27 = vadd.f32 %v6419_v18, %v788_v37  ;;  %v6432_v18 = vld [vmem:[#allocation8 + $0xe] ss:$0 sm:$0xff] }
 0x12d   :  { %v730_v39 = vpop.f32.mrf.mxu0  ;;  %v790_v24 = vpop.f32.mrf.mxu1 }
 0x12e   :  { %v2226_v28 = vpack.c.bf16 %v729_v26, %v729_v26  ;;  %v2227_v29 = vpack.c.bf16 %v789_v27, %v789_v27  ;;  %v6424_v27 = vld [vmem:[#allocation8 + $0x6] ss:$0 sm:$0xff] }
 0x12f   :  { %v731_v40 = vpop.f32.mrf.mxu0  ;;  %v791_v42 = vpop.f32.mrf.mxu1 }
 0x130   :  { %v6420_v42 = vld [vmem:[#allocation8 + $0x2] ss:$0 sm:$0xff] }
 0x131   :  { %v732_v38 = vpop.f32.mrf.mxu0  ;;  %v792_v43 = vpop.f32.mrf.mxu1 }
 0x132   :  { %v6421_v38 = vld [vmem:[#allocation8 + $0x3] ss:$0 sm:$0xff] }
 0x13b   :  { %v7710_v44 = vpop.f32.mrf.mxu0  ;;  %v7712_v45 = vpop.f32.mrf.mxu1 }
 0x13d   :  { %v850_v46 = vpop.f32.mrf.mxu0  ;;  %v910_v48 = vpop.f32.mrf.mxu1 }
 0x13f   :  { %v851_v49 = vpop.f32.mrf.mxu0  ;;  %v911_v47 = vpop.f32.mrf.mxu1 }
 0x141   :  { %v852_v50 = vpop.f32.mrf.mxu0  ;;  %v912_v51 = vpop.f32.mrf.mxu1 }
 0x142   :  { %v849_v51 = vadd.f32 %v6420_v42, %v7710_v44 }
 0x14b   :  { %v7714_v52 = vpop.f32.mrf.mxu0  ;;  %v7716_v53 = vpop.f32.mrf.mxu1 }
 0x14d   :  { %v970_v55 = vpop.f32.mrf.mxu0  ;;  %v1030_v56 = vpop.f32.mrf.mxu1 }
 0x14e   :  { %v909_v55 = vadd.f32 %v6421_v38, %v7712_v45  ;;  %v2228_v56 = vpack.c.bf16 %v849_v51, %v849_v51 }
 0x14f   :  { %v971_v57 = vpop.f32.mrf.mxu0  ;;  %v1031_v58 = vpop.f32.mrf.mxu1 }
 0x150   :  { %v2229_v57 = vpack.c.bf16 %v909_v55, %v909_v55  ;;  %v6430_v58 = vld [vmem:[#allocation8 + $0xc] ss:$0 sm:$0xff] }
 0x151   :  { %v972_v59 = vpop.f32.mrf.mxu0  ;;  %v1032_v60 = vpop.f32.mrf.mxu1 }
 0x152   :  { %v6431_v59 = vld [vmem:[#allocation8 + $0xd] ss:$0 sm:$0xff] }
 0x15b   :  { %v7718_v54 = vpop.f32.mrf.mxu0  ;;  %v7720_v61 = vpop.f32.mrf.mxu1 }
 0x15d   :  { %v1090_v62 = vpop.f32.mrf.mxu0  ;;  %v1150_v63 = vpop.f32.mrf.mxu1 }
 0x15f   :  { %v1091_v2 = vpop.f32.mrf.mxu0  ;;  %v1151_v3 = vpop.f32.mrf.mxu1 }
 0x161   :  { %v1092_v4 = vpop.f32.mrf.mxu0  ;;  %v1152_v5 = vpop.f32.mrf.mxu1 }
 0x162   :  { %v6422_v5 = vld [vmem:[#allocation8 + $0x4] ss:$0 sm:$0xff] }
 0x16b   :  { %v1208_v41 = vpop.f32.mrf.mxu0  ;;  %v1268_v10 = vpop.f32.mrf.mxu1 }
 0x16c   :  { %v1209_v11 = vadd.f32 %v6426_v6, %v1208_v41  ;;  %v1269_v12 = vadd.f32 %v6427_v9, %v1268_v10  ;;  %v6423_v6 = vld [vmem:[#allocation8 + $0x5] ss:$0 sm:$0xff] }
 0x16d   :  { %v1210_v13 = vpop.f32.mrf.mxu0  ;;  %v1270_v14 = vpop.f32.mrf.mxu1 }
 0x16e   :  { %v2234_v15 = vpack.c.bf16 %v1209_v11, %v1209_v11  ;;  %v2235_v17 = vpack.c.bf16 %v1269_v12, %v1269_v12  ;;  %v969_v14 = vadd.f32 %v6422_v5, %v7714_v52 }
 0x16f   :  { %v1211_v19 = vpop.f32.mrf.mxu0  ;;  %v1271_v20 = vpop.f32.mrf.mxu1 }
 0x170   :  { %v2247_v21 = vsel %vm2242_vm8, %v2234_v15, 0  ;;  %v2293_v22 = vsel %vm2242_vm8, %v2235_v17, 0  ;;  %v1029_v15 = vadd.f32 %v6423_v6, %v7716_v53  ;;  %v2230_v17 = vpack.c.bf16 %v969_v14, %v969_v14  ;;  %v6433_v19 = vld [vmem:[#allocation8 + $0xf] ss:$0 sm:$0xff] }
 0x171   :  { %v1212_v23 = vpop.f32.mrf.mxu0  ;;  %v1272_v25 = vpop.f32.mrf.mxu1  ;;  %6683 = vmatpush3.bf16.xpose.msra.mxu0 %v2247_v21  ;;  %6689 = vmatpush3.bf16.xpose.msra.mxu1 %v2293_v22 }
 0x172   :  { %6694 = vmatprep.subr.bf16.mxu0 %v7484_v35  ;;  %6700 = vmatprep.subr.bf16.mxu1 %v7484_v35  ;;  %v2231_v16 = vpack.c.bf16 %v1029_v15, %v1029_v15 }
 0x178   :  { %6685 = vmatmul.mubr.msk.bf16.vlgmr.msra.gmra.mxu0 %vm2242_vm8, %v2226_v28  ;;  %6691 = vmatmul.mubr.msk.bf16.vlgmr.msra.gmra.mxu1 %vm2242_vm8, %v2227_v29  ;;  %v6425_v28 = vld [vmem:[#allocation8 + $0x7] ss:$0 sm:$0xff] }
 0x179   :  { %6696 = vmatprep.mubr.msk.bf16.mxu0 %vm7485_vm7, %v7484_v35  ;;  %6702 = vmatprep.mubr.msk.bf16.mxu1 %vm7485_vm7, %v7484_v35 }
 0x17b   :  { %v1328_v32 = vpop.f32.mrf.mxu0  ;;  %v1388_v33 = vpop.f32.mrf.mxu1 }
 0x17c   :  { %v1329_v34 = vadd.f32 %v6428_v30, %v1328_v32  ;;  %v1389_v36 = vadd.f32 %v6429_v31, %v1388_v33 }
 0x17d   :  { %v1330_v37 = vpop.f32.mrf.mxu0  ;;  %v1390_v39 = vpop.f32.mrf.mxu1 }
 0x17e   :  { %v2236_v24 = vpack.c.bf16 %v1329_v34, %v1329_v34  ;;  %v2237_v40 = vpack.c.bf16 %v1389_v36, %v1389_v36  ;;  %v1089_v36 = vadd.f32 %v6424_v27, %v7718_v54  ;;  %v1149_v37 = vadd.f32 %v6425_v28, %v7720_v61  ;;  %v6499_v54 = vld [vmem:[%s8351_s5 + $0x1] ss:$0 sm:$0xff] }
 0x17f   :  { %v1331_v43 = vpop.f32.mrf.mxu0  ;;  %v1391_v46 = vpop.f32.mrf.mxu1 }
 0x180   :  { %v2339_v48 = vsel %vm2242_vm8, %v2236_v24, 0  ;;  %v2385_v49 = vsel %vm2242_vm8, %v2237_v40, 0  ;;  %v2232_v39 = vpack.c.bf16 %v1089_v36, %v1089_v36  ;;  %v2233_v24 = vpack.c.bf16 %v1149_v37, %v1149_v37  ;;  %v6498_v40 = vld [vmem:[%s8351_s5] ss:$0 sm:$0xff] }
 0x181   :  { %v1332_v47 = vpop.f32.mrf.mxu0  ;;  %v1392_v50 = vpop.f32.mrf.mxu1  ;;  %6695 = vmatpush3.bf16.xpose.msra.mxu0 %v2339_v48  ;;  %6701 = vmatpush3.bf16.xpose.msra.mxu1 %v2385_v49 }
 0x182   :  { %6706 = vmatprep.subr.bf16.mxu0 %v7484_v35  ;;  %6712 = vmatprep.subr.bf16.mxu1 %v7484_v35 }
 0x188   :  { %6697 = vmatmul.mubr.msk.bf16.vlgmr.msra.gmra.mxu0 %vm2242_vm8, %v2228_v56  ;;  %6703 = vmatmul.mubr.msk.bf16.vlgmr.msra.gmra.mxu1 %vm2242_vm8, %v2229_v57 }
 0x189   :  { %6708 = vmatprep.mubr.msk.bf16.mxu0 %vm7485_vm7, %v7484_v35  ;;  %6714 = vmatprep.mubr.msk.bf16.mxu1 %vm7485_vm7, %v7484_v35 }
 0x18b   :  { %v1448_v44 = vpop.f32.mrf.mxu0  ;;  %v1508_v45 = vpop.f32.mrf.mxu1 }
 0x18c   :  { %v1449_v60 = vadd.f32 %v6430_v58, %v1448_v44  ;;  %v1509_v62 = vadd.f32 %v6431_v59, %v1508_v45 }
 0x18d   :  { %v1450_v63 = vpop.f32.mrf.mxu0  ;;  %v1510_v2 = vpop.f32.mrf.mxu1 }
 0x18e   :  { %v2238_v3 = vpack.c.bf16 %v1449_v60, %v1449_v60  ;;  %v2239_v4 = vpack.c.bf16 %v1509_v62, %v1509_v62 }
 0x18f   :  { %v1451_v9 = vpop.f32.mrf.mxu0  ;;  %v1511_v41 = vpop.f32.mrf.mxu1 }
 0x190   :  { %v2431_v10 = vsel %vm2242_vm8, %v2238_v3, 0  ;;  %v2477_v11 = vsel %vm2242_vm8, %v2239_v4, 0 }
 0x191   :  { %v1452_v12 = vpop.f32.mrf.mxu0  ;;  %v1512_v13 = vpop.f32.mrf.mxu1  ;;  %6707 = vmatpush3.bf16.xpose.msra.mxu0 %v2431_v10  ;;  %6713 = vmatpush3.bf16.xpose.msra.mxu1 %v2477_v11 }
 0x192   :  { %6718 = vmatprep.subr.bf16.mxu0 %v7484_v35  ;;  %6724 = vmatprep.subr.bf16.mxu1 %v7484_v35 }
 0x198   :  { %6709 = vmatmul.mubr.msk.bf16.vlgmr.msra.gmra.mxu0 %vm2242_vm8, %v2230_v17  ;;  %6715 = vmatmul.mubr.msk.bf16.vlgmr.msra.gmra.mxu1 %vm2242_vm8, %v2231_v16 }
 0x199   :  { %6720 = vmatprep.mubr.msk.bf16.mxu0 %vm7485_vm7, %v7484_v35  ;;  %6726 = vmatprep.mubr.msk.bf16.mxu1 %vm7485_vm7, %v7484_v35 }
 0x19b   :  { %v1568_v52 = vpop.f32.mrf.mxu0  ;;  %v1628_v53 = vpop.f32.mrf.mxu1 }
 0x19c   :  { %v1569_v20 = vadd.f32 %v6432_v18, %v1568_v52  ;;  %v1629_v21 = vadd.f32 %v6433_v19, %v1628_v53 }
 0x19d   :  { %v1570_v22 = vpop.f32.mrf.mxu0  ;;  %v1630_v23 = vpop.f32.mrf.mxu1 }
 0x19e   :  { %v2240_v25 = vpack.c.bf16 %v1569_v20, %v1569_v20  ;;  %v2241_v26 = vpack.c.bf16 %v1629_v21, %v1629_v21 }
 0x19f   :  { %v1571_v29 = vpop.f32.mrf.mxu0  ;;  %v1631_v30 = vpop.f32.mrf.mxu1 }
 0x1a0   :  { %v2523_v31 = vsel %vm2242_vm8, %v2240_v25, 0  ;;  %v2569_v32 = vsel %vm2242_vm8, %v2241_v26, 0 }
 0x1a1   :  { %v1572_v33 = vpop.f32.mrf.mxu0  ;;  %v1632_v34 = vpop.f32.mrf.mxu1  ;;  %6719 = vmatpush3.bf16.xpose.msra.mxu0 %v2523_v31  ;;  %6725 = vmatpush3.bf16.xpose.msra.mxu1 %v2569_v32 }
 0x1a2   :  { %6730 = vmatprep.subr.bf16.mxu0 %v7484_v35  ;;  %6736 = vmatprep.subr.bf16.mxu1 %v7484_v35 }
 0x1a8   :  { %6721 = vmatmul.mubr.msk.bf16.vlgmr.msra.gmra.mxu0 %vm2242_vm8, %v2232_v39  ;;  %6727 = vmatmul.mubr.msk.bf16.vlgmr.msra.gmra.mxu1 %vm2242_vm8, %v2233_v24 }
 0x1a9   :  { %6732 = vmatprep.mubr.msk.bf16.mxu0 %vm7485_vm7, %v7484_v35  ;;  %6738 = vmatprep.mubr.msk.bf16.mxu1 %vm7485_vm7, %v7484_v35 }
 0x1ab   :  { %v1800_v61 = vpop.f32.mrf.mxu0  ;;  %v1860_v42 = vpop.f32.mrf.mxu1 }
 0x1ac   :  { %v1801_v38 = vadd.f32 %v6498_v40, %v1800_v61  ;;  %v1861_v43 = vadd.f32 %v6499_v54, %v1860_v42 }
 0x1ad   :  { %v1802_v46 = vpop.f32.mrf.mxu0  ;;  %v1862_v48 = vpop.f32.mrf.mxu1 }
 0x1ae   :  { %v2725_v49 = vpack.c.bf16 %v1801_v38, %v1801_v38  ;;  %v2726_v47 = vpack.c.bf16 %v1861_v43, %v1861_v43 }
 0x1af   :  { %v1803_v50 = vpop.f32.mrf.mxu0  ;;  %v1863_v51 = vpop.f32.mrf.mxu1 }
 0x1b0   :  { %v2738_v55 = vsel %vm2736_vm9, %v2725_v49, 0  ;;  %v2784_v56 = vsel %vm2736_vm9, %v2726_v47, 0 }
 0x1b1   :  { %v1804_v57 = vpop.f32.mrf.mxu0  ;;  %v1864_v58 = vpop.f32.mrf.mxu1  ;;  %6731 = vmatpush3.bf16.msra.mxu0 %v2738_v55  ;;  %6737 = vmatpush3.bf16.msra.mxu1 %v2784_v56 }
 0x1b2   :  { %6742 = vmatprep.subr.bf16.mxu0 %v7484_v35  ;;  %6748 = vmatprep.subr.bf16.mxu1 %v7484_v35 }
 0x1bb   :  { %v7778_v59 = vpop.f32.mrf.mxu0  ;;  %v7780_v44 = vpop.f32.mrf.mxu1 }
 0x1bd   :  { %v1922_v45 = vpop.f32.mrf.mxu0  ;;  %v1982_v60 = vpop.f32.mrf.mxu1 }
 0x1bf   :  { %v1923_v62 = vpop.f32.mrf.mxu0  ;;  %v1983_v63 = vpop.f32.mrf.mxu1 }
 0x1c1   :  { %v1924_v2 = vpop.f32.mrf.mxu0  ;;  %v1984_v3 = vpop.f32.mrf.mxu1 }
 0x1cb   :  { %v7782_v4 = vpop.f32.mrf.mxu0  ;;  %v7784_v5 = vpop.f32.mrf.mxu1 }
 0x1cd   :  { %v2042_v6 = vpop.f32.mrf.mxu0  ;;  %v2102_v9 = vpop.f32.mrf.mxu1 }
 0x1cf   :  { %v2043_v41 = vpop.f32.mrf.mxu0  ;;  %v2103_v10 = vpop.f32.mrf.mxu1 }
 0x1d1   :  { %v2044_v11 = vpop.f32.mrf.mxu0  ;;  %v2104_v12 = vpop.f32.mrf.mxu1 }
 0x1db   :  { %v7786_v13 = vpop.f32.mrf.mxu0  ;;  %v7788_v14 = vpop.f32.mrf.mxu1 }
 0x1dd   :  { %v2162_v15 = vpop.f32.mrf.mxu0  ;;  %v2222_v17 = vpop.f32.mrf.mxu1 }
 0x1df   :  { %v2163_v16 = vpop.f32.mrf.mxu0  ;;  %v2223_v18 = vpop.f32.mrf.mxu1 }
 0x1e1   :  { %v2164_v19 = vpop.f32.mrf.mxu0  ;;  %v2224_v52 = vpop.f32.mrf.mxu1 }
 0x238   :  { %v2283_v53 = vpop.f32.mrf.mxu0  ;;  %v2329_v20 = vpop.f32.mrf.mxu1 }
 0x239   :  { %v2612_v21 = vsel %vm2611_vm10, %v2283_v53, -inf  ;;  %v2615_v27 = vsel %vm2611_vm10, %v2329_v20, -inf }
 0x23a   :  { %v6692_v22 = vpop.f32.mrf.mxu1  ;;  %2613 = vmax.xlane.f32.xlu0 %v2612_v21  ;;  %v6686_v23 = vpop.f32.mrf.mxu0 }
 0x23c   :  { %v2286_v25 = vpop.f32.mrf.mxu0  ;;  %v2332_v26 = vpop.f32.mrf.mxu1 }
 0x23e   :  { %v6693_v28 = vpop.f32.mrf.mxu1  ;;  %2616 = vmax.xlane.f32.xlu0 %v2615_v27  ;;  %v6687_v29 = vpop.f32.mrf.mxu0 }
 0x248   :  { %v2375_v30 = vpop.f32.mrf.mxu0  ;;  %v2421_v31 = vpop.f32.mrf.mxu1 }
 0x249   :  { %v2618_v32 = vsel %vm2611_vm10, %v2375_v30, -inf  ;;  %v2621_v39 = vsel %vm2611_vm10, %v2421_v31, -inf }
 0x24a   :  { %v6704_v33 = vpop.f32.mrf.mxu1  ;;  %2619 = vmax.xlane.f32.xlu1 %v2618_v32  ;;  %v6698_v34 = vpop.f32.mrf.mxu0 }
 0x24c   :  { %v2378_v36 = vpop.f32.mrf.mxu0  ;;  %v2424_v37 = vpop.f32.mrf.mxu1 }
 0x24e   :  { %v6705_v24 = vpop.f32.mrf.mxu1  ;;  %2622 = vmax.xlane.f32.xlu1 %v2621_v39  ;;  %v6699_v40 = vpop.f32.mrf.mxu0 }
 0x258   :  { %v2467_v54 = vpop.f32.mrf.mxu0  ;;  %v2513_v61 = vpop.f32.mrf.mxu1 }
 0x259   :  { %v2627_v42 = vsel %vm2611_vm10, %v2513_v61, -inf  ;;  %v2624_v38 = vsel %vm2611_vm10, %v2467_v54, -inf }
 0x25a   :  { %v6716_v43 = vpop.f32.mrf.mxu1  ;;  %2628 = vmax.xlane.f32.xlu1 %v2627_v42  ;;  %2625 = vmax.xlane.f32.xlu0 %v2624_v38  ;;  %v6710_v46 = vpop.f32.mrf.mxu0 }
 0x25c   :  { %v2470_v48 = vpop.f32.mrf.mxu0  ;;  %v2516_v49 = vpop.f32.mrf.mxu1 }
 0x25e   :  { %v6711_v47 = vpop.f32.mrf.mxu0  ;;  %v6717_v50 = vpop.f32.mrf.mxu1 }
 0x25f   :  { %v6500_v50 = vld [vmem:[%s8351_s5 + $0x2] ss:$0 sm:$0xff] }
 0x268   :  { %v2559_v51 = vpop.f32.mrf.mxu0  ;;  %v2605_v55 = vpop.f32.mrf.mxu1 }
 0x269   :  { %v2633_v56 = vsel %vm2611_vm10, %v2605_v55, -inf  ;;  %v2630_v57 = vsel %vm2611_vm10, %v2559_v51, -inf }
 0x26a   :  { %v6728_v58 = vpop.f32.mrf.mxu1  ;;  %2634 = vmax.xlane.f32.xlu1 %v2633_v56  ;;  %2631 = vmax.xlane.f32.xlu0 %v2630_v57  ;;  %v6722_v45 = vpop.f32.mrf.mxu0 }
 0x26c   :  { %v2562_v60 = vpop.f32.mrf.mxu0  ;;  %v2608_v62 = vpop.f32.mrf.mxu1 }
 0x26e   :  { %v6723_v63 = vpop.f32.mrf.mxu0  ;;  %v6729_v2 = vpop.f32.mrf.mxu1 }
 0x2c3   :  { %v2614_v3 = vpop.xlane.xlu0 %2613 }
 0x2c4   :  { %v2636_v6 = vsub.f32 %v2283_v53, %v2614_v3 }
 0x2c6   :  { %v2644_v9 = vmul.f32 1.442695, %v2636_v6 }
 0x2c7   :  { %v2617_v41 = vpop.xlane.xlu0 %2616 }
 0x2c8   :  { %7084 = vpow2.f32 %v2644_v9  ;;  %v2637_v10 = vsub.f32 %v2329_v20, %v2617_v41  ;;  %v6502_v41 = vld [vmem:[%s8351_s5 + $0x4] ss:$0 sm:$0xff] }
 0x2ca   :  { %v2646_v11 = vmul.f32 1.442695, %v2637_v10  ;;  %v2041_v10 = vadd.f32 %v6502_v41, %v7782_v4 }
 0x2cc   :  { %7086 = vpow2.f32 %v2646_v11  ;;  %v6503_v11 = vld [vmem:[%s8351_s5 + $0x5] ss:$0 sm:$0xff] }
 0x2d3   :  { %v2620_v12 = vpop.xlane.xlu1 %2619 }
 0x2d4   :  { %v2638_v15 = vsub.f32 %v2375_v30, %v2620_v12 }
 0x2d5   :  { %v7085_v17 = vpop.eup %7084 }
 0x2d6   :  { %v2648_v16 = vmul.f32 1.442695, %v2638_v15  ;;  %v2660_v18 = vsel %vm2611_vm10, %v7085_v17, 0.0  ;;  %v2729_v15 = vpack.c.bf16 %v2041_v10, %v2041_v10  ;;  %v7486_v10 = vmov 0  }
 0x2d7   :  { %v2623_v19 = vpop.xlane.xlu1 %2622  ;;  %2661 = vadd.xlane.f32.xlu0 %v2660_v18 }
 0x2d8   :  { %7088 = vpow2.f32 %v2648_v16  ;;  %v2639_v52 = vsub.f32 %v2421_v31, %v2623_v19 }
 0x2d9   :  { %v7087_v21 = vpop.eup %7086 }
 0x2da   :  { %v2650_v22 = vmul.f32 1.442695, %v2639_v52  ;;  %v2663_v53 = vsel %vm2611_vm10, %v7087_v21, 0.0 }
 0x2db   :  { %2664 = vadd.xlane.f32.xlu1 %v2663_v53 }
 0x2dc   :  { %7090 = vpow2.f32 %v2650_v22  ;;  %v2922_v22 = vsel %vm2736_vm9, %v2729_v15, 0  ;;  %v7050_v15 = vld [vmem:[#allocation11 + $0x54] ss:$8 sps:$4 sm:$0xff]  }
 0x2e3   :  { %v2629_v23 = vpop.xlane.xlu1 %2628  ;;  %v2626_v20 = vpop.xlane.xlu0 %2625 }
 0x2e4   :  { %v2641_v25 = vsub.f32 %v2513_v61, %v2629_v23  ;;  %v2640_v26 = vsub.f32 %v2467_v54, %v2626_v20  ;;  %v6505_v20 = vld [vmem:[%s8351_s5 + $0x7] ss:$0 sm:$0xff] }
 0x2e5   :  { %v7800_v27 = vpop.eup %7088 }
 0x2e6   :  { %v2654_v28 = vmul.f32 1.442695, %v2641_v25  ;;  %v2652_v29 = vmul.f32 1.442695, %v2640_v26  ;;  %v2666_v30 = vsel %vm2611_vm10, %v7800_v27, 0.0  ;;  %v2221_v26 = vadd.f32 %v6505_v20, %v7788_v14 }
 0x2e7   :  { %2667 = vadd.xlane.f32.xlu0 %v2666_v30  ;;  %v6504_v25 = vld [vmem:[%s8351_s5 + $0x6] ss:$0 sm:$0xff]  ;;  %v7059_v20 = vld [vmem:[#allocation11 + $0x64] ss:$8 sps:$4 sm:$0xff]  }
 0x2e8   :  { %7092 = vpow2.f32 %v2654_v28  ;;  %v2732_v30 = vpack.c.bf16 %v2221_v26, %v2221_v26 }
 0x2e9   :  { %v7804_v31 = vpop.eup %7090  ;;  %7094 = vpow2.f32 %v2652_v29 }
 0x2ea   :  { %v2669_v32 = vsel %vm2611_vm10, %v7804_v31, 0.0 }
 0x2eb   :  { %2670 = vadd.xlane.f32.xlu1 %v2669_v32 }
 0x2f3   :  { %v2635_v33 = vpop.xlane.xlu1 %2634  ;;  %v2632_v34 = vpop.xlane.xlu0 %2631 }
 0x2f4   :  { %v2643_v36 = vsub.f32 %v2605_v55, %v2635_v33  ;;  %v2642_v37 = vsub.f32 %v2559_v51, %v2632_v34  ;;  %v1921_v51 = vadd.f32 %v6500_v50, %v7778_v59  ;;  %v6501_v55 = vld [vmem:[%s8351_s5 + $0x3] ss:$0 sm:$0xff] }
 0x2f5   :  { %v7808_v39 = vpop.eup %7092  ;;  %v1981_v58 = vadd.f32 %v6501_v55, %v7780_v44 }
 0x2f6   :  { %v7810_v24 = vpop.eup %7094  ;;  %v2658_v40 = vmul.f32 1.442695, %v2643_v36  ;;  %v2656_v54 = vmul.f32 1.442695, %v2642_v37  ;;  %v2675_v61 = vsel %vm2611_vm10, %v7808_v39, 0.0  ;;  %v2727_v57 = vpack.c.bf16 %v1921_v51, %v1921_v51 }
 0x2f7   :  { %2676 = vadd.xlane.f32.xlu1 %v2675_v61  ;;  %v2672_v42 = vsel %vm2611_vm10, %v7810_v24, 0.0  ;;  %v2728_v3 = vpack.c.bf16 %v1981_v58, %v1981_v58  ;;  %v3060_v61 = vsel %vm2736_vm9, %v2732_v30, 0  ;;  %v7065_v30 = vld [vmem:[#allocation11 + $0xb4] ss:$8 sps:$4 sm:$0xff]  }
 0x2f8   :  { %7096 = vpow2.f32 %v2658_v40  ;;  %2673 = vadd.xlane.f32.xlu0 %v2672_v42  ;;  %v2830_v2 = vsel %vm2736_vm9, %v2727_v57, 0 }
 0x2f9   :  { %7098 = vpow2.f32 %v2656_v54  ;;  %v2876_v9 = vsel %vm2736_vm9, %v2728_v3, 0  ;;  %v7038_v54 = vld [vmem:[#allocation11 + $0x14] ss:$8 sps:$4 sm:$0xff]  }
 0x305   :  { %v7816_v38 = vpop.eup %7096 }
 0x306   :  { %v7818_v43 = vpop.eup %7098  ;;  %v2681_v46 = vsel %vm2611_vm10, %v7816_v38, 0.0 }
 0x307   :  { %2682 = vadd.xlane.f32.xlu1 %v2681_v46  ;;  %v2678_v48 = vsel %vm2611_vm10, %v7818_v43, 0.0 }
 0x308   :  { %2679 = vadd.xlane.f32.xlu0 %v2678_v48 }
 0x360   :  { %v2662_v49 = vpop.xlane.xlu0 %2661 }
 0x361   :  { %7100 = vrcp.f32 %v2662_v49 }
 0x364   :  { %v2665_v47 = vpop.xlane.xlu1 %2664 }
 0x365   :  { %7102 = vrcp.f32 %v2665_v47 }
 0x36e   :  { %v7101_v56 = vpop.eup %7100 }
 0x36f   :  { %v7832_v45 = vmul.f32 %v7101_v56, %v7085_v17  ;;  %v2101_v17 = vadd.f32 %v6503_v11, %v7784_v5  ;;  %v7045_v11 = vld [vmem:[#allocation11 + $0x20] ss:$8 sps:$4 sm:$0xff]  }
 0x370   :  { %v2668_v60 = vpop.xlane.xlu0 %2667 }
 0x371   :  { %7104 = vrcp.f32 %v2668_v60  ;;  %v2717_v62 = vpack.c.bf16 %v7832_v45, %v7832_v45  ;;  %v2730_v53 = vpack.c.bf16 %v2101_v17, %v2101_v17  ;;  %v7056_v17 = vld [vmem:[#allocation11 + $0x74] ss:$8 sps:$4 sm:$0xff]  }
 0x372   :  { %v7103_v63 = vpop.eup %7102 }
 0x373   :  { %6733 = vmatmul.mubr.msk.bf16.vlgmr.msra.gmra.mxu0 %vm2611_vm10, %v2717_v62  ;;  %v2687_v59 = vmul.f32 %v7103_v63, %v7087_v21  ;;  %v2968_v23 = vsel %vm2736_vm9, %v2730_v53, 0  ;;  %v7036_v63 = vld [vmem:[#allocation11 + $0x10] ss:$8 sps:$4 sm:$0xff]  }
 0x374   :  { %6743 = vmatpush3.bf16.msra.mxu0 %v2830_v2  ;;  %v2671_v6 = vpop.xlane.xlu1 %2670  ;;  %6744 = vmatprep.mubr.msk.bf16.mxu0 %vm7485_vm7, %v7484_v35 }
 0x375   :  { %7106 = vrcp.f32 %v2671_v6  ;;  %v2718_v44 = vpack.c.bf16 %v2687_v59, %v2687_v59  ;;  %6754 = vmatprep.subr.bf16.mxu0 %v7484_v35  ;;  %v2701_v42 = vsel %vm2611_vm10, %v2687_v59, 0.0  ;;  %v7041_v59 = vld [vmem:[#allocation11 + $0x4] ss:$8 sps:$4 sm:$0xff]  }
 0x377   :  { %6739 = vmatmul.mubr.msk.bf16.vlgmr.msra.gmra.mxu1 %vm2611_vm10, %v2718_v44 }
 0x378   :  { %6749 = vmatpush3.bf16.msra.mxu1 %v2876_v9  ;;  %6750 = vmatprep.mubr.msk.bf16.mxu1 %vm7485_vm7, %v7484_v35 }
 0x379   :  { %6760 = vmatprep.subr.bf16.mxu1 %v7484_v35 }
 0x37e   :  { %v7105_v12 = vpop.eup %7104 }
 0x37f   :  { %v2689_v16 = vmul.f32 %v7105_v12, %v7800_v27  ;;  %v2161_v27 = vadd.f32 %v6504_v25, %v7786_v13  ;;  %v7044_v13 = vld [vmem:[#allocation11 + $0x34] ss:$8 sps:$4 sm:$0xff]   ;;  %v7047_v12 = vld [vmem:[#allocation11 + $0x24] ss:$8 sps:$4 sm:$0xff]  }
 0x380   :  { %v2677_v18 = vpop.xlane.xlu1 %2676 }
 0x381   :  { %7108 = vrcp.f32 %v2677_v18  ;;  %v2674_v19 = vpop.xlane.xlu0 %2673  ;;  %v2719_v52 = vpack.c.bf16 %v2689_v16, %v2689_v16  ;;  %v2731_v32 = vpack.c.bf16 %v2161_v27, %v2161_v27  ;;  %v7048_v18 = vld [vmem:[#allocation11 + $0x50] ss:$8 sps:$4 sm:$0xff]   ;;  %v7062_v27 = vld [vmem:[#allocation11 + $0x94] ss:$8 sps:$4 sm:$0xff]  }
 0x382   :  { %v7107_v21 = vpop.eup %7106  ;;  %7110 = vrcp.f32 %v2674_v19 }
 0x383   :  { %6745 = vmatmul.mubr.msk.bf16.vlgmr.msra.gmra.mxu0 %vm2611_vm10, %v2719_v52  ;;  %v2691_v4 = vmul.f32 %v7107_v21, %v7804_v31  ;;  %v3014_v14 = vsel %vm2736_vm9, %v2731_v32, 0  ;;  %v7053_v52 = vld [vmem:[#allocation11 + $0x44] ss:$8 sps:$4 sm:$0xff]   ;;  %v3731_v32 = vld [vmem:[#allocation2 + $0x5] ss:$2 sm:$0x3] }
 0x384   :  { %6755 = vmatpush3.bf16.msra.mxu0 %v2922_v22  ;;  %6756 = vmatprep.mubr.msk.bf16.mxu0 %vm7485_vm7, %v7484_v35 }
 0x385   :  { %v2720_v5 = vpack.c.bf16 %v2691_v4, %v2691_v4  ;;  %6766 = vmatprep.subr.bf16.mxu0 %v7484_v35  ;;  %v2705_v48 = vsel %vm2611_vm10, %v2691_v4, 0.0  ;;  %v7051_v4 = vld [vmem:[#allocation11 + $0x40] ss:$8 sps:$4 sm:$0xff]  }
 0x387   :  { %6751 = vmatmul.mubr.msk.bf16.vlgmr.msra.gmra.mxu1 %vm2611_vm10, %v2720_v5  ;;  %v7054_v5 = vld [vmem:[#allocation11 + $0x70] ss:$8 sps:$4 sm:$0xff]  }
 0x388   :  { %6761 = vmatpush3.bf16.msra.mxu1 %v2968_v23  ;;  %6762 = vmatprep.mubr.msk.bf16.mxu1 %vm7485_vm7, %v7484_v35 }
 0x389   :  { %6772 = vmatprep.subr.bf16.mxu1 %v7484_v35 }
 0x38e   :  { %v7109_v28 = vpop.eup %7108 }
 0x38f   :  { %v7111_v29 = vpop.eup %7110  ;;  %v2695_v31 = vmul.f32 %v7109_v28, %v7808_v39  ;;  %v2700_v39 = vsel %vm2611_vm10, %v7832_v45, 0.0  ;;  %v7042_v45 = vld [vmem:[#allocation11 + $0x30] ss:$8 sps:$4 sm:$0xff]  }
 0x390   :  { %v2683_v33 = vpop.xlane.xlu1 %2682  ;;  %v2693_v34 = vmul.f32 %v7111_v29, %v7810_v24  ;;  %v2703_v24 = vsel %vm2611_vm10, %v2689_v16, 0.0  ;;  %v2702_v46 = vadd.f32 %v2701_v42, %v2700_v39  ;;  %v7057_v29 = vld [vmem:[#allocation11 + $0x60] ss:$8 sps:$4 sm:$0xff]  }
 0x391   :  { %7112 = vrcp.f32 %v2683_v33  ;;  %v2680_v36 = vpop.xlane.xlu0 %2679  ;;  %v2722_v37 = vpack.c.bf16 %v2695_v31, %v2695_v31  ;;  %v2709_v60 = vsel %vm2611_vm10, %v2695_v31, 0.0  ;;  %v3733_v33 = vld [vmem:[#allocation2 + $0x9] ss:$2 sm:$0x3] }
 0x392   :  { %7114 = vrcp.f32 %v2680_v36  ;;  %v2721_v40 = vpack.c.bf16 %v2693_v34, %v2693_v34  ;;  %v2704_v49 = vadd.f32 %v2703_v24, %v2702_v46  ;;  %v2707_v47 = vsel %vm2611_vm10, %v2693_v34, 0.0  ;;  %v3729_v36 = vld [vmem:[#allocation2 + $0x1] ss:$2 sm:$0x3] }
 0x393   :  { %6763 = vmatmul.mubr.msk.bf16.vlgmr.msra.gmra.mxu1 %vm2611_vm10, %v2722_v37  ;;  %v3767_v34 = vrot.slane %v3731_v32, %v7577_v7  ;;  %v3759_v42 = vrot.slane %v3729_v36, %v7577_v7  ;;  %v7910_v46 = vld [vmem:[#allocation2 + $0x11] ss:$2 sm:$0x3] }
 0x394   :  { %6757 = vmatmul.mubr.msk.bf16.vlgmr.msra.gmra.mxu0 %vm2611_vm10, %v2721_v40  ;;  %6773 = vmatpush3.bf16.msra.mxu1 %v3060_v61  ;;  %v2706_v50 = vadd.f32 %v2705_v48, %v2704_v49  ;;  %v7060_v40 = vld [vmem:[#allocation11 + $0x90] ss:$8 sps:$4 sm:$0xff]   ;;  %v3775_v61 = vrot.slane %v3733_v33, %v7577_v7 }
 0x395   :  { %6767 = vmatpush3.bf16.msra.mxu0 %v3014_v14  ;;  %6768 = vmatprep.mubr.msk.bf16.mxu0 %vm7485_vm7, %v7484_v35  ;;  %v7068_v14 = vld [vmem:[#allocation11 + $0x84] ss:$8 sps:$4 sm:$0xff]   ;;  %v3835_v39 = vpack.c.bf16 %v3767_v34, %v3767_v34 }
 0x396   :  { %6774 = vmatprep.mubr.msk.bf16.mxu1 %vm7485_vm7, %v7484_v35  ;;  %3145 = vmatprep.subr.bf16.mxu0 %v7038_v54  ;;  %v2708_v51 = vadd.f32 %v2707_v47, %v2706_v50  ;;  %v7905_v54 = vld [vmem:[#allocation2 + $0xd] ss:$2 sm:$0x3]  ;;  %v7063_v50 = vld [vmem:[#allocation11 + $0xb0] ss:$8 sps:$4 sm:$0xff]  }
 0x397   :  { %3209 = vmatprep.subr.bf16.mxu1 %v7044_v13  ;;  %v3783_v48 = vrot.slane %v7905_v54, %v7577_v7 }
 0x398   :  { %v2710_v2 = vadd.f32 %v2709_v60, %v2708_v51  ;;  %v7066_v51 = vld [vmem:[#allocation11 + $0x80] ss:$8 sps:$4 sm:$0xff]  }
 0x39e   :  { %v7113_v55 = vpop.eup %7112 }
 0x39f   :  { %v7115_v56 = vpop.eup %7114  ;;  %v2699_v57 = vmul.f32 %v7113_v55, %v7816_v38  ;;  %v3837_v55 = vpack.c.bf16 %v3775_v61, %v3775_v61 }
 0x3a0   :  { %v2697_v58 = vmul.f32 %v7115_v56, %v7818_v43  ;;  %v7039_v43 = vld [vmem:[#allocation11] ss:$8 sps:$4 sm:$0xff]  }
 0x3a1   :  { %v2724_v62 = vpack.c.bf16 %v2699_v57, %v2699_v57  ;;  %v2713_v38 = vsel %vm2611_vm10, %v2699_v57, 0.0  ;;  %v7071_v57 = vld [vmem:[#allocation11 + $0xa4] ss:$8 sps:$4 sm:$0xff]  }
 0x3a2   :  { %v2723_v3 = vpack.c.bf16 %v2697_v58, %v2697_v58  ;;  %v2711_v6 = vsel %vm2611_vm10, %v2697_v58, 0.0  ;;  %v3833_v58 = vpack.c.bf16 %v3759_v42, %v3759_v42 }
 0x3a3   :  { %6775 = vmatmul.mubr.msk.bf16.vlgmr.msra.gmra.mxu1 %vm2611_vm10, %v2724_v62  ;;  %v2712_v44 = vadd.f32 %v2711_v6, %v2710_v2  ;;  %v7915_v2 = vld [vmem:[#allocation2 + $0x15] ss:$2 sm:$0x3] }
 0x3a4   :  { %6769 = vmatmul.mubr.msk.bf16.vlgmr.msra.gmra.mxu0 %vm2611_vm10, %v2723_v3  ;;  %3210 = vmatpush1.bf16.msra.mxu1 %v7042_v45  ;;  %v3987_v45 = vunpack.c.l.b16 %v3835_v39  ;;  %v3791_v3 = vrot.slane %v7910_v46, %v7577_v7 }
 0x3a5   :  { %3146 = vmatpush1.bf16.msra.mxu0 %v7036_v63  ;;  %v2714_v9 = vadd.f32 %v2713_v38, %v2712_v44  ;;  %3165 = vmatprep.mubr.bf16.mxu0 %v7486_v10  ;;  %v7074_v63 = vld [vmem:[#allocation11 + $0xd4] ss:$8 sps:$4 sm:$0xff]   ;;  %v7069_v44 = vld [vmem:[#allocation11 + $0xa0] ss:$8 sps:$4 sm:$0xff]   ;;  %v3989_v38 = vunpack.c.l.b16 %v3837_v55 }
 0x3a6   :  { %3147 = vmatprep.subr.bf16.mxu0 %v7041_v59  ;;  %3229 = vmatprep.mubr.bf16.mxu1 %v7486_v10  ;;  %v3839_v59 = vpack.c.bf16 %v3783_v48, %v3783_v48 }
 0x3a7   :  { %v2715_v41 = vmul.f32 0.125, %v2714_v9  ;;  %3211 = vmatprep.subr.bf16.mxu1 %v7047_v12  ;;  %v7921_v9 = vld [vmem:[#allocation2 + $0x19] ss:$2 sm:$0x3]  ;;  %v4014_v12 = vrot.slane %v3987_v45, 7 }
 0x3a8   :  { %3212 = vmatpush1.bf16.msra.mxu1 %v7045_v11  ;;  %v3985_v11 = vunpack.c.l.b16 %v3833_v58  ;;  %v7078_v58 = vld [vmem:[#allocation11 + $0xc0] ss:$8 sps:$4 sm:$0xff]  }
 0x3a9   :  { %3148 = vmatpush1.bf16.msra.mxu0 %v7039_v43  ;;  %2716 = vst.msk [vmem:[#allocation14] sm:$0xff] %vm2611_vm10, %v2715_v41  ;;  %3337 = vmatprep.subr.bf16.mxu1 %v7056_v17  ;;  %v7077_v43 = vld [vmem:[#allocation11 + $0xf4] ss:$8 sps:$4 sm:$0xff]   ;;  %v3799_v41 = vrot.slane %v7915_v2, %v7577_v7  ;;  %v3841_v17 = vpack.c.bf16 %v3791_v3, %v3791_v3 }
 0x3aa   :  { %3273 = vmatprep.subr.bf16.mxu0 %v7050_v15 }
 0x433   :  { %v2774_v16 = vpop.f32.mrf.mxu0 }
 0x434   :  { %v3102_v19 = vpack.c.bf16 %v2774_v16, %v2774_v16  ;;  %v3763_v16 = vrot.slane %v3731_v32, %v7580_v8 }
 0x435   :  { %v6734_v21 = vpop.f32.mrf.mxu0 }
 0x436   :  { %6558 = vmatmul.mubr.msk.bf16.vlgmr.msra.gmra.mxu0 %vm2242_vm8, %v3102_v19  ;;  %v7926_v19 = vld [vmem:[#allocation2 + $0x1d] ss:$2 sm:$0x3]  ;;  %v4016_v21 = vrot.slane %v3989_v38, 6 }
 0x437   :  { %v2777_v22 = vpop.f32.mrf.mxu0  ;;  %v2820_v53 = vpop.f32.mrf.mxu1  ;;  %3274 = vmatpush1.bf16.msra.mxu0 %v7048_v18  ;;  %3293 = vmatprep.mubr.bf16.mxu0 %v7486_v10  ;;  %v3991_v18 = vunpack.c.l.b16 %v3839_v59 }
 0x438   :  { %v3103_v23 = vpack.c.bf16 %v2820_v53, %v2820_v53  ;;  %3275 = vmatprep.subr.bf16.mxu0 %v7053_v52  ;;  %v3807_v52 = vrot.slane %v7921_v9, %v7577_v7  ;;  %v3843_v22 = vpack.c.bf16 %v3799_v41, %v3799_v41  ;;  %v4015_v53 = vsel %vm636_vm0, %v4014_v12, %v3985_v11  ;;  %v7148_v11 = vld [vmem:[#allocation7 + $0x34] ss:$8 sps:$4 sm:$0xff]  }
 0x439   :  { %v6735_v25 = vpop.f32.mrf.mxu0  ;;  %v6740_v26 = vpop.f32.mrf.mxu1 }
 0x43a   :  { %6563 = vmatmul.mubr.msk.bf16.vlgmr.msra.gmra.mxu1 %vm2242_vm8, %v3103_v23  ;;  %v3755_v23 = vrot.slane %v3729_v36, %v7580_v8  ;;  %v3815_v25 = vrot.slane %v7926_v19, %v7577_v7  ;;  %v4018_v26 = vrot.slane %v3991_v18, 5 }
 0x43b   :  { %v2823_v28 = vpop.f32.mrf.mxu1  ;;  %3276 = vmatpush1.bf16.msra.mxu0 %v7051_v4  ;;  %3338 = vmatpush1.bf16.msra.mxu1 %v7054_v5  ;;  %v3771_v4 = vrot.slane %v3733_v33, %v7580_v8  ;;  %v3993_v5 = vunpack.c.l.b16 %v3841_v17  ;;  %v7083_v33 = vld [vmem:[#allocation11 + $0xe4] ss:$8 sps:$4 sm:$0xff]  }
 0x43c   :  { %3339 = vmatprep.subr.bf16.mxu1 %v7059_v20  ;;  %3357 = vmatprep.mubr.bf16.mxu1 %v7486_v10  ;;  %v3834_v20 = vpack.c.bf16 %v3763_v16, %v3763_v16  ;;  %v7075_v28 = vld [vmem:[#allocation11 + $0xf0] ss:$8 sps:$4 sm:$0xff]   ;;  %v3832_v39 = vpack.c.bf16 %v3755_v23, %v3755_v23 }
 0x43d   :  { %v6741_v31 = vpop.f32.mrf.mxu1  ;;  %3401 = vmatprep.subr.bf16.mxu0 %v7062_v27  ;;  %v3836_v61 = vpack.c.bf16 %v3771_v4, %v3771_v4  ;;  %v4020_v42 = vrot.slane %v3993_v5, 4 }
 0x43e   :  { %v3779_v31 = vrot.slane %v7905_v54, %v7580_v8  ;;  %v3787_v54 = vrot.slane %v7910_v46, %v7580_v8  ;;  %v3795_v46 = vrot.slane %v7915_v2, %v7580_v8  ;;  %v3984_v3 = vunpack.c.l.b16 %v3832_v39  ;;  %v7149_v2 = vld [vmem:[#allocation7 + $0x14] ss:$8 sps:$4 sm:$0xff]   ;;  %v7152_v39 = vld [vmem:[#allocation7 + $0x24] ss:$8 sps:$4 sm:$0xff]  }
 0x43f   :  { %3340 = vmatpush1.bf16.msra.mxu1 %v7057_v29  ;;  %v3845_v29 = vpack.c.bf16 %v3807_v52, %v3807_v52 }
 0x440   :  { %3465 = vmatprep.subr.bf16.mxu1 %v7065_v30  ;;  %v4017_v30 = vsel %vm639_vm1, %v4016_v21, %v4015_v53  ;;  %v3840_v38 = vpack.c.bf16 %v3787_v54, %v3787_v54  ;;  %v3842_v16 = vpack.c.bf16 %v3795_v46, %v3795_v46  ;;  %v3811_v53 = vrot.slane %v7926_v19, %v7580_v8  ;;  %v7160_v46 = vld [vmem:[#allocation7 + $0x64] ss:$8 sps:$4 sm:$0xff]  }
 0x441   :  { %v3997_v55 = vunpack.c.l.b16 %v3845_v29 }
 0x442   :  { %v3992_v21 = vunpack.c.l.b16 %v3840_v38  ;;  %v7165_v38 = vld [vmem:[#allocation7 + $0x94] ss:$8 sps:$4 sm:$0xff]  }
 0x443   :  { %v2866_v37 = vpop.f32.mrf.mxu0 }
 0x444   :  { %v3104_v13 = vpack.c.bf16 %v2866_v37, %v2866_v37  ;;  %v7072_v37 = vld [vmem:[#allocation11 + $0xd0] ss:$8 sps:$4 sm:$0xff]  }
 0x445   :  { %v6746_v24 = vpop.f32.mrf.mxu0 }
 0x446   :  { %6568 = vmatmul.mubr.msk.bf16.vlgmr.msra.gmra.mxu0 %vm2242_vm8, %v3104_v13  ;;  %v3986_v24 = vunpack.c.l.b16 %v3834_v20  ;;  %v3994_v20 = vunpack.c.l.b16 %v3842_v16  ;;  %v7173_v16 = vld [vmem:[#allocation7 + $0xd4] ss:$8 sps:$4 sm:$0xff]  }
 0x447   :  { %v2869_v49 = vpop.f32.mrf.mxu0  ;;  %v2912_v47 = vpop.f32.mrf.mxu1  ;;  %3402 = vmatpush1.bf16.msra.mxu0 %v7060_v40  ;;  %3421 = vmatprep.mubr.bf16.mxu0 %v7486_v10  ;;  %v3995_v40 = vunpack.c.l.b16 %v3843_v22 }
 0x448   :  { %v3105_v56 = vpack.c.bf16 %v2912_v47, %v2912_v47  ;;  %3403 = vmatprep.subr.bf16.mxu0 %v7068_v14  ;;  %v7080_v14 = vld [vmem:[#allocation11 + $0xc4] ss:$8 sps:$4 sm:$0xff]   ;;  %v3847_v49 = vpack.c.bf16 %v3815_v25, %v3815_v25  ;;  %v4019_v47 = vsel %vm642_vm2, %v4018_v26, %v4017_v30  ;;  %v4000_v59 = vrot.slane %v3986_v24, 7 }
 0x449   :  { %v6747_v60 = vpop.f32.mrf.mxu0  ;;  %v6752_v62 = vpop.f32.mrf.mxu1  ;;  %v4022_v45 = vrot.slane %v3995_v40, 3  ;;  %v4006_v25 = vrot.slane %v3992_v21, 4  ;;  %v4008_v19 = vrot.slane %v3994_v20, 3  ;;  %v7176_v21 = vld [vmem:[#allocation7 + $0xe4] ss:$8 sps:$4 sm:$0xff]  }
 0x44a   :  { %6573 = vmatmul.mubr.msk.bf16.vlgmr.msra.gmra.mxu1 %vm2242_vm8, %v3105_v56  ;;  %v3838_v56 = vpack.c.bf16 %v3779_v31, %v3779_v31  ;;  %v3988_v60 = vunpack.c.l.b16 %v3836_v61  ;;  %v4001_v18 = vsel %vm636_vm0, %v4000_v59, %v3984_v3  ;;  %v7150_v61 = vld [vmem:[#allocation7 + $0x30] ss:$8 sps:$4 sm:$0xff]   ;;  %v7161_v3 = vld [vmem:[#allocation7 + $0x44] ss:$8 sps:$4 sm:$0xff]   ;;  %v7162_v59 = vld [vmem:[#allocation7 + $0x60] ss:$8 sps:$4 sm:$0xff]  }
 0x44b   :  { %v2915_v6 = vpop.f32.mrf.mxu1  ;;  %3466 = vmatpush1.bf16.msra.mxu1 %v7063_v50  ;;  %3404 = vmatpush1.bf16.msra.mxu0 %v7066_v51  ;;  %v7081_v51 = vld [vmem:[#allocation11 + $0xe0] ss:$8 sps:$4 sm:$0xff]  }
 0x44c   :  { %3467 = vmatprep.subr.bf16.mxu1 %v7071_v57  ;;  %3485 = vmatprep.mubr.bf16.mxu1 %v7486_v10  ;;  %v3990_v41 = vunpack.c.l.b16 %v3838_v56  ;;  %v4002_v17 = vrot.slane %v3988_v60, 6  ;;  %v7182_v20 = vld [vmem:[#allocation7 + $0x130] ss:$8 sps:$4 sm:$0xff]  }
 0x44d   :  { %v6753_v15 = vpop.f32.mrf.mxu1  ;;  %3529 = vmatprep.subr.bf16.mxu0 %v7074_v63  ;;  %v4021_v63 = vsel %vm645_vm3, %v4020_v42, %v4019_v47 }
 0x44e   :  { %v4023_v12 = vsel %vm648_vm4, %v4022_v45, %v4021_v63  ;;  %v3803_v15 = vrot.slane %v7921_v9, %v7580_v8  ;;  %v4004_v4 = vrot.slane %v3990_v41, 5  ;;  %v4003_v23 = vsel %vm639_vm1, %v4002_v17, %v4001_v18  ;;  %v7157_v45 = vld [vmem:[#allocation7 + $0x54] ss:$8 sps:$4 sm:$0xff]   ;;  %v7159_v63 = vld [vmem:[#allocation7 + $0x50] ss:$8 sps:$4 sm:$0xff]  }
 0x44f   :  { %3468 = vmatpush1.bf16.msra.mxu1 %v7069_v44  ;;  %v3999_v44 = vunpack.c.l.b16 %v3847_v49  ;;  %v7153_v49 = vld [vmem:[#allocation7 + $0x4] ss:$8 sps:$4 sm:$0xff]   ;;  %v7167_v41 = vld [vmem:[#allocation7 + $0x90] ss:$8 sps:$4 sm:$0xff]   ;;  %v7171_v17 = vld [vmem:[#allocation7 + $0x80] ss:$8 sps:$4 sm:$0xff]  }
 0x450   :  { %3593 = vmatprep.subr.bf16.mxu1 %v7077_v43  ;;  %v4024_v43 = vrot.slane %v3997_v55, 2  ;;  %v3844_v5 = vpack.c.bf16 %v3803_v15, %v3803_v15  ;;  %v7154_v55 = vld [vmem:[#allocation7 + $0x20] ss:$8 sps:$4 sm:$0xff]   ;;  %v7174_v18 = vld [vmem:[#allocation7 + $0xf0] ss:$8 sps:$4 sm:$0xff]  }
 0x451   :  { %v4026_v52 = vrot.slane %v3999_v44, 1  ;;  %v7164_v44 = vld [vmem:[#allocation7 + $0xb4] ss:$8 sps:$4 sm:$0xff]   ;;  %v7170_v15 = vld [vmem:[#allocation7 + $0xa0] ss:$8 sps:$4 sm:$0xff]  }
 0x452   :  { %v4025_v22 = vsel %vm651_vm5, %v4024_v43, %v4023_v12  ;;  %v3996_v31 = vunpack.c.l.b16 %v3844_v5  ;;  %v7166_v43 = vld [vmem:[#allocation7 + $0xb0] ss:$8 sps:$4 sm:$0xff]   ;;  %v7169_v12 = vld [vmem:[#allocation7 + $0x84] ss:$8 sps:$4 sm:$0xff]   ;;  %v7180_v5 = vld [vmem:[#allocation7 + $0x134] ss:$8 sps:$4 sm:$0xff]  }
 0x453   :  { %v3004_v27 = vpop.f32.mrf.mxu1  ;;  %v4027_v9 = vsel %vm654_vm6, %v4026_v52, %v4025_v22  ;;  %v7175_v52 = vld [vmem:[#allocation7 + $0xd0] ss:$8 sps:$4 sm:$0xff]   ;;  %v7177_v22 = vld [vmem:[#allocation7 + $0xc4] ss:$8 sps:$4 sm:$0xff]  }
 0x454   :  { %v2958_v32 = vpop.f32.mrf.mxu0  ;;  %v3107_v34 = vpack.c.bf16 %v3004_v27, %v3004_v27  ;;  %v3846_v27 = vpack.c.bf16 %v3811_v53, %v3811_v53  ;;  %v4010_v24 = vrot.slane %v3996_v31, 2  ;;  %v7178_v53 = vld [vmem:[#allocation7 + $0xe0] ss:$8 sps:$4 sm:$0xff]   ;;  %v7190_v31 = vld [vmem:[#allocation7 + $0x170] ss:$8 sps:$4 sm:$0xff]  }
 0x455   :  { %v3106_v36 = vpack.c.bf16 %v2958_v32, %v2958_v32  ;;  %v6764_v13 = vpop.f32.mrf.mxu1 }
 0x456   :  { %v6758_v48 = vpop.f32.mrf.mxu0  ;;  %6583 = vmatmul.mubr.msk.bf16.vlgmr.msra.gmra.mxu1 %vm2242_vm8, %v3107_v34  ;;  %v3998_v13 = vunpack.c.l.b16 %v3846_v27  ;;  %v7186_v27 = vld [vmem:[#allocation7 + $0x120] ss:$8 sps:$4 sm:$0xff]  }
 0x457   :  { %6578 = vmatmul.mubr.msk.bf16.vlgmr.msra.gmra.mxu0 %vm2242_vm8, %v3106_v36  ;;  %v3007_v50 = vpop.f32.mrf.mxu1  ;;  %3594 = vmatpush1.bf16.msra.mxu1 %v7075_v28  ;;  %v4005_v28 = vsel %vm642_vm2, %v4004_v4, %v4003_v23  ;;  %v7179_v4 = vld [vmem:[#allocation7 + $0xc0] ss:$8 sps:$4 sm:$0xff]   ;;  %v7181_v23 = vld [vmem:[#allocation7 + $0x114] ss:$8 sps:$4 sm:$0xff]  }
 0x458   :  { %v2961_v57 = vpop.f32.mrf.mxu0  ;;  %3530 = vmatpush1.bf16.msra.mxu0 %v7072_v37  ;;  %3595 = vmatprep.subr.bf16.mxu1 %v7083_v33  ;;  %v7958_v37 = vpack.c.b16 %v4027_v9, %v4027_v9  ;;  %v4007_v40 = vsel %vm645_vm3, %v4006_v25, %v4005_v28  ;;  %v4012_v50 = vrot.slane %v3998_v13, 1  ;;  %v7183_v9 = vld [vmem:[#allocation7 + $0x110] ss:$8 sps:$4 sm:$0xff]   ;;  %v7184_v25 = vld [vmem:[#allocation7 + $0x124] ss:$8 sps:$4 sm:$0xff]  }
 0x459   :  { %v6765_v62 = vpop.f32.mrf.mxu1  ;;  %3531 = vmatprep.subr.bf16.mxu0 %v7080_v14  ;;  %3549 = vmatprep.mubr.bf16.mxu0 %v7486_v10  ;;  %v7151_v14 = vld [vmem:[#allocation7 + $0x10] ss:$8 sps:$4 sm:$0xff]   ;;  %v4009_v47 = vsel %vm648_vm4, %v4008_v19, %v4007_v40  ;;  %v7155_v57 = vld [vmem:[#allocation7] ss:$8 sps:$4 sm:$0xff]   ;;  %v7193_v19 = vld [vmem:[#allocation7 + $0x144] ss:$8 sps:$4 sm:$0xff]  }
 0x45a   :  { %v6759_v6 = vpop.f32.mrf.mxu0  ;;  %3613 = vmatprep.mubr.bf16.mxu1 %v7486_v10  ;;  %v7158_v62 = vld [vmem:[#allocation7 + $0x70] ss:$8 sps:$4 sm:$0xff]   ;;  %v7187_v28 = vld [vmem:[#allocation7 + $0x100] ss:$8 sps:$4 sm:$0xff]  }
 0x45b   :  { %3596 = vmatpush1.bf16.msra.mxu1 %v7081_v51  ;;  %v4011_v51 = vsel %vm651_vm5, %v4010_v24, %v4009_v47  ;;  %v7163_v6 = vld [vmem:[#allocation7 + $0x40] ss:$8 sps:$4 sm:$0xff]   ;;  %v3855_v24 = vld [vmem:[#allocation5 + $0xd] ss:$2 sm:$0x3] }
 0x45c   :  { %3532 = vmatpush1.bf16.msra.mxu0 %v7078_v58  ;;  %4084 = vmatprep.subr.bf16.mxu1 %v7148_v11  ;;  %v4013_v56 = vsel %vm654_vm6, %v4012_v50, %v4011_v51  ;;  %v7156_v58 = vld [vmem:[#allocation7 + $0x74] ss:$8 sps:$4 sm:$0xff]   ;;  %v7168_v11 = vld [vmem:[#allocation7 + $0xa4] ss:$8 sps:$4 sm:$0xff]   ;;  %v7194_v40 = vld [vmem:[#allocation7 + $0x160] ss:$8 sps:$4 sm:$0xff]   ;;  %v3903_v50 = vrot.slane %v3855_v24, %v7577_v7 }
 0x45d   :  { %4044 = vmatprep.subr.bf16.mxu0 %v7149_v2  ;;  %v7968_v60 = vpack.c.b16 %v4013_v56, %v4013_v56  ;;  %v7172_v2 = vld [vmem:[#allocation7 + $0xf4] ss:$8 sps:$4 sm:$0xff]   ;;  %v3853_v13 = vld [vmem:[#allocation5 + $0x9] ss:$2 sm:$0x3] }
 0x45e   :  { %v7198_v51 = vld [vmem:[#allocation7 + $0x1b0] ss:$8 sps:$4 sm:$0xff]  }
 0x45f   :  { %v7199_v56 = vld [vmem:[#allocation7 + $0x190] ss:$8 sps:$4 sm:$0xff]  }
 0x463   :  { %v3096_v26 = vpop.f32.mrf.mxu1 }
 0x464   :  { %v3050_v29 = vpop.f32.mrf.mxu0  ;;  %v3109_v30 = vpack.c.bf16 %v3096_v26, %v3096_v26  ;;  %v7185_v26 = vld [vmem:[#allocation7 + $0x104] ss:$8 sps:$4 sm:$0xff]  }
 0x465   :  { %v3108_v32 = vpack.c.bf16 %v3050_v29, %v3050_v29  ;;  %v6776_v34 = vpop.f32.mrf.mxu1  ;;  %v7188_v29 = vld [vmem:[#allocation7 + $0x174] ss:$8 sps:$4 sm:$0xff]  }
 0x466   :  { %v6770_v33 = vpop.f32.mrf.mxu0  ;;  %6593 = vmatmul.mubr.msk.bf16.vlgmr.msra.gmra.mxu1 %vm2242_vm8, %v3109_v30  ;;  %v7189_v30 = vld [vmem:[#allocation7 + $0x154] ss:$8 sps:$4 sm:$0xff]   ;;  %v7192_v34 = vld [vmem:[#allocation7 + $0x164] ss:$8 sps:$4 sm:$0xff]  }
 0x467   :  { %6588 = vmatmul.mubr.msk.bf16.vlgmr.msra.gmra.mxu0 %vm2242_vm8, %v3108_v32  ;;  %4085 = vmatpush1.bf16.xpose.msra.mxu1 %v7150_v61  ;;  %v3099_v36 = vpop.f32.mrf.mxu1  ;;  %v7191_v32 = vld [vmem:[#allocation7 + $0x150] ss:$8 sps:$4 sm:$0xff]   ;;  %v3851_v33 = vld [vmem:[#allocation5 + $0x5] ss:$2 sm:$0x3] }
 0x468   :  { %4045 = vmatpush1.bf16.xpose.msra.mxu0 %v7151_v14  ;;  %v3053_v42 = vpop.f32.mrf.mxu0  ;;  %4086 = vmatprep.subr.bf16.mxu1 %v7152_v39  ;;  %v7195_v61 = vld [vmem:[#allocation7 + $0x140] ss:$8 sps:$4 sm:$0xff]   ;;  %v7196_v36 = vld [vmem:[#allocation7 + $0x1b4] ss:$8 sps:$4 sm:$0xff]   ;;  %v3887_v14 = vrot.slane %v3851_v33, %v7577_v7 }
 0x469   :  { %v6777_v48 = vpop.f32.mrf.mxu1  ;;  %4046 = vmatprep.subr.bf16.mxu0 %v7153_v49  ;;  %4064 = vmatprep.mubr.bf16.mxu0 %v7958_v37  ;;  %v7197_v42 = vld [vmem:[#allocation7 + $0x194] ss:$8 sps:$4 sm:$0xff]   ;;  %v3849_v39 = vld [vmem:[#allocation5 + $0x1] ss:$2 sm:$0x3] }
 0x46a   :  { %v6771_v54 = vpop.f32.mrf.mxu0  ;;  %4104 = vmatprep.mubr.bf16.mxu1 %v7958_v37  ;;  %v3895_v48 = vrot.slane %v3853_v13, %v7577_v7  ;;  %v3879_v49 = vrot.slane %v3849_v39, %v7577_v7  ;;  %v3955_v47 = vpack.c.bf16 %v3887_v14, %v3887_v14  ;;  %v7207_v14 = vld [vmem:[#allocation7 + $0x1d0] ss:$8 sps:$4 sm:$0xff]  }
 0x46b   :  { %v3857_v54 = vld [vmem:[#allocation5 + $0x11] ss:$2 sm:$0x3] }
 0x46f   :  { %4087 = vmatpush1.bf16.xpose.msra.mxu1 %v7154_v55  ;;  %v3957_v55 = vpack.c.bf16 %v3895_v48, %v3895_v48  ;;  %v7209_v48 = vld [vmem:[#allocation7 + $0x1c4] ss:$8 sps:$4 sm:$0xff]  }
 0x470   :  { %4047 = vmatpush1.bf16.xpose.msra.mxu0 %v7155_v57  ;;  %4164 = vmatprep.subr.bf16.mxu1 %v7156_v58  ;;  %v7200_v57 = vld [vmem:[#allocation7 + $0x1a4] ss:$8 sps:$4 sm:$0xff]   ;;  %v3953_v58 = vpack.c.bf16 %v3879_v49, %v3879_v49 }
 0x471   :  { %4124 = vmatprep.subr.bf16.mxu0 %v7157_v45  ;;  %v4691_v45 = vunpack.c.l.b16 %v3955_v47 }
 0x476   :  { %4105 = vmatmul.mubr.bf16.vlgmr.msra.gmra.mxu1 %v7968_v60 }
 0x477   :  { %4065 = vmatmul.mubr.bf16.vlgmr.msra.gmra.mxu0 %v7968_v60  ;;  %4165 = vmatpush1.bf16.xpose.msra.mxu1 %v7158_v62  ;;  %v7201_v62 = vld [vmem:[#allocation7 + $0x184] ss:$8 sps:$4 sm:$0xff]  }
 0x478   :  { %4125 = vmatpush1.bf16.xpose.msra.mxu0 %v7159_v63  ;;  %4166 = vmatprep.subr.bf16.mxu1 %v7160_v46  ;;  %v3859_v63 = vld [vmem:[#allocation5 + $0x15] ss:$2 sm:$0x3]  ;;  %v3911_v46 = vrot.slane %v3857_v54, %v7577_v7 }
 0x479   :  { %4126 = vmatprep.subr.bf16.mxu0 %v7161_v3  ;;  %4144 = vmatprep.mubr.bf16.mxu0 %v7958_v37  ;;  %v3959_v3 = vpack.c.bf16 %v3903_v50, %v3903_v50  ;;  %v3915_v47 = vrot.slane %v3859_v63, %v7580_v8 }
 0x47a   :  { %4184 = vmatprep.mubr.bf16.mxu1 %v7958_v37 }
 0x47f   :  { %4167 = vmatpush1.bf16.xpose.msra.mxu1 %v7162_v59  ;;  %v4693_v59 = vunpack.c.l.b16 %v3957_v55 }
 0x480   :  { %4127 = vmatpush1.bf16.xpose.msra.mxu0 %v7163_v6  ;;  %4244 = vmatprep.subr.bf16.mxu1 %v7164_v44  ;;  %v7999_v6 = vld [vmem:[#allocation5 + $0x19] ss:$2 sm:$0x3]  ;;  %v3919_v44 = vrot.slane %v3859_v63, %v7577_v7  ;;  %v7210_v63 = vld [vmem:[#allocation7 + $0x1e0] ss:$8 sps:$4 sm:$0xff]  }
 0x481   :  { %4204 = vmatprep.subr.bf16.mxu0 %v7165_v38  ;;  %v4689_v38 = vunpack.c.l.b16 %v3953_v58 }
 0x486   :  { %4185 = vmatmul.mubr.bf16.vlgmr.msra.gmra.mxu1 %v7968_v60 }
 0x487   :  { %4145 = vmatmul.mubr.bf16.vlgmr.msra.gmra.mxu0 %v7968_v60  ;;  %4245 = vmatpush1.bf16.xpose.msra.mxu1 %v7166_v43  ;;  %v4718_v43 = vrot.slane %v4691_v45, 7  ;;  %v3923_v45 = vrot.slane %v7999_v6, %v7580_v8 }
 0x488   :  { %4205 = vmatpush1.bf16.xpose.msra.mxu0 %v7167_v41  ;;  %4246 = vmatprep.subr.bf16.mxu1 %v7168_v11  ;;  %v3961_v41 = vpack.c.bf16 %v3911_v46, %v3911_v46  ;;  %v3883_v11 = vrot.slane %v3851_v33, %v7580_v8  ;;  %v3962_v46 = vpack.c.bf16 %v3915_v47, %v3915_v47  ;;  %v7226_v47 = vld [vmem:[#allocation10 + $0x60] ss:$8 sps:$4 sm:$0xff]  }
 0x489   :  { %4206 = vmatprep.subr.bf16.mxu0 %v7169_v12  ;;  %4224 = vmatprep.mubr.bf16.mxu0 %v7958_v37  ;;  %v4695_v12 = vunpack.c.l.b16 %v3959_v3 }
 0x48a   :  { %4264 = vmatprep.mubr.bf16.mxu1 %v7958_v37 }
 0x48f   :  { %4247 = vmatpush1.bf16.xpose.msra.mxu1 %v7170_v15  ;;  %v7202_v15 = vld [vmem:[#allocation7 + $0x1a0] ss:$8 sps:$4 sm:$0xff]  }
 0x490   :  { %4207 = vmatpush1.bf16.xpose.msra.mxu0 %v7171_v17  ;;  %4324 = vmatprep.subr.bf16.mxu1 %v7172_v2  ;;  %v8003_v17 = vld [vmem:[#allocation5 + $0x1d] ss:$2 sm:$0x3]  ;;  %v3927_v2 = vrot.slane %v7999_v6, %v7577_v7 }
 0x491   :  { %4284 = vmatprep.subr.bf16.mxu0 %v7173_v16  ;;  %v4720_v16 = vrot.slane %v4693_v59, 6 }
 0x496   :  { %4265 = vmatmul.mubr.bf16.vlgmr.msra.gmra.mxu1 %v7968_v60 }
 0x497   :  { %4225 = vmatmul.mubr.bf16.vlgmr.msra.gmra.mxu0 %v7968_v60  ;;  %4325 = vmatpush1.bf16.xpose.msra.mxu1 %v7174_v18  ;;  %v7203_v18 = vld [vmem:[#allocation7 + $0x180] ss:$8 sps:$4 sm:$0xff]  }
 0x498   :  { %4285 = vmatpush1.bf16.xpose.msra.mxu0 %v7175_v52  ;;  %4326 = vmatprep.subr.bf16.mxu1 %v7176_v21  ;;  %v7204_v52 = vld [vmem:[#allocation7 + $0x1f4] ss:$8 sps:$4 sm:$0xff]   ;;  %v3963_v21 = vpack.c.bf16 %v3919_v44, %v3919_v44 }
 0x499   :  { %4286 = vmatprep.subr.bf16.mxu0 %v7177_v22  ;;  %4304 = vmatprep.mubr.bf16.mxu0 %v7958_v37  ;;  %v4719_v22 = vsel %vm636_vm0, %v4718_v43, %v4689_v38 }
 0x49a   :  { %4344 = vmatprep.mubr.bf16.mxu1 %v7958_v37 }
 0x49f   :  { %4327 = vmatpush1.bf16.xpose.msra.mxu1 %v7178_v53  ;;  %v3891_v53 = vrot.slane %v3853_v13, %v7580_v8 }
 0x4a0   :  { %4287 = vmatpush1.bf16.xpose.msra.mxu0 %v7179_v4  ;;  %4404 = vmatprep.subr.bf16.mxu1 %v7180_v5  ;;  %v7205_v4 = vld [vmem:[#allocation7 + $0x1d4] ss:$8 sps:$4 sm:$0xff]   ;;  %v4697_v5 = vunpack.c.l.b16 %v3961_v41  ;;  %v7211_v41 = vld [vmem:[#allocation7 + $0x1c0] ss:$8 sps:$4 sm:$0xff]  }
 0x4a1   :  { %4364 = vmatprep.subr.bf16.mxu0 %v7181_v23  ;;  %v3875_v23 = vrot.slane %v3849_v39, %v7580_v8 }
 0x4a6   :  { %4345 = vmatmul.mubr.bf16.vlgmr.msra.gmra.mxu1 %v7968_v60 }
 0x4a7   :  { %4305 = vmatmul.mubr.bf16.vlgmr.msra.gmra.mxu0 %v7968_v60  ;;  %4405 = vmatpush1.bf16.xpose.msra.mxu1 %v7182_v20  ;;  %v3954_v20 = vpack.c.bf16 %v3883_v11, %v3883_v11  ;;  %v7212_v11 = vld [vmem:[#allocation10 + $0x34] ss:$8 sps:$4 sm:$0xff]  }
 0x4a8   :  { %4365 = vmatpush1.bf16.xpose.msra.mxu0 %v7183_v9  ;;  %4406 = vmatprep.subr.bf16.mxu1 %v7184_v25  ;;  %v3935_v9 = vrot.slane %v8003_v17, %v7577_v7  ;;  %v4722_v25 = vrot.slane %v4695_v12, 5  ;;  %v3964_v12 = vpack.c.bf16 %v3923_v45, %v3923_v45  ;;  %v7231_v45 = vld [vmem:[#allocation10 + $0x90] ss:$8 sps:$4 sm:$0xff]  }
 0x4a9   :  { %4366 = vmatprep.subr.bf16.mxu0 %v7185_v26  ;;  %4384 = vmatprep.mubr.bf16.mxu0 %v7958_v37  ;;  %v3965_v26 = vpack.c.bf16 %v3927_v2, %v3927_v2  ;;  %v4698_v2 = vunpack.c.l.b16 %v3962_v46  ;;  %v7233_v46 = vld [vmem:[#allocation10 + $0x84] ss:$8 sps:$4 sm:$0xff]  }
 0x4aa   :  { %4424 = vmatprep.mubr.bf16.mxu1 %v7958_v37 }
 0x4af   :  { %4407 = vmatpush1.bf16.xpose.msra.mxu1 %v7186_v27  ;;  %v4721_v27 = vsel %vm639_vm1, %v4720_v16, %v4719_v22  ;;  %v4700_v22 = vunpack.c.l.b16 %v3964_v12  ;;  %v7237_v12 = vld [vmem:[#allocation10 + $0xd4] ss:$8 sps:$4 sm:$0xff]  }
 0x4b0   :  { %4367 = vmatpush1.bf16.xpose.msra.mxu0 %v7187_v28  ;;  %4484 = vmatprep.subr.bf16.mxu1 %v7188_v29  ;;  %v3899_v28 = vrot.slane %v3855_v24, %v7580_v8  ;;  %v4699_v29 = vunpack.c.l.b16 %v3963_v21  ;;  %v4723_v33 = vsel %vm642_vm2, %v4722_v25, %v4721_v27 }
 0x4b1   :  { %4444 = vmatprep.subr.bf16.mxu0 %v7189_v30  ;;  %v3956_v30 = vpack.c.bf16 %v3891_v53, %v3891_v53  ;;  %v4714_v25 = vrot.slane %v4700_v22, 2  ;;  %v7241_v22 = vld [vmem:[#allocation10 + $0xc4] ss:$8 sps:$4 sm:$0xff]  }
 0x4b2   :  { %v3958_v13 = vpack.c.bf16 %v3899_v28, %v3899_v28  ;;  %v4726_v39 = vrot.slane %v4699_v29, 3 }
 0x4b3   :  { %v4692_v24 = vunpack.c.l.b16 %v3956_v30 }
 0x4b6   :  { %4425 = vmatmul.mubr.bf16.vlgmr.msra.gmra.mxu1 %v7968_v60 }
 0x4b7   :  { %4385 = vmatmul.mubr.bf16.vlgmr.msra.gmra.mxu0 %v7968_v60  ;;  %4485 = vmatpush1.bf16.xpose.msra.mxu1 %v7190_v31  ;;  %v4724_v31 = vrot.slane %v4697_v5, 4  ;;  %v7214_v5 = vld [vmem:[#allocation10 + $0x30] ss:$8 sps:$4 sm:$0xff]  }
 0x4b8   :  { %4445 = vmatpush1.bf16.xpose.msra.mxu0 %v7191_v32  ;;  %4486 = vmatprep.subr.bf16.mxu1 %v7192_v34  ;;  %v3952_v32 = vpack.c.bf16 %v3875_v23, %v3875_v23  ;;  %v4690_v34 = vunpack.c.l.b16 %v3954_v20  ;;  %v7215_v20 = vld [vmem:[#allocation10 + $0x10] ss:$8 sps:$4 sm:$0xff]  }
 0x4b9   :  { %4446 = vmatprep.subr.bf16.mxu0 %v7193_v19  ;;  %4464 = vmatprep.mubr.bf16.mxu0 %v7958_v37  ;;  %v3967_v19 = vpack.c.bf16 %v3935_v9, %v3935_v9  ;;  %v4725_v49 = vsel %vm645_vm3, %v4724_v31, %v4723_v33  ;;  %v7216_v9 = vld [vmem:[#allocation10 + $0x24] ss:$8 sps:$4 sm:$0xff]   ;;  %v7219_v31 = vld [vmem:[#allocation10] ss:$8 sps:$4 sm:$0xff]  }
 0x4ba   :  { %4504 = vmatprep.mubr.bf16.mxu1 %v7958_v37  ;;  %v4704_v50 = vrot.slane %v4690_v34, 7  ;;  %v4727_v58 = vsel %vm648_vm4, %v4726_v39, %v4725_v49  ;;  %v7221_v34 = vld [vmem:[#allocation10 + $0x54] ss:$8 sps:$4 sm:$0xff]  }
 0x4bf   :  { %4487 = vmatpush1.bf16.xpose.msra.mxu1 %v7194_v40  ;;  %v3907_v40 = vrot.slane %v3857_v54, %v7580_v8  ;;  %v4688_v54 = vunpack.c.l.b16 %v3952_v32  ;;  %v7220_v32 = vld [vmem:[#allocation10 + $0x74] ss:$8 sps:$4 sm:$0xff]  }
 0x4c0   :  { %4447 = vmatpush1.bf16.xpose.msra.mxu0 %v7195_v61  ;;  %4564 = vmatprep.subr.bf16.mxu1 %v7196_v36  ;;  %v7206_v61 = vld [vmem:[#allocation7 + $0x1f0] ss:$8 sps:$4 sm:$0xff]   ;;  %v4701_v36 = vunpack.c.l.b16 %v3965_v26  ;;  %v7217_v26 = vld [vmem:[#allocation10 + $0x4] ss:$8 sps:$4 sm:$0xff]  }
 0x4c1   :  { %4524 = vmatprep.subr.bf16.mxu0 %v7197_v42  ;;  %v7208_v42 = vld [vmem:[#allocation7 + $0x1e4] ss:$8 sps:$4 sm:$0xff]   ;;  %v3960_v55 = vpack.c.bf16 %v3907_v40, %v3907_v40  ;;  %v4705_v3 = vsel %vm636_vm0, %v4704_v50, %v4688_v54  ;;  %v7222_v40 = vld [vmem:[#allocation10 + $0x70] ss:$8 sps:$4 sm:$0xff]   ;;  %v7227_v50 = vld [vmem:[#allocation10 + $0x40] ss:$8 sps:$4 sm:$0xff]  }
 0x4c3   :  { %v4696_v44 = vunpack.c.l.b16 %v3960_v55  ;;  %v7229_v55 = vld [vmem:[#allocation10 + $0x94] ss:$8 sps:$4 sm:$0xff]  }
 0x4c6   :  { %4505 = vmatmul.mubr.bf16.vlgmr.msra.gmra.mxu1 %v7968_v60 }
 0x4c7   :  { %4465 = vmatmul.mubr.bf16.vlgmr.msra.gmra.mxu0 %v7968_v60  ;;  %4565 = vmatpush1.bf16.xpose.msra.mxu1 %v7198_v51  ;;  %v4703_v51 = vunpack.c.l.b16 %v3967_v19 }
 0x4c8   :  { %4525 = vmatpush1.bf16.xpose.msra.mxu0 %v7199_v56  ;;  %4566 = vmatprep.subr.bf16.mxu1 %v7200_v57  ;;  %v4728_v56 = vrot.slane %v4701_v36, 2  ;;  %v4694_v57 = vunpack.c.l.b16 %v3958_v13  ;;  %v7223_v36 = vld [vmem:[#allocation10 + $0x50] ss:$8 sps:$4 sm:$0xff]   ;;  %v7224_v13 = vld [vmem:[#allocation10 + $0x64] ss:$8 sps:$4 sm:$0xff]  }
 0x4c9   :  { %4526 = vmatprep.subr.bf16.mxu0 %v7201_v62  ;;  %4544 = vmatprep.mubr.bf16.mxu0 %v7958_v37  ;;  %v4706_v62 = vrot.slane %v4692_v24, 6  ;;  %v4730_v59 = vrot.slane %v4703_v51, 1  ;;  %v7228_v51 = vld [vmem:[#allocation10 + $0xb4] ss:$8 sps:$4 sm:$0xff]  }
 0x4ca   :  { %4584 = vmatprep.mubr.bf16.mxu1 %v7958_v37  ;;  %v4729_v38 = vsel %vm651_vm5, %v4728_v56, %v4727_v58  ;;  %v4708_v43 = vrot.slane %v4694_v57, 5  ;;  %v7230_v57 = vld [vmem:[#allocation10 + $0xb0] ss:$8 sps:$4 sm:$0xff]  }
 0x4cb   :  { %v4707_v6 = vsel %vm639_vm1, %v4706_v62, %v4705_v3  ;;  %v4731_v16 = vsel %vm654_vm6, %v4730_v59, %v4729_v38  ;;  %v7232_v62 = vld [vmem:[#allocation10 + $0xa4] ss:$8 sps:$4 sm:$0xff]  }
 0x4cc   :  { %v4709_v21 = vsel %vm642_vm2, %v4708_v43, %v4707_v6  ;;  %v8032_v53 = vpack.c.b16 %v4731_v16, %v4731_v16 }
 0x4cf   :  { %4567 = vmatpush1.bf16.xpose.msra.mxu1 %v7202_v15  ;;  %v7213_v15 = vld [vmem:[#allocation10 + $0x14] ss:$8 sps:$4 sm:$0xff]  }
 0x4d0   :  { %4527 = vmatpush1.bf16.xpose.msra.mxu0 %v7203_v18  ;;  %4644 = vmatprep.subr.bf16.mxu1 %v7204_v52  ;;  %v4710_v18 = vrot.slane %v4696_v44, 4 }
 0x4d1   :  { %4604 = vmatprep.subr.bf16.mxu0 %v7205_v4 }
 0x4d2   :  { %v4711_v4 = vsel %vm645_vm3, %v4710_v18, %v4709_v21  ;;  %v7239_v18 = vld [vmem:[#allocation10 + $0xd0] ss:$8 sps:$4 sm:$0xff]  }
 0x4d6   :  { %4585 = vmatmul.mubr.bf16.vlgmr.msra.gmra.mxu1 %v7968_v60 }
 0x4d7   :  { %4545 = vmatmul.mubr.bf16.vlgmr.msra.gmra.mxu0 %v7968_v60  ;;  %4645 = vmatpush1.bf16.xpose.msra.mxu1 %v7206_v61 }
 0x4d8   :  { %4605 = vmatpush1.bf16.xpose.msra.mxu0 %v7207_v14  ;;  %4646 = vmatprep.subr.bf16.mxu1 %v7208_v42  ;;  %v7225_v14 = vld [vmem:[#allocation10 + $0x44] ss:$8 sps:$4 sm:$0xff]  }
 0x4d9   :  { %4606 = vmatprep.subr.bf16.mxu0 %v7209_v48  ;;  %4624 = vmatprep.mubr.bf16.mxu0 %v7958_v37 }
 0x4da   :  { %4664 = vmatprep.mubr.bf16.mxu1 %v7958_v37  ;;  %v3931_v37 = vrot.slane %v8003_v17, %v7580_v8  ;;  %v4712_v17 = vrot.slane %v4698_v2, 3  ;;  %v7238_v2 = vld [vmem:[#allocation10 + $0xf0] ss:$8 sps:$4 sm:$0xff]  }
 0x4dc   :  { %v3966_v52 = vpack.c.bf16 %v3931_v37, %v3931_v37  ;;  %v4713_v27 = vsel %vm648_vm4, %v4712_v17, %v4711_v4  ;;  %v7234_v37 = vld [vmem:[#allocation10 + $0xa0] ss:$8 sps:$4 sm:$0xff]  }
 0x4dd   :  { %v4715_v29 = vsel %vm651_vm5, %v4714_v25, %v4713_v27 }
 0x4de   :  { %v4702_v23 = vunpack.c.l.b16 %v3966_v52  ;;  %v7240_v52 = vld [vmem:[#allocation10 + $0xe4] ss:$8 sps:$4 sm:$0xff]  }
 0x4df   :  { %4647 = vmatpush1.bf16.xpose.msra.mxu1 %v7210_v63 }
 0x4e0   :  { %4607 = vmatpush1.bf16.xpose.msra.mxu0 %v7211_v41  ;;  %4788 = vmatprep.subr.bf16.mxu1 %v7212_v11  ;;  %v4716_v28 = vrot.slane %v4702_v23, 1  ;;  %v7235_v41 = vld [vmem:[#allocation10 + $0x80] ss:$8 sps:$4 sm:$0xff]   ;;  %v7236_v11 = vld [vmem:[#allocation10 + $0xf4] ss:$8 sps:$4 sm:$0xff]  }
 0x4e1   :  { %4748 = vmatprep.subr.bf16.mxu0 %v7213_v15 }
 0x4e2   :  { %v4717_v30 = vsel %vm654_vm6, %v4716_v28, %v4715_v29  ;;  %v7243_v29 = vld [vmem:[#allocation10 + $0xc0] ss:$8 sps:$4 sm:$0xff]  }
 0x4e3   :  { %v8042_v19 = vpack.c.b16 %v4717_v30, %v4717_v30 }
 0x4e6   :  { %4665 = vmatmul.mubr.bf16.vlgmr.msra.gmra.mxu1 %v7968_v60 }
 0x4e7   :  { %4625 = vmatmul.mubr.bf16.vlgmr.msra.gmra.mxu0 %v7968_v60  ;;  %4789 = vmatpush1.bf16.xpose.msra.mxu1 %v7214_v5  ;;  %v7218_v60 = vld [vmem:[#allocation10 + $0x20] ss:$8 sps:$4 sm:$0xff]  }
 0x4e8   :  { %4749 = vmatpush1.bf16.xpose.msra.mxu0 %v7215_v20  ;;  %4790 = vmatprep.subr.bf16.mxu1 %v7216_v9 }
 0x4e9   :  { %4750 = vmatprep.subr.bf16.mxu0 %v7217_v26  ;;  %4768 = vmatprep.mubr.bf16.mxu0 %v8032_v53  ;;  %v7242_v26 = vld [vmem:[#allocation10 + $0xe0] ss:$8 sps:$4 sm:$0xff]  }
 0x4ea   :  { %4808 = vmatprep.mubr.bf16.mxu1 %v8032_v53 }
 0x4ef   :  { %4791 = vmatpush1.bf16.xpose.msra.mxu1 %v7218_v60 }
 0x4f0   :  { %4751 = vmatpush1.bf16.xpose.msra.mxu0 %v7219_v31  ;;  %4868 = vmatprep.subr.bf16.mxu1 %v7220_v32  ;;  %v268_v32 = vld [vmem:[%s8353_s7] sm:$0x3] }
 0x4f1   :  { %4828 = vmatprep.subr.bf16.mxu0 %v7221_v34 }
 0x4f6   :  { %v8044_v33 = vpop.f32.mrf.mxu0  ;;  %4809 = vmatmul.mubr.bf16.vlgmr.msra.gmra.mxu1 %v8042_v19 }
 0x4f7   :  { %4769 = vmatmul.mubr.bf16.vlgmr.msra.gmra.mxu0 %v8042_v19  ;;  %4869 = vmatpush1.bf16.xpose.msra.mxu1 %v7222_v40 }
 0x4f8   :  { %v8048_v61 = vpop.f32.mrf.mxu0  ;;  %4829 = vmatpush1.bf16.xpose.msra.mxu0 %v7223_v36  ;;  %4870 = vmatprep.subr.bf16.mxu1 %v7224_v13 }
 0x4f9   :  { %4830 = vmatprep.subr.bf16.mxu0 %v7225_v14  ;;  %4848 = vmatprep.mubr.bf16.mxu0 %v8032_v53 }
 0x4fa   :  { %v3171_v42 = vpop.f32.mrf.mxu0  ;;  %v3231_v39 = vpop.f32.mrf.mxu1  ;;  %4888 = vmatprep.mubr.bf16.mxu1 %v8032_v53 }
 0x4fb   :  { %v3622_v5 = vadd.f32 %v3231_v39, %v8044_v33  ;;  %v7487_v33 = vmov 1966171168   ;;  %v8074_v42 = vrot.slane %v268_v32, %v7580_v8 }
 0x4fc   :  { %v3172_v24 = vpop.f32.mrf.mxu0  ;;  %v3233_v48 = vpop.f32.mrf.mxu1  ;;  %v3654_v40 = vunpack.c.l.s4 %v7487_v33 }
 0x4fd   :  { %v3629_v9 = vadd.f32 %v3233_v48, %v8048_v61 }
 0x4fe   :  { %v3235_v49 = vpop.f32.mrf.mxu1 }
 0x4ff   :  { %4871 = vmatpush1.bf16.xpose.msra.mxu1 %v7226_v47  ;;  %v8077_v49 = vrot.slane %v268_v32, %v7577_v7  ;;  %v3655_v47 = vunpack.c.0.s8 %v3654_v40 }
 0x500   :  { %v3236_v54 = vpop.f32.mrf.mxu1  ;;  %4831 = vmatpush1.bf16.xpose.msra.mxu0 %v7227_v50  ;;  %4948 = vmatprep.subr.bf16.mxu1 %v7228_v51 }
 0x501   :  { %4908 = vmatprep.subr.bf16.mxu0 %v7229_v55 }
 0x506   :  { %v3295_v56 = vpop.f32.mrf.mxu0  ;;  %4889 = vmatmul.mubr.bf16.vlgmr.msra.gmra.mxu1 %v8042_v19 }
 0x507   :  { %4849 = vmatmul.mubr.bf16.vlgmr.msra.gmra.mxu0 %v8042_v19  ;;  %4949 = vmatpush1.bf16.xpose.msra.mxu1 %v7230_v57  ;;  %v3623_v25 = vadd.f32 %v3622_v5, %v3295_v56 }
 0x508   :  { %v3297_v58 = vpop.f32.mrf.mxu0  ;;  %4909 = vmatpush1.bf16.xpose.msra.mxu0 %v7231_v45  ;;  %4950 = vmatprep.subr.bf16.mxu1 %v7232_v62 }
 0x509   :  { %4910 = vmatprep.subr.bf16.mxu0 %v7233_v46  ;;  %4928 = vmatprep.mubr.bf16.mxu0 %v8032_v53  ;;  %v3630_v27 = vadd.f32 %v3629_v9, %v3297_v58  ;;  %v8082_v58 = vsub.s32 %v3655_v47, %v7574_v1  ;;  %v7245_v47 = vld [vmem:[#allocation8 + $0x8] ss:$0 sm:$0xff] }
 0x50a   :  { %v3299_v3 = vpop.f32.mrf.mxu0  ;;  %v3359_v59 = vpop.f32.mrf.mxu1  ;;  %4968 = vmatprep.mubr.bf16.mxu1 %v8032_v53 }
 0x50b   :  { %v3624_v28 = vadd.f32 %v3623_v25, %v3359_v59 }
 0x50c   :  { %v3300_v44 = vpop.f32.mrf.mxu0  ;;  %v3361_v63 = vpop.f32.mrf.mxu1 }
 0x50d   :  { %v3631_v60 = vadd.f32 %v3630_v27, %v3361_v63 }
 0x50e   :  { %v3363_v38 = vpop.f32.mrf.mxu1 }
 0x50f   :  { %4951 = vmatpush1.bf16.xpose.msra.mxu1 %v7234_v37 }
 0x510   :  { %v3364_v43 = vpop.f32.mrf.mxu1  ;;  %4911 = vmatpush1.bf16.xpose.msra.mxu0 %v7235_v41  ;;  %5028 = vmatprep.subr.bf16.mxu1 %v7236_v11 }
 0x511   :  { %4988 = vmatprep.subr.bf16.mxu0 %v7237_v12 }
 0x516   :  { %v3487_v6 = vpop.f32.mrf.mxu1  ;;  %4969 = vmatmul.mubr.bf16.vlgmr.msra.gmra.mxu1 %v8042_v19 }
 0x517   :  { %v3423_v15 = vpop.f32.mrf.mxu0  ;;  %4929 = vmatmul.mubr.bf16.vlgmr.msra.gmra.mxu0 %v8042_v19  ;;  %5029 = vmatpush1.bf16.xpose.msra.mxu1 %v7238_v2 }
 0x518   :  { %v3489_v16 = vpop.f32.mrf.mxu1  ;;  %4989 = vmatpush1.bf16.xpose.msra.mxu0 %v7239_v18  ;;  %5030 = vmatprep.subr.bf16.mxu1 %v7240_v52 }
 0x519   :  { %v3425_v21 = vpop.f32.mrf.mxu0  ;;  %4990 = vmatprep.subr.bf16.mxu0 %v7241_v22  ;;  %5008 = vmatprep.mubr.bf16.mxu0 %v8032_v53 }
 0x51a   :  { %v3491_v17 = vpop.f32.mrf.mxu1  ;;  %5048 = vmatprep.mubr.bf16.mxu1 %v8032_v53  ;;  %v3625_v53 = vadd.f32 %v3624_v28, %v3423_v15  ;;  %v3632_v30 = vadd.f32 %v3631_v60, %v3425_v21 }
 0x51b   :  { %v3427_v4 = vpop.f32.mrf.mxu0 }
 0x51c   :  { %v3492_v23 = vpop.f32.mrf.mxu1  ;;  %v3626_v31 = vadd.f32 %v3625_v53, %v3487_v6  ;;  %v3633_v36 = vadd.f32 %v3632_v30, %v3489_v16 }
 0x51d   :  { %v3428_v20 = vpop.f32.mrf.mxu0 }
 0x51f   :  { %5031 = vmatpush1.bf16.xpose.msra.mxu1 %v7242_v26 }
 0x520   :  { %4991 = vmatpush1.bf16.xpose.msra.mxu0 %v7243_v29  ;;  %6784 = vmatprep.subr.bf16.mxu1 %v7484_v35 }
 0x521   :  { %6778 = vmatprep.subr.bf16.mxu0 %v7484_v35 }
 0x526   :  { %v3615_v34 = vpop.f32.mrf.mxu1  ;;  %5049 = vmatmul.mubr.bf16.vlgmr.msra.gmra.mxu1 %v8042_v19 }
 0x527   :  { %v3551_v61 = vpop.f32.mrf.mxu0  ;;  %5009 = vmatmul.mubr.bf16.vlgmr.msra.gmra.mxu0 %v8042_v19  ;;  %6786 = vmatprep.mubr.msk.bf16.mxu1 %vm7485_vm7, %v7484_v35 }
 0x528   :  { %v3627_v13 = vadd.f32 %v3626_v31, %v3551_v61  ;;  %v3617_v14 = vpop.f32.mrf.mxu1  ;;  %6780 = vmatprep.mubr.msk.bf16.mxu0 %vm7485_vm7, %v7484_v35 }
 0x529   :  { %v3553_v39 = vpop.f32.mrf.mxu0 }
 0x52a   :  { %v3628_v24 = vadd.f32 %v3627_v13, %v3615_v34  ;;  %v3634_v48 = vadd.f32 %v3633_v36, %v3553_v39  ;;  %v3619_v19 = vpop.f32.mrf.mxu1 }
 0x52b   :  { %v3555_v54 = vpop.f32.mrf.mxu0 }
 0x52c   :  { %v3635_v50 = vadd.f32 %v3634_v48, %v3617_v14  ;;  %v3620_v51 = vpop.f32.mrf.mxu1  ;;  %v3647_v56 = vadd.f32 %v8074_v42, %v3628_v24  ;;  %v7244_v24 = vld [vmem:[#allocation8 + $0x9] ss:$0 sm:$0xff] }
 0x52d   :  { %v3556_v55 = vpop.f32.mrf.mxu0 }
 0x52e   :  { %v3648_v57 = vadd.f32 %v8077_v49, %v3635_v50 }
 0x530   :  { %v3651_v8 = vcombine.low %v3647_v56, %v3648_v57  ;;  %v3652_v45 = vcombine.high %v3647_v56, %v3648_v57 }
 0x532   :  { %v3659_v62 = vrot.slane %v3651_v8, %v8082_v58  ;;  %v3666_v7 = vrot.slane %v3652_v45, %v8082_v58 }
 0x534   :  { %v3667_v3 = vcombine.high %v3659_v62, %v3659_v62  ;;  %v3668_v59 = vcombine.high %v3666_v7, %v3666_v7  ;;  %v3675_v44 = vrot.slane %v3659_v62, %v8082_v58  ;;  %v3682_v63 = vrot.slane %v3666_v7, %v8082_v58  ;;  %v7246_v7 = vld [vmem:[#allocation8 + $0x1] ss:$0 sm:$0xff] }
 0x536   :  { %v3689_v1 = vrot.slane %v3667_v3, %v8082_v58  ;;  %v3696_v38 = vrot.slane %v3668_v59, %v8082_v58  ;;  %v3697_v37 = vcombine.high %v3675_v44, %v3675_v44  ;;  %v3698_v43 = vcombine.high %v3682_v63, %v3682_v63  ;;  %3713 = vst.msk [vmem:[#allocation13] ss:$2 sm:$0x3] %vm8087_vm11, %v3675_v44  ;;  %v4106_v0 = vpop.f32.mrf.mxu1  ;;  %v7247_v44 = vld [vmem:[#allocation8] ss:$0 sm:$0xff] }
 0x537   :  { %3721 = vst.msk [vmem:[#allocation13 + $0x10] ss:$2 sm:$0x3] %vm8087_vm11, %v3682_v63  ;;  %v4066_v41 = vpop.f32.mrf.mxu0  ;;  %v4107_v3 = vadd.f32 %v7246_v7, %v4106_v0  ;;  %v7248_v0 = vld [vmem:[#allocation8 + $0xb] ss:$0 sm:$0xff] }
 0x538   :  { %v3699_v11 = vcombine.high %v3689_v1, %v3689_v1  ;;  %v3700_v12 = vcombine.high %v3696_v38, %v3696_v38  ;;  %3715 = vst.msk [vmem:[#allocation13 + $0x4] ss:$2 sm:$0x3] %vm8087_vm11, %v3689_v1  ;;  %3717 = vst.msk [vmem:[#allocation13 + $0x8] ss:$2 sm:$0x3] %vm8087_vm11, %v3697_v37  ;;  %v4108_v6 = vpop.f32.mrf.mxu1  ;;  %v4067_v63 = vadd.f32 %v7247_v44, %v4066_v41 }
 0x539   :  { %3723 = vst.msk [vmem:[#allocation13 + $0x14] ss:$2 sm:$0x3] %vm8087_vm11, %v3696_v38  ;;  %3725 = vst.msk [vmem:[#allocation13 + $0x18] ss:$2 sm:$0x3] %vm8087_vm11, %v3698_v43  ;;  %v4068_v15 = vpop.f32.mrf.mxu0  ;;  %v5057_v1 = vpack.c.bf16 %v4107_v3, %v4107_v3 }
 0x53a   :  { %3719 = vst.msk [vmem:[#allocation13 + $0xc] ss:$2 sm:$0x3] %vm8087_vm11, %v3699_v11  ;;  %3727 = vst.msk [vmem:[#allocation13 + $0x1c] ss:$2 sm:$0x3] %vm8087_vm11, %v3700_v12  ;;  %v4109_v2 = vpop.f32.mrf.mxu1  ;;  %v5056_v38 = vpack.c.bf16 %v4067_v63, %v4067_v63 }
 0x53b   :  { %v4069_v16 = vpop.f32.mrf.mxu0  ;;  %v7249_v12 = vld [vmem:[#allocation8 + $0xa] ss:$0 sm:$0xff]  ;;  %v7257_v7 = vld [vmem:[#allocation8 + $0xe] ss:$0 sm:$0xff] }
 0x53c   :  { %v4110_v18 = vpop.f32.mrf.mxu1 }
 0x53d   :  { %v4070_v52 = vpop.f32.mrf.mxu0 }
 0x546   :  { %v8111_v21 = vpop.f32.mrf.mxu1 }
 0x547   :  { %v8113_v22 = vpop.f32.mrf.mxu0 }
 0x548   :  { %v4188_v17 = vpop.f32.mrf.mxu1 }
 0x549   :  { %v4148_v4 = vpop.f32.mrf.mxu0 }
 0x54a   :  { %v4189_v5 = vpop.f32.mrf.mxu1 }
 0x54b   :  { %v4149_v23 = vpop.f32.mrf.mxu0 }
 0x54c   :  { %v4190_v20 = vpop.f32.mrf.mxu1  ;;  %v7250_v23 = vld [vmem:[#allocation8 + $0x3] ss:$0 sm:$0xff] }
 0x54d   :  { %v4150_v9 = vpop.f32.mrf.mxu0  ;;  %v4187_v20 = vadd.f32 %v7250_v23, %v8111_v21 }
 0x556   :  { %v8115_v25 = vpop.f32.mrf.mxu1 }
 0x557   :  { %v8117_v26 = vpop.f32.mrf.mxu0 }
 0x558   :  { %v4268_v27 = vpop.f32.mrf.mxu1 }
 0x559   :  { %v4228_v28 = vpop.f32.mrf.mxu0  ;;  %v7251_v27 = vld [vmem:[#allocation8 + $0x2] ss:$0 sm:$0xff] }
 0x55a   :  { %v4269_v29 = vpop.f32.mrf.mxu1  ;;  %v4147_v28 = vadd.f32 %v7251_v27, %v8113_v22 }
 0x55b   :  { %v4229_v60 = vpop.f32.mrf.mxu0  ;;  %v5059_v29 = vpack.c.bf16 %v4187_v20, %v4187_v20 }
 0x55c   :  { %v4270_v53 = vpop.f32.mrf.mxu1  ;;  %v5058_v60 = vpack.c.bf16 %v4147_v28, %v4147_v28 }
 0x55d   :  { %v4230_v30 = vpop.f32.mrf.mxu0 }
 0x55e   :  { %v7252_v30 = vld [vmem:[#allocation8 + $0xd] ss:$0 sm:$0xff] }
 0x566   :  { %v8119_v31 = vpop.f32.mrf.mxu1 }
 0x567   :  { %v8121_v32 = vpop.f32.mrf.mxu0 }
 0x568   :  { %v4348_v34 = vpop.f32.mrf.mxu1 }
 0x569   :  { %v4308_v33 = vpop.f32.mrf.mxu0 }
 0x56a   :  { %v4349_v40 = vpop.f32.mrf.mxu1  ;;  %v7253_v33 = vld [vmem:[#allocation8 + $0xc] ss:$0 sm:$0xff] }
 0x56b   :  { %v4309_v61 = vpop.f32.mrf.mxu0 }
 0x56c   :  { %v4350_v36 = vpop.f32.mrf.mxu1 }
 0x56d   :  { %v4310_v13 = vpop.f32.mrf.mxu0 }
 0x576   :  { %v4426_v14 = vpop.f32.mrf.mxu1 }
 0x577   :  { %v4386_v39 = vpop.f32.mrf.mxu0  ;;  %v4427_v48 = vadd.f32 %v7244_v24, %v4426_v14 }
 0x578   :  { %v4387_v19 = vadd.f32 %v7245_v47, %v4386_v39  ;;  %v4428_v54 = vpop.f32.mrf.mxu1 }
 0x579   :  { %v5065_v50 = vpack.c.bf16 %v4427_v48, %v4427_v48  ;;  %v4388_v51 = vpop.f32.mrf.mxu0 }
 0x57a   :  { %v5064_v55 = vpack.c.bf16 %v4387_v19, %v4387_v19  ;;  %v4429_v56 = vpop.f32.mrf.mxu1  ;;  %v7254_v19 = vld [vmem:[#allocation8 + $0x5] ss:$0 sm:$0xff]  ;;  %v7255_v51 = vld [vmem:[#allocation8 + $0x4] ss:$0 sm:$0xff] }
 0x57b   :  { %v5122_v57 = vsel %vm2242_vm8, %v5065_v50, 0  ;;  %v4389_v8 = vpop.f32.mrf.mxu0  ;;  %v4267_v54 = vadd.f32 %v7254_v19, %v8115_v25 }
 0x57c   :  { %v5076_v45 = vsel %vm2242_vm8, %v5064_v55, 0  ;;  %v4430_v62 = vpop.f32.mrf.mxu1  ;;  %6785 = vmatpush3.bf16.xpose.msra.mxu1 %v5122_v57  ;;  %v4227_v55 = vadd.f32 %v7255_v51, %v8117_v26 }
 0x57d   :  { %v4390_v59 = vpop.f32.mrf.mxu0  ;;  %6779 = vmatpush3.bf16.xpose.msra.mxu0 %v5076_v45  ;;  %6796 = vmatprep.subr.bf16.mxu1 %v7484_v35  ;;  %v5061_v56 = vpack.c.bf16 %v4267_v54, %v4267_v54  ;;  %v7256_v45 = vld [vmem:[#allocation8 + $0xf] ss:$0 sm:$0xff] }
 0x57e   :  { %6790 = vmatprep.subr.bf16.mxu0 %v7484_v35  ;;  %v5060_v57 = vpack.c.bf16 %v4227_v55, %v4227_v55 }
 0x583   :  { %6787 = vmatmul.mubr.msk.bf16.vlgmr.msra.gmra.mxu1 %vm2242_vm8, %v5057_v1 }
 0x584   :  { %6781 = vmatmul.mubr.msk.bf16.vlgmr.msra.gmra.mxu0 %vm2242_vm8, %v5056_v38  ;;  %6798 = vmatprep.mubr.msk.bf16.mxu1 %vm7485_vm7, %v7484_v35 }
 0x585   :  { %6792 = vmatprep.mubr.msk.bf16.mxu0 %vm7485_vm7, %v7484_v35 }
 0x586   :  { %v4506_v37 = vpop.f32.mrf.mxu1 }
 0x587   :  { %v4466_v43 = vpop.f32.mrf.mxu0  ;;  %v4507_v11 = vadd.f32 %v7248_v0, %v4506_v37 }
 0x588   :  { %v4467_v41 = vadd.f32 %v7249_v12, %v4466_v43  ;;  %v4508_v6 = vpop.f32.mrf.mxu1 }
 0x589   :  { %v5067_v15 = vpack.c.bf16 %v4507_v11, %v4507_v11  ;;  %v4468_v2 = vpop.f32.mrf.mxu0  ;;  %v7258_v11 = vld [vmem:[#allocation8 + $0x7] ss:$0 sm:$0xff]  ;;  %v7259_v6 = vld [vmem:[#allocation8 + $0x6] ss:$0 sm:$0xff] }
 0x58a   :  { %v5066_v16 = vpack.c.bf16 %v4467_v41, %v4467_v41  ;;  %v4509_v18 = vpop.f32.mrf.mxu1  ;;  %v4347_v12 = vadd.f32 %v7258_v11, %v8119_v31 }
 0x58b   :  { %v5214_v52 = vsel %vm2242_vm8, %v5067_v15, 0  ;;  %v4469_v17 = vpop.f32.mrf.mxu0  ;;  %v4307_v15 = vadd.f32 %v7259_v6, %v8121_v32  ;;  %v7260_v32 = vld [vmem:[%s8351_s5 + $0x1] ss:$0 sm:$0xff] }
 0x58c   :  { %v5168_v4 = vsel %vm2242_vm8, %v5066_v16, 0  ;;  %v4510_v5 = vpop.f32.mrf.mxu1  ;;  %6797 = vmatpush3.bf16.xpose.msra.mxu1 %v5214_v52  ;;  %v5063_v2 = vpack.c.bf16 %v4347_v12, %v4347_v12  ;;  %v7261_v17 = vld [vmem:[%s8351_s5] ss:$0 sm:$0xff] }
 0x58d   :  { %v4470_v9 = vpop.f32.mrf.mxu0  ;;  %6791 = vmatpush3.bf16.xpose.msra.mxu0 %v5168_v4  ;;  %6808 = vmatprep.subr.bf16.mxu1 %v7484_v35  ;;  %v5062_v16 = vpack.c.bf16 %v4307_v15, %v4307_v15 }
 0x58e   :  { %6802 = vmatprep.subr.bf16.mxu0 %v7484_v35 }
 0x593   :  { %6799 = vmatmul.mubr.msk.bf16.vlgmr.msra.gmra.mxu1 %vm2242_vm8, %v5059_v29 }
 0x594   :  { %6793 = vmatmul.mubr.msk.bf16.vlgmr.msra.gmra.mxu0 %vm2242_vm8, %v5058_v60  ;;  %6810 = vmatprep.mubr.msk.bf16.mxu1 %vm7485_vm7, %v7484_v35 }
 0x595   :  { %6804 = vmatprep.mubr.msk.bf16.mxu0 %vm7485_vm7, %v7484_v35 }
 0x596   :  { %v4586_v21 = vpop.f32.mrf.mxu1 }
 0x597   :  { %v4546_v53 = vpop.f32.mrf.mxu0  ;;  %v4587_v34 = vadd.f32 %v7252_v30, %v4586_v21 }
 0x598   :  { %v4547_v22 = vadd.f32 %v7253_v33, %v4546_v53  ;;  %v4588_v40 = vpop.f32.mrf.mxu1 }
 0x599   :  { %v5069_v61 = vpack.c.bf16 %v4587_v34, %v4587_v34  ;;  %v4548_v36 = vpop.f32.mrf.mxu0 }
 0x59a   :  { %v5068_v13 = vpack.c.bf16 %v4547_v22, %v4547_v22  ;;  %v4589_v14 = vpop.f32.mrf.mxu1 }
 0x59b   :  { %v5306_v39 = vsel %vm2242_vm8, %v5069_v61, 0  ;;  %v4549_v24 = vpop.f32.mrf.mxu0 }
 0x59c   :  { %v5260_v48 = vsel %vm2242_vm8, %v5068_v13, 0  ;;  %v4590_v47 = vpop.f32.mrf.mxu1  ;;  %6809 = vmatpush3.bf16.xpose.msra.mxu1 %v5306_v39 }
 0x59d   :  { %v4550_v50 = vpop.f32.mrf.mxu0  ;;  %6803 = vmatpush3.bf16.xpose.msra.mxu0 %v5260_v48  ;;  %6820 = vmatprep.subr.bf16.mxu1 %v7484_v35 }
 0x59e   :  { %6814 = vmatprep.subr.bf16.mxu0 %v7484_v35 }
 0x5a3   :  { %6811 = vmatmul.mubr.msk.bf16.vlgmr.msra.gmra.mxu1 %vm2242_vm8, %v5061_v56 }
 0x5a4   :  { %6805 = vmatmul.mubr.msk.bf16.vlgmr.msra.gmra.mxu0 %vm2242_vm8, %v5060_v57  ;;  %6822 = vmatprep.mubr.msk.bf16.mxu1 %vm7485_vm7, %v7484_v35 }
 0x5a5   :  { %6816 = vmatprep.mubr.msk.bf16.mxu0 %vm7485_vm7, %v7484_v35 }
 0x5a6   :  { %v4666_v25 = vpop.f32.mrf.mxu1 }
 0x5a7   :  { %v4626_v8 = vpop.f32.mrf.mxu0  ;;  %v4667_v62 = vadd.f32 %v7256_v45, %v4666_v25 }
 0x5a8   :  { %v4627_v26 = vadd.f32 %v7257_v7, %v4626_v8  ;;  %v4668_v3 = vpop.f32.mrf.mxu1 }
 0x5a9   :  { %v5071_v59 = vpack.c.bf16 %v4667_v62, %v4667_v62  ;;  %v4628_v44 = vpop.f32.mrf.mxu0 }
 0x5aa   :  { %v5070_v63 = vpack.c.bf16 %v4627_v26, %v4627_v26  ;;  %v4669_v1 = vpop.f32.mrf.mxu1 }
 0x5ab   :  { %v5398_v38 = vsel %vm2242_vm8, %v5071_v59, 0  ;;  %v4629_v37 = vpop.f32.mrf.mxu0 }
 0x5ac   :  { %v5352_v43 = vsel %vm2242_vm8, %v5070_v63, 0  ;;  %v4670_v0 = vpop.f32.mrf.mxu1  ;;  %6821 = vmatpush3.bf16.xpose.msra.mxu1 %v5398_v38 }
 0x5ad   :  { %v4630_v41 = vpop.f32.mrf.mxu0  ;;  %6815 = vmatpush3.bf16.xpose.msra.mxu0 %v5352_v43  ;;  %6832 = vmatprep.subr.bf16.mxu1 %v7484_v35 }
 0x5ae   :  { %6826 = vmatprep.subr.bf16.mxu0 %v7484_v35 }
 0x5b3   :  { %6823 = vmatmul.mubr.msk.bf16.vlgmr.msra.gmra.mxu1 %vm2242_vm8, %v5063_v2 }
 0x5b4   :  { %6817 = vmatmul.mubr.msk.bf16.vlgmr.msra.gmra.mxu0 %vm2242_vm8, %v5062_v16  ;;  %6834 = vmatprep.mubr.msk.bf16.mxu1 %vm7485_vm7, %v7484_v35 }
 0x5b5   :  { %6828 = vmatprep.mubr.msk.bf16.mxu0 %vm7485_vm7, %v7484_v35 }
 0x5b6   :  { %v4810_v31 = vpop.f32.mrf.mxu1 }
 0x5b7   :  { %v4770_v18 = vpop.f32.mrf.mxu0  ;;  %v4811_v52 = vadd.f32 %v7260_v32, %v4810_v31 }
 0x5b8   :  { %v4771_v4 = vadd.f32 %v7261_v17, %v4770_v18  ;;  %v4812_v5 = vpop.f32.mrf.mxu1 }
 0x5b9   :  { %v4772_v23 = vpop.f32.mrf.mxu0  ;;  %v5555_v20 = vpack.c.bf16 %v4811_v52, %v4811_v52 }
 0x5ba   :  { %v5554_v9 = vpack.c.bf16 %v4771_v4, %v4771_v4  ;;  %v4813_v27 = vpop.f32.mrf.mxu1 }
 0x5bb   :  { %v5612_v28 = vsel %vm2736_vm9, %v5555_v20, 0  ;;  %v4773_v29 = vpop.f32.mrf.mxu0 }
 0x5bc   :  { %v5566_v60 = vsel %vm2736_vm9, %v5554_v9, 0  ;;  %v4814_v21 = vpop.f32.mrf.mxu1  ;;  %6833 = vmatpush3.bf16.msra.mxu1 %v5612_v28 }
 0x5bd   :  { %v4774_v53 = vpop.f32.mrf.mxu0  ;;  %6827 = vmatpush3.bf16.msra.mxu0 %v5566_v60  ;;  %6844 = vmatprep.subr.bf16.mxu1 %v7484_v35 }
 0x5be   :  { %6838 = vmatprep.subr.bf16.mxu0 %v7484_v35 }
 0x5c6   :  { %v8179_v30 = vpop.f32.mrf.mxu1 }
 0x5c7   :  { %v8181_v34 = vpop.f32.mrf.mxu0 }
 0x5c8   :  { %v4892_v33 = vpop.f32.mrf.mxu1 }
 0x5c9   :  { %v4852_v22 = vpop.f32.mrf.mxu0 }
 0x5ca   :  { %v4893_v40 = vpop.f32.mrf.mxu1 }
 0x5cb   :  { %v4853_v61 = vpop.f32.mrf.mxu0 }
 0x5cc   :  { %v4894_v36 = vpop.f32.mrf.mxu1 }
 0x5cd   :  { %v4854_v13 = vpop.f32.mrf.mxu0 }
 0x5d6   :  { %v8183_v14 = vpop.f32.mrf.mxu1 }
 0x5d7   :  { %v8185_v39 = vpop.f32.mrf.mxu0 }
 0x5d8   :  { %v4972_v24 = vpop.f32.mrf.mxu1 }
 0x5d9   :  { %v4932_v48 = vpop.f32.mrf.mxu0 }
 0x5da   :  { %v4973_v47 = vpop.f32.mrf.mxu1 }
 0x5db   :  { %v4933_v19 = vpop.f32.mrf.mxu0 }
 0x5dc   :  { %v4974_v54 = vpop.f32.mrf.mxu1 }
 0x5dd   :  { %v4934_v50 = vpop.f32.mrf.mxu0 }
 0x5e6   :  { %v8187_v51 = vpop.f32.mrf.mxu1 }
 0x5e7   :  { %v8189_v55 = vpop.f32.mrf.mxu0 }
 0x5e8   :  { %v5052_v56 = vpop.f32.mrf.mxu1 }
 0x5e9   :  { %v5012_v57 = vpop.f32.mrf.mxu0 }
 0x5ea   :  { %v5053_v25 = vpop.f32.mrf.mxu1 }
 0x5eb   :  { %v5013_v8 = vpop.f32.mrf.mxu0 }
 0x5ec   :  { %v5054_v45 = vpop.f32.mrf.mxu1 }
 0x5ed   :  { %v5014_v62 = vpop.f32.mrf.mxu0 }
 0x643   :  { %v5158_v7 = vpop.f32.mrf.mxu1 }
 0x644   :  { %v5112_v26 = vpop.f32.mrf.mxu0  ;;  %v5443_v3 = vsel %vm2611_vm10, %v5158_v7, -inf }
 0x645   :  { %5444 = vmax.xlane.f32.xlu1 %v5443_v3  ;;  %v6788_v59 = vpop.f32.mrf.mxu1  ;;  %v5440_v44 = vsel %vm2611_vm10, %v5112_v26, -inf }
 0x646   :  { %5441 = vmax.xlane.f32.xlu0 %v5440_v44  ;;  %v6782_v63 = vpop.f32.mrf.mxu0 }
 0x647   :  { %v5161_v1 = vpop.f32.mrf.mxu1 }
 0x648   :  { %v5115_v38 = vpop.f32.mrf.mxu0 }
 0x649   :  { %v6789_v37 = vpop.f32.mrf.mxu1 }
 0x64a   :  { %v6783_v43 = vpop.f32.mrf.mxu0 }
 0x653   :  { %v5250_v0 = vpop.f32.mrf.mxu1 }
 0x654   :  { %v5204_v11 = vpop.f32.mrf.mxu0  ;;  %v5449_v12 = vsel %vm2611_vm10, %v5250_v0, -inf }
 0x655   :  { %5450 = vmax.xlane.f32.xlu1 %v5449_v12  ;;  %v6800_v41 = vpop.f32.mrf.mxu1  ;;  %v5446_v6 = vsel %vm2611_vm10, %v5204_v11, -inf }
 0x656   :  { %5447 = vmax.xlane.f32.xlu0 %v5446_v6  ;;  %v6794_v15 = vpop.f32.mrf.mxu0 }
 0x657   :  { %v5253_v2 = vpop.f32.mrf.mxu1 }
 0x658   :  { %v5207_v16 = vpop.f32.mrf.mxu0 }
 0x659   :  { %v6801_v31 = vpop.f32.mrf.mxu1 }
 0x65a   :  { %v6795_v18 = vpop.f32.mrf.mxu0 }
 0x663   :  { %v5342_v32 = vpop.f32.mrf.mxu1 }
 0x664   :  { %v5296_v52 = vpop.f32.mrf.mxu0  ;;  %v5455_v17 = vsel %vm2611_vm10, %v5342_v32, -inf }
 0x665   :  { %5456 = vmax.xlane.f32.xlu1 %v5455_v17  ;;  %v6812_v4 = vpop.f32.mrf.mxu1  ;;  %v5452_v5 = vsel %vm2611_vm10, %v5296_v52, -inf }
 0x666   :  { %5453 = vmax.xlane.f32.xlu0 %v5452_v5  ;;  %v6806_v23 = vpop.f32.mrf.mxu0 }
 0x667   :  { %v5345_v20 = vpop.f32.mrf.mxu1 }
 0x668   :  { %v5299_v9 = vpop.f32.mrf.mxu0 }
 0x669   :  { %v6813_v27 = vpop.f32.mrf.mxu1 }
 0x66a   :  { %v6807_v28 = vpop.f32.mrf.mxu0 }
 0x673   :  { %v5434_v29 = vpop.f32.mrf.mxu1 }
 0x674   :  { %v5388_v60 = vpop.f32.mrf.mxu0  ;;  %v5461_v21 = vsel %vm2611_vm10, %v5434_v29, -inf }
 0x675   :  { %5462 = vmax.xlane.f32.xlu1 %v5461_v21  ;;  %v6824_v53 = vpop.f32.mrf.mxu1  ;;  %v5458_v33 = vsel %vm2611_vm10, %v5388_v60, -inf  ;;  %v7263_v21 = vld [vmem:[%s8351_s5 + $0x2] ss:$0 sm:$0xff] }
 0x676   :  { %5459 = vmax.xlane.f32.xlu0 %v5458_v33  ;;  %v6818_v22 = vpop.f32.mrf.mxu0  ;;  %v4851_v53 = vadd.f32 %v7263_v21, %v8181_v34  ;;  %v7264_v34 = vld [vmem:[%s8351_s5 + $0x5] ss:$0 sm:$0xff] }
 0x677   :  { %v5437_v40 = vpop.f32.mrf.mxu1 }
 0x678   :  { %v5391_v61 = vpop.f32.mrf.mxu0 }
 0x679   :  { %v6825_v36 = vpop.f32.mrf.mxu1 }
 0x67a   :  { %v6819_v13 = vpop.f32.mrf.mxu0  ;;  %v5556_v36 = vpack.c.bf16 %v4851_v53, %v4851_v53 }
 0x6ce   :  { %v5445_v24 = vpop.xlane.xlu1 %5444 }
 0x6cf   :  { %v5465_v48 = vsub.f32 %v5158_v7, %v5445_v24  ;;  %v5442_v47 = vpop.xlane.xlu0 %5441 }
 0x6d0   :  { %v5464_v19 = vsub.f32 %v5112_v26, %v5442_v47 }
 0x6d1   :  { %v5474_v54 = vmul.f32 1.442695, %v5465_v48 }
 0x6d2   :  { %v5472_v50 = vmul.f32 1.442695, %v5464_v19 }
 0x6d3   :  { %7116 = vpow2.f32 %v5474_v54  ;;  %v5658_v54 = vsel %vm2736_vm9, %v5556_v36, 0 }
 0x6d4   :  { %7118 = vpow2.f32 %v5472_v50  ;;  %v4971_v50 = vadd.f32 %v7264_v34, %v8183_v14 }
 0x6de   :  { %v5451_v56 = vpop.xlane.xlu1 %5450 }
 0x6df   :  { %v5467_v57 = vsub.f32 %v5250_v0, %v5451_v56  ;;  %v5448_v25 = vpop.xlane.xlu0 %5447  ;;  %v7265_v56 = vld [vmem:[%s8351_s5 + $0x4] ss:$0 sm:$0xff] }
 0x6e0   :  { %v7117_v8 = vpop.eup %7116  ;;  %v5466_v45 = vsub.f32 %v5204_v11, %v5448_v25 }
 0x6e1   :  { %v7119_v62 = vpop.eup %7118  ;;  %v5478_v3 = vmul.f32 1.442695, %v5467_v57  ;;  %v5491_v59 = vsel %vm2611_vm10, %v7117_v8, 0.0  ;;  %v4931_v57 = vadd.f32 %v7265_v56, %v8185_v39  ;;  %v7275_v56 = vld [vmem:[#allocation11] ss:$8 sps:$4 sm:$0xff]  }
 0x6e2   :  { %v5476_v44 = vmul.f32 1.442695, %v5466_v45  ;;  %5492 = vadd.xlane.f32.xlu1 %v5491_v59  ;;  %v5488_v63 = vsel %vm2611_vm10, %v7119_v62, 0.0  ;;  %v5559_v45 = vpack.c.bf16 %v4971_v50, %v4971_v50  ;;  %v7274_v50 = vld [vmem:[#allocation11 + $0x20] ss:$8 sps:$4 sm:$0xff]  }
 0x6e3   :  { %7120 = vpow2.f32 %v5478_v3  ;;  %5489 = vadd.xlane.f32.xlu0 %v5488_v63  ;;  %v5558_v3 = vpack.c.bf16 %v4931_v57, %v4931_v57  ;;  %v7276_v57 = vld [vmem:[#allocation11 + $0x74] ss:$8 sps:$4 sm:$0xff]  }
 0x6e4   :  { %7122 = vpow2.f32 %v5476_v44  ;;  %v5796_v14 = vsel %vm2736_vm9, %v5559_v45, 0 }
 0x6e5   :  { %v5750_v39 = vsel %vm2736_vm9, %v5558_v3, 0 }
 0x6ee   :  { %v5457_v7 = vpop.xlane.xlu1 %5456 }
 0x6ef   :  { %v5469_v26 = vsub.f32 %v5342_v32, %v5457_v7  ;;  %v5454_v1 = vpop.xlane.xlu0 %5453 }
 0x6f0   :  { %v8201_v38 = vpop.eup %7120  ;;  %v5468_v37 = vsub.f32 %v5296_v52, %v5454_v1  ;;  %v7266_v1 = vld [vmem:[%s8351_s5 + $0x7] ss:$0 sm:$0xff] }
 0x6f1   :  { %v8203_v43 = vpop.eup %7122  ;;  %v5482_v0 = vmul.f32 1.442695, %v5469_v26  ;;  %v5497_v11 = vsel %vm2611_vm10, %v8201_v38, 0.0 }
 0x6f2   :  { %v5480_v12 = vmul.f32 1.442695, %v5468_v37  ;;  %5498 = vadd.xlane.f32.xlu1 %v5497_v11  ;;  %v5494_v41 = vsel %vm2611_vm10, %v8203_v43, 0.0  ;;  %v7267_v37 = vld [vmem:[%s8351_s5 + $0x6] ss:$0 sm:$0xff] }
 0x6f3   :  { %7124 = vpow2.f32 %v5482_v0  ;;  %5495 = vadd.xlane.f32.xlu0 %v5494_v41 }
 0x6f4   :  { %7126 = vpow2.f32 %v5480_v12 }
 0x6fe   :  { %v5463_v6 = vpop.xlane.xlu1 %5462 }
 0x6ff   :  { %v5471_v15 = vsub.f32 %v5434_v29, %v5463_v6  ;;  %v5460_v2 = vpop.xlane.xlu0 %5459  ;;  %v7262_v29 = vld [vmem:[%s8351_s5 + $0x3] ss:$0 sm:$0xff]  ;;  %s7488_s5 = smov [#allocation14]  }
 0x700   :  { %v8209_v16 = vpop.eup %7124  ;;  %v5470_v31 = vsub.f32 %v5388_v60, %v5460_v2  ;;  %v4891_v60 = vadd.f32 %v7262_v29, %v8179_v30  ;;  %s6399_s3 = sshll.u32 %s7488_s5, 4  ;;  %s6400_s3 = int_to_ptr.vmem [resolvable:$true] %s6399_s3 }
 0x701   :  { %v8211_v18 = vpop.eup %7126  ;;  %v5486_v32 = vmul.f32 1.442695, %v5471_v15  ;;  %v5503_v52 = vsel %vm2611_vm10, %v8209_v16, 0.0  ;;  %s7420_s10 = scalar_lea.vmem %s6400_s3, 256  ;;  %p7425_p3 = scmp.lt.s32.totalorder %s6400_s3, %s6400_s3 }
 0x702   :  { %v5484_v17 = vmul.f32 1.442695, %v5470_v31  ;;  %5504 = vadd.xlane.f32.xlu1 %v5503_v52  ;;  %v5500_v4 = vsel %vm2611_vm10, %v8211_v18, 0.0  ;;  %v5557_v40 = vpack.c.bf16 %v4891_v60, %v4891_v60  ;;  %p7421_p2 = scmp.ne.s32.totalorder %s6400_s3, %s7420_s10  ;;  %p7426_p4 = scmp.lt.s32.totalorder %s7420_s10, %s7420_s10 }
 0x703   :  { %7128 = vpow2.f32 %v5486_v32  ;;  %5501 = vadd.xlane.f32.xlu0 %v5500_v4 }
 0x704   :  { %7130 = vpow2.f32 %v5484_v17  ;;  %v5704_v30 = vsel %vm2736_vm9, %v5557_v40, 0  ;;  %p7427_p5 = por %p7426_p4, %p7425_p3 }
 0x706   :  { %p7428_p6 = pnand %p7427_p5, %p7421_p2 }
 0x710   :  { %v8217_v5 = vpop.eup %7128 }
 0x711   :  { %v8219_v23 = vpop.eup %7130  ;;  %v5509_v20 = vsel %vm2611_vm10, %v8217_v5, 0.0 }
 0x712   :  { %5510 = vadd.xlane.f32.xlu1 %v5509_v20  ;;  %v5506_v9 = vsel %vm2611_vm10, %v8219_v23, 0.0  ;;  %v7268_v20 = vld [vmem:[#allocation11 + $0x14] ss:$8 sps:$4 sm:$0xff]  }
 0x713   :  { %5507 = vadd.xlane.f32.xlu0 %v5506_v9 }
 0x76b   :  { %v5493_v27 = vpop.xlane.xlu1 %5492 }
 0x76c   :  { %7132 = vrcp.f32 %v5493_v27  ;;  %v5490_v28 = vpop.xlane.xlu0 %5489  ;;  %v7269_v27 = vld [vmem:[#allocation11 + $0x34] ss:$8 sps:$4 sm:$0xff]  }
 0x76d   :  { %7134 = vrcp.f32 %v5490_v28 }
 0x779   :  { %v7133_v33 = vpop.eup %7132 }
 0x77a   :  { %v7135_v22 = vpop.eup %7134  ;;  %v5515_v61 = vmul.f32 %v7133_v33, %v7117_v8 }
 0x77b   :  { %v5513_v13 = vmul.f32 %v7135_v22, %v7119_v62  ;;  %v5499_v24 = vpop.xlane.xlu1 %5498 }
 0x77c   :  { %v5547_v48 = vpack.c.bf16 %v5515_v61, %v5515_v61  ;;  %7136 = vrcp.f32 %v5499_v24  ;;  %v5496_v47 = vpop.xlane.xlu0 %5495 }
 0x77d   :  { %v5546_v19 = vpack.c.bf16 %v5513_v13, %v5513_v13  ;;  %7138 = vrcp.f32 %v5496_v47  ;;  %v5528_v52 = vsel %vm2611_vm10, %v5513_v13, 0.0  ;;  %v7270_v47 = vld [vmem:[#allocation11 + $0x30] ss:$8 sps:$4 sm:$0xff]  }
 0x77e   :  { %6835 = vmatmul.mubr.msk.bf16.vlgmr.msra.gmra.mxu1 %vm2611_vm10, %v5547_v48 }
 0x77f   :  { %6829 = vmatmul.mubr.msk.bf16.vlgmr.msra.gmra.mxu0 %vm2611_vm10, %v5546_v19  ;;  %6845 = vmatpush3.bf16.msra.mxu1 %v5704_v30  ;;  %v7271_v30 = vld [vmem:[#allocation11 + $0x10] ss:$8 sps:$4 sm:$0xff]  }
 0x780   :  { %6839 = vmatpush3.bf16.msra.mxu0 %v5658_v54  ;;  %6840 = vmatprep.mubr.msk.bf16.mxu0 %vm7485_vm7, %v7484_v35  ;;  %v7273_v54 = vld [vmem:[#allocation11 + $0x4] ss:$8 sps:$4 sm:$0xff]  }
 0x781   :  { %6846 = vmatprep.mubr.msk.bf16.mxu1 %vm7485_vm7, %v7484_v35  ;;  %6850 = vmatprep.subr.bf16.mxu0 %v7484_v35 }
 0x782   :  { %6856 = vmatprep.subr.bf16.mxu1 %v7484_v35 }
 0x789   :  { %v7137_v25 = vpop.eup %7136 }
 0x78a   :  { %v7139_v8 = vpop.eup %7138  ;;  %v5519_v62 = vmul.f32 %v7137_v25, %v8201_v38  ;;  %v5051_v38 = vadd.f32 %v7266_v1, %v8187_v51  ;;  %v5529_v51 = vsel %vm2611_vm10, %v5515_v61, 0.0  ;;  %v7277_v25 = vld [vmem:[#allocation11 + $0x54] ss:$8 sps:$4 sm:$0xff]  }
 0x78b   :  { %v5517_v59 = vmul.f32 %v7139_v8, %v8203_v43  ;;  %v5505_v44 = vpop.xlane.xlu1 %5504  ;;  %v5011_v43 = vadd.f32 %v7267_v37, %v8189_v55 }
 0x78c   :  { %v5549_v63 = vpack.c.bf16 %v5519_v62, %v5519_v62  ;;  %7140 = vrcp.f32 %v5505_v44  ;;  %v5502_v7 = vpop.xlane.xlu0 %5501  ;;  %v5561_v12 = vpack.c.bf16 %v5051_v38, %v5051_v38  ;;  %v5533_v28 = vsel %vm2611_vm10, %v5519_v62, 0.0  ;;  %v7281_v38 = vld [vmem:[#allocation11 + $0x44] ss:$8 sps:$4 sm:$0xff]  }
 0x78d   :  { %v5548_v26 = vpack.c.bf16 %v5517_v59, %v5517_v59  ;;  %7142 = vrcp.f32 %v5502_v7  ;;  %v5560_v6 = vpack.c.bf16 %v5011_v43, %v5011_v43  ;;  %v7278_v7 = vld [vmem:[#allocation11 + $0x70] ss:$8 sps:$4 sm:$0xff]   ;;  %v7282_v43 = vld [vmem:[#allocation11 + $0x60] ss:$8 sps:$4 sm:$0xff]  }
 0x78e   :  { %6847 = vmatmul.mubr.msk.bf16.vlgmr.msra.gmra.mxu1 %vm2611_vm10, %v5549_v63  ;;  %v5888_v55 = vsel %vm2736_vm9, %v5561_v12, 0  ;;  %v7285_v12 = vld [vmem:[#allocation11 + $0x94] ss:$8 sps:$4 sm:$0xff]  }
 0x78f   :  { %6841 = vmatmul.mubr.msk.bf16.vlgmr.msra.gmra.mxu0 %vm2611_vm10, %v5548_v26  ;;  %6857 = vmatpush3.bf16.msra.mxu1 %v5796_v14  ;;  %v5842_v4 = vsel %vm2736_vm9, %v5560_v6, 0  ;;  %v7279_v14 = vld [vmem:[#allocation11 + $0x50] ss:$8 sps:$4 sm:$0xff]  }
 0x790   :  { %6851 = vmatpush3.bf16.msra.mxu0 %v5750_v39  ;;  %6852 = vmatprep.mubr.msk.bf16.mxu0 %vm7485_vm7, %v7484_v35  ;;  %v7280_v39 = vld [vmem:[#allocation11 + $0x64] ss:$8 sps:$4 sm:$0xff]  }
 0x791   :  { %6858 = vmatprep.mubr.msk.bf16.mxu1 %vm7485_vm7, %v7484_v35  ;;  %6862 = vmatprep.subr.bf16.mxu0 %v7484_v35 }
 0x792   :  { %6868 = vmatprep.subr.bf16.mxu1 %v7484_v35 }
 0x799   :  { %v7141_v0 = vpop.eup %7140 }
 0x79a   :  { %v7143_v11 = vpop.eup %7142  ;;  %v5523_v41 = vmul.f32 %v7141_v0, %v8209_v16  ;;  %v5531_v16 = vsel %vm2611_vm10, %v5517_v59, 0.0  ;;  %v7283_v0 = vld [vmem:[#allocation11 + $0x40] ss:$8 sps:$4 sm:$0xff]  }
 0x79b   :  { %v5521_v15 = vmul.f32 %v7143_v11, %v8211_v18  ;;  %v5511_v2 = vpop.xlane.xlu1 %5510  ;;  %v5530_v18 = vadd.f32 %v5529_v51, %v5528_v52  ;;  %v7284_v11 = vld [vmem:[#allocation11 + $0xb4] ss:$8 sps:$4 sm:$0xff]   ;;  %v7286_v52 = vld [vmem:[#allocation11 + $0xb0] ss:$8 sps:$4 sm:$0xff]  }
 0x79c   :  { %v5551_v31 = vpack.c.bf16 %v5523_v41, %v5523_v41  ;;  %7144 = vrcp.f32 %v5511_v2  ;;  %v5508_v32 = vpop.xlane.xlu0 %5507  ;;  %v5537_v61 = vsel %vm2611_vm10, %v5523_v41, 0.0 }
 0x79d   :  { %v5550_v17 = vpack.c.bf16 %v5521_v15, %v5521_v15  ;;  %7146 = vrcp.f32 %v5508_v32  ;;  %v5532_v9 = vadd.f32 %v5531_v16, %v5530_v18  ;;  %v5535_v29 = vsel %vm2611_vm10, %v5521_v15, 0.0  ;;  %v7289_v18 = vld [vmem:[#allocation11 + $0x84] ss:$8 sps:$4 sm:$0xff]  }
 0x79e   :  { %6859 = vmatmul.mubr.msk.bf16.vlgmr.msra.gmra.mxu1 %vm2611_vm10, %v5551_v31 }
 0x79f   :  { %6853 = vmatmul.mubr.msk.bf16.vlgmr.msra.gmra.mxu0 %vm2611_vm10, %v5550_v17  ;;  %6869 = vmatpush3.bf16.msra.mxu1 %v5888_v55  ;;  %v5534_v60 = vadd.f32 %v5533_v28, %v5532_v9  ;;  %v7287_v55 = vld [vmem:[#allocation11 + $0x90] ss:$8 sps:$4 sm:$0xff]   ;;  %v7290_v9 = vld [vmem:[#allocation11 + $0xa0] ss:$8 sps:$4 sm:$0xff]   ;;  %v7292_v28 = vld [vmem:[#allocation11 + $0xf4] ss:$8 sps:$4 sm:$0xff]  }
 0x7a0   :  { %6863 = vmatpush3.bf16.msra.mxu0 %v5842_v4  ;;  %6864 = vmatprep.mubr.msk.bf16.mxu0 %vm7485_vm7, %v7484_v35  ;;  %v7288_v4 = vld [vmem:[#allocation11 + $0xa4] ss:$8 sps:$4 sm:$0xff]  }
 0x7a1   :  { %6870 = vmatprep.mubr.msk.bf16.mxu1 %vm7485_vm7, %v7484_v35  ;;  %5953 = vmatprep.subr.bf16.mxu0 %v7268_v20  ;;  %v5536_v21 = vadd.f32 %v5535_v29, %v5534_v60  ;;  %v7293_v29 = vld [vmem:[#allocation11 + $0xd4] ss:$8 sps:$4 sm:$0xff]  }
 0x7a2   :  { %5997 = vmatprep.subr.bf16.mxu1 %v7269_v27  ;;  %v7291_v27 = vld [vmem:[#allocation11 + $0x80] ss:$8 sps:$4 sm:$0xff]  }
 0x7a3   :  { %v5538_v36 = vadd.f32 %v5537_v61, %v5536_v21 }
 0x7a9   :  { %v7145_v53 = vpop.eup %7144 }
 0x7aa   :  { %v7147_v33 = vpop.eup %7146  ;;  %v5527_v22 = vmul.f32 %v7145_v53, %v8217_v5  ;;  %v7272_v5 = vld [vmem:[#allocation11 + $0x24] ss:$8 sps:$4 sm:$0xff]  }
 0x7ab   :  { %v5525_v40 = vmul.f32 %v7147_v33, %v8219_v23 }
 0x7ac   :  { %v5553_v35 = vpack.c.bf16 %v5527_v22, %v5527_v22  ;;  %v5541_v19 = vsel %vm2611_vm10, %v5527_v22, 0.0 }
 0x7ad   :  { %v5552_v13 = vpack.c.bf16 %v5525_v40, %v5525_v40  ;;  %v5539_v24 = vsel %vm2611_vm10, %v5525_v40, 0.0 }
 0x7ae   :  { %6871 = vmatmul.mubr.msk.bf16.vlgmr.msra.gmra.mxu1 %vm2611_vm10, %v5553_v35  ;;  %v5540_v48 = vadd.f32 %v5539_v24, %v5538_v36  ;;  %v7294_v35 = vld [vmem:[#allocation11 + $0xf0] ss:$8 sps:$4 sm:$0xff]   ;;  %v7296_v24 = vld [vmem:[#allocation11 + $0xe4] ss:$8 sps:$4 sm:$0xff]  }
 0x7af   :  { %6865 = vmatmul.mubr.msk.bf16.vlgmr.msra.gmra.mxu0 %vm2611_vm10, %v5552_v13  ;;  %5998 = vmatpush1.bf16.msra.mxu1 %v7270_v47  ;;  %v7295_v13 = vld [vmem:[#allocation11 + $0xd0] ss:$8 sps:$4 sm:$0xff]   ;;  %v7297_v47 = vld [vmem:[#allocation11 + $0xc4] ss:$8 sps:$4 sm:$0xff]  }
 0x7b0   :  { %5954 = vmatpush1.bf16.msra.mxu0 %v7271_v30  ;;  %5999 = vmatprep.subr.bf16.mxu1 %v7272_v5  ;;  %v5542_v23 = vadd.f32 %v5541_v19, %v5540_v48  ;;  %v7298_v30 = vld [vmem:[#allocation11 + $0xe0] ss:$8 sps:$4 sm:$0xff]  }
 0x7b1   :  { %5955 = vmatprep.subr.bf16.mxu0 %v7273_v54  ;;  %5973 = vmatprep.mubr.bf16.mxu0 %v7486_v10  ;;  %v7299_v5 = vld [vmem:[#allocation11 + $0xc0] ss:$8 sps:$4 sm:$0xff]  }
 0x7b2   :  { %6017 = vmatprep.mubr.bf16.mxu1 %v7486_v10  ;;  %v5543_v34 = vmul.f32 0.125, %v5542_v23 }
 0x7b3   :  { %6000 = vmatpush1.bf16.msra.mxu1 %v7274_v50 }
 0x7b4   :  { %5956 = vmatpush1.bf16.msra.mxu0 %v7275_v56  ;;  %6085 = vmatprep.subr.bf16.mxu1 %v7276_v57  ;;  %5545 = vst.msk [vmem:[#allocation14 + $0x8] sm:$0xff] %vm2611_vm10, %v5543_v34 }
 0x7b5   :  { %6041 = vmatprep.subr.bf16.mxu0 %v7277_v25 }
 0x83e   :  { %v5648_v8 = vpop.f32.mrf.mxu1 }
 0x83f   :  { %v5602_v45 = vpop.f32.mrf.mxu0  ;;  %v5931_v62 = vpack.c.bf16 %v5648_v8, %v5648_v8 }
 0x840   :  { %v5930_v3 = vpack.c.bf16 %v5602_v45, %v5602_v45  ;;  %v6836_v59 = vpop.f32.mrf.mxu1 }
 0x841   :  { %v6830_v44 = vpop.f32.mrf.mxu0  ;;  %6611 = vmatmul.mubr.msk.bf16.vlgmr.msra.gmra.mxu1 %vm2242_vm8, %v5931_v62 }
 0x842   :  { %6610 = vmatmul.mubr.msk.bf16.vlgmr.msra.gmra.mxu0 %vm2242_vm8, %v5930_v3  ;;  %v5651_v63 = vpop.f32.mrf.mxu1  ;;  %6086 = vmatpush1.bf16.msra.mxu1 %v7278_v7 }
 0x843   :  { %v5605_v26 = vpop.f32.mrf.mxu0  ;;  %6042 = vmatpush1.bf16.msra.mxu0 %v7279_v14  ;;  %6087 = vmatprep.subr.bf16.mxu1 %v7280_v39 }
 0x844   :  { %v6837_v1 = vpop.f32.mrf.mxu1  ;;  %6043 = vmatprep.subr.bf16.mxu0 %v7281_v38  ;;  %6061 = vmatprep.mubr.bf16.mxu0 %v7486_v10 }
 0x845   :  { %v6831_v37 = vpop.f32.mrf.mxu0  ;;  %6105 = vmatprep.mubr.bf16.mxu1 %v7486_v10 }
 0x846   :  { %6088 = vmatpush1.bf16.msra.mxu1 %v7282_v43 }
 0x847   :  { %6044 = vmatpush1.bf16.msra.mxu0 %v7283_v0  ;;  %6173 = vmatprep.subr.bf16.mxu1 %v7284_v11 }
 0x848   :  { %6129 = vmatprep.subr.bf16.mxu0 %v7285_v12 }
 0x84e   :  { %v5740_v41 = vpop.f32.mrf.mxu1 }
 0x84f   :  { %v5694_v6 = vpop.f32.mrf.mxu0  ;;  %v5933_v15 = vpack.c.bf16 %v5740_v41, %v5740_v41 }
 0x850   :  { %v5932_v2 = vpack.c.bf16 %v5694_v6, %v5694_v6  ;;  %v6848_v31 = vpop.f32.mrf.mxu1 }
 0x851   :  { %v6842_v32 = vpop.f32.mrf.mxu0  ;;  %6613 = vmatmul.mubr.msk.bf16.vlgmr.msra.gmra.mxu1 %vm2242_vm8, %v5933_v15 }
 0x852   :  { %6612 = vmatmul.mubr.msk.bf16.vlgmr.msra.gmra.mxu0 %vm2242_vm8, %v5932_v2  ;;  %v5743_v51 = vpop.f32.mrf.mxu1  ;;  %6174 = vmatpush1.bf16.msra.mxu1 %v7286_v52 }
 0x853   :  { %v5697_v17 = vpop.f32.mrf.mxu0  ;;  %6130 = vmatpush1.bf16.msra.mxu0 %v7287_v55  ;;  %6175 = vmatprep.subr.bf16.mxu1 %v7288_v4 }
 0x854   :  { %v6849_v16 = vpop.f32.mrf.mxu1  ;;  %6131 = vmatprep.subr.bf16.mxu0 %v7289_v18  ;;  %6149 = vmatprep.mubr.bf16.mxu0 %v7486_v10 }
 0x855   :  { %v6843_v20 = vpop.f32.mrf.mxu0  ;;  %6193 = vmatprep.mubr.bf16.mxu1 %v7486_v10 }
 0x856   :  { %6176 = vmatpush1.bf16.msra.mxu1 %v7290_v9 }
 0x857   :  { %6132 = vmatpush1.bf16.msra.mxu0 %v7291_v27  ;;  %6261 = vmatprep.subr.bf16.mxu1 %v7292_v28 }
 0x858   :  { %6217 = vmatprep.subr.bf16.mxu0 %v7293_v29 }
 0x85e   :  { %v5832_v60 = vpop.f32.mrf.mxu1 }
 0x85f   :  { %v5786_v21 = vpop.f32.mrf.mxu0  ;;  %v5935_v53 = vpack.c.bf16 %v5832_v60, %v5832_v60 }
 0x860   :  { %v5934_v33 = vpack.c.bf16 %v5786_v21, %v5786_v21  ;;  %v6860_v22 = vpop.f32.mrf.mxu1 }
 0x861   :  { %v6854_v40 = vpop.f32.mrf.mxu0  ;;  %6615 = vmatmul.mubr.msk.bf16.vlgmr.msra.gmra.mxu1 %vm2242_vm8, %v5935_v53 }
 0x862   :  { %6614 = vmatmul.mubr.msk.bf16.vlgmr.msra.gmra.mxu0 %vm2242_vm8, %v5934_v33  ;;  %v5835_v61 = vpop.f32.mrf.mxu1  ;;  %6262 = vmatpush1.bf16.msra.mxu1 %v7294_v35 }
 0x863   :  { %v5789_v36 = vpop.f32.mrf.mxu0  ;;  %6218 = vmatpush1.bf16.msra.mxu0 %v7295_v13  ;;  %6263 = vmatprep.subr.bf16.mxu1 %v7296_v24 }
 0x864   :  { %v6861_v48 = vpop.f32.mrf.mxu1  ;;  %6219 = vmatprep.subr.bf16.mxu0 %v7297_v47  ;;  %6237 = vmatprep.mubr.bf16.mxu0 %v7486_v10 }
 0x865   :  { %v6855_v19 = vpop.f32.mrf.mxu0  ;;  %6281 = vmatprep.mubr.bf16.mxu1 %v7486_v10 }
 0x866   :  { %6264 = vmatpush1.bf16.msra.mxu1 %v7298_v30 }
 0x867   :  { %6220 = vmatpush1.bf16.msra.mxu0 %v7299_v5 }
 0x86e   :  { %v5924_v23 = vpop.f32.mrf.mxu1 }
 0x86f   :  { %v5878_v54 = vpop.f32.mrf.mxu0  ;;  %v5937_v34 = vpack.c.bf16 %v5924_v23, %v5924_v23 }
 0x870   :  { %v5936_v50 = vpack.c.bf16 %v5878_v54, %v5878_v54  ;;  %v6872_v56 = vpop.f32.mrf.mxu1 }
 0x871   :  { %v6866_v57 = vpop.f32.mrf.mxu0  ;;  %6617 = vmatmul.mubr.msk.bf16.vlgmr.msra.gmra.mxu1 %vm2242_vm8, %v5937_v34 }
 0x872   :  { %6616 = vmatmul.mubr.msk.bf16.vlgmr.msra.gmra.mxu0 %vm2242_vm8, %v5936_v50  ;;  %v5927_v25 = vpop.f32.mrf.mxu1 }
 0x873   :  { %v5881_v8 = vpop.f32.mrf.mxu0 }
 0x874   :  { %v6873_v45 = vpop.f32.mrf.mxu1 }
 0x875   :  { %v6867_v62 = vpop.f32.mrf.mxu0 }
 0x876   :  { %7431 = shalt.err (!%p7428_p6)
}
 0x877   :  { %6405 = dma.vmem_to_hbm [thread:$0]  %s6400_s3, 256, %s8355_s9, [#allocation15], %s7480_s29, %s7480_s29, %s7481_s30  }
 0x878   :  { %s7489_s9 = smov [#allocation13]  }
 0x879   :  { %s6387_s29 = sshll.u32 %s7489_s9, 4  ;;  %s6388_s29 = int_to_ptr.vmem [resolvable:$true] %s6387_s29 }
 0x87a   :  { %s7440_s30 = scalar_lea.vmem %s6388_s29, 512  ;;  %p7445_p8 = scmp.lt.s32.totalorder %s6388_s29, %s6388_s29 }
 0x87b   :  { %p7441_p7 = scmp.ne.s32.totalorder %s6388_s29, %s7440_s30  ;;  %p7446_p9 = scmp.lt.s32.totalorder %s7440_s30, %s7440_s30 }
 0x87d   :  { %p7447_p10 = por %p7446_p9, %p7445_p8 }
 0x87f   :  { %p7448_p11 = pnand %p7447_p10, %p7441_p7 }
 0x901   :  { %v6019_v10 = vpop.f32.mrf.mxu1 }
 0x902   :  { %v5975_v3 = vpop.f32.mrf.mxu0 }
 0x903   :  { %v6021_v59 = vpop.f32.mrf.mxu1  ;;  %v6290_v31 = vadd.f32 %v6019_v10, %v5975_v3 }
 0x904   :  { %v5977_v44 = vpop.f32.mrf.mxu0 }
 0x905   :  { %v6023_v63 = vpop.f32.mrf.mxu1  ;;  %v6297_v52 = vadd.f32 %v6021_v59, %v5977_v44 }
 0x906   :  { %v5979_v7 = vpop.f32.mrf.mxu0 }
 0x907   :  { %v6024_v26 = vpop.f32.mrf.mxu1 }
 0x908   :  { %v5980_v14 = vpop.f32.mrf.mxu0 }
 0x911   :  { %v6107_v39 = vpop.f32.mrf.mxu1 }
 0x912   :  { %v6063_v1 = vpop.f32.mrf.mxu0 }
 0x913   :  { %v6109_v38 = vpop.f32.mrf.mxu1  ;;  %v6291_v17 = vadd.f32 %v6290_v31, %v6063_v1 }
 0x914   :  { %v6065_v37 = vpop.f32.mrf.mxu0 }
 0x915   :  { %v6111_v43 = vpop.f32.mrf.mxu1  ;;  %v6298_v16 = vadd.f32 %v6297_v52, %v6065_v37  ;;  %v6292_v18 = vadd.f32 %v6291_v17, %v6107_v39 }
 0x916   :  { %v6067_v0 = vpop.f32.mrf.mxu0 }
 0x917   :  { %v6112_v11 = vpop.f32.mrf.mxu1  ;;  %v6299_v20 = vadd.f32 %v6298_v16, %v6109_v38 }
 0x918   :  { %v6068_v12 = vpop.f32.mrf.mxu0 }
 0x921   :  { %v6195_v41 = vpop.f32.mrf.mxu1 }
 0x922   :  { %v6151_v6 = vpop.f32.mrf.mxu0 }
 0x923   :  { %v6197_v15 = vpop.f32.mrf.mxu1  ;;  %v6293_v9 = vadd.f32 %v6292_v18, %v6151_v6 }
 0x924   :  { %v6153_v2 = vpop.f32.mrf.mxu0 }
 0x925   :  { %v6199_v32 = vpop.f32.mrf.mxu1  ;;  %v6300_v27 = vadd.f32 %v6299_v20, %v6153_v2  ;;  %v6294_v28 = vadd.f32 %v6293_v9, %v6195_v41 }
 0x926   :  { %v6155_v51 = vpop.f32.mrf.mxu0 }
 0x927   :  { %v6200_v55 = vpop.f32.mrf.mxu1  ;;  %v6301_v21 = vadd.f32 %v6300_v27, %v6197_v15 }
 0x928   :  { %v6156_v4 = vpop.f32.mrf.mxu0 }
 0x931   :  { %v6283_v29 = vpop.f32.mrf.mxu1 }
 0x932   :  { %v6239_v60 = vpop.f32.mrf.mxu0 }
 0x933   :  { %v6295_v53 = vadd.f32 %v6294_v28, %v6239_v60  ;;  %v6285_v33 = vpop.f32.mrf.mxu1 }
 0x934   :  { %v6241_v22 = vpop.f32.mrf.mxu0 }
 0x935   :  { %v6296_v40 = vadd.f32 %v6295_v53, %v6283_v29  ;;  %v6302_v61 = vadd.f32 %v6301_v21, %v6241_v22  ;;  %v6287_v35 = vpop.f32.mrf.mxu1 }
 0x936   :  { %v6243_v36 = vpop.f32.mrf.mxu0 }
 0x937   :  { %v6303_v13 = vadd.f32 %v6302_v61, %v6285_v33  ;;  %v6288_v24 = vpop.f32.mrf.mxu1  ;;  %v6304_v47 = vadd.f32 %v6296_v40, %v8074_v42 }
 0x938   :  { %v6244_v48 = vpop.f32.mrf.mxu0 }
 0x939   :  { %v6305_v19 = vadd.f32 %v6303_v13, %v8077_v49 }
 0x93b   :  { %v6308_v30 = vcombine.low %v6304_v47, %v6305_v19  ;;  %v6309_v5 = vcombine.high %v6304_v47, %v6305_v19 }
 0x93d   :  { %v6316_v23 = vrot.slane %v6308_v30, %v8082_v58  ;;  %v6323_v54 = vrot.slane %v6309_v5, %v8082_v58 }
 0x93f   :  { %v6324_v34 = vcombine.high %v6316_v23, %v6316_v23  ;;  %v6325_v50 = vcombine.high %v6323_v54, %v6323_v54  ;;  %v6332_v56 = vrot.slane %v6316_v23, %v8082_v58  ;;  %v6339_v57 = vrot.slane %v6323_v54, %v8082_v58 }
 0x941   :  { %v6346_v25 = vrot.slane %v6324_v34, %v8082_v58  ;;  %v6353_v42 = vrot.slane %v6325_v50, %v8082_v58  ;;  %v6354_v8 = vcombine.high %v6332_v56, %v6332_v56  ;;  %v6355_v49 = vcombine.high %v6339_v57, %v6339_v57  ;;  %6367 = vst.msk [vmem:[#allocation13 + $0x1] ss:$2 sm:$0x3] %vm8087_vm11, %v6332_v56 }
 0x942   :  { %6375 = vst.msk [vmem:[#allocation13 + $0x11] ss:$2 sm:$0x3] %vm8087_vm11, %v6339_v57 }
 0x943   :  { %v6356_v45 = vcombine.high %v6346_v25, %v6346_v25  ;;  %v6357_v62 = vcombine.high %v6353_v42, %v6353_v42  ;;  %6369 = vst.msk [vmem:[#allocation13 + $0x5] ss:$2 sm:$0x3] %vm8087_vm11, %v6346_v25  ;;  %6371 = vst.msk [vmem:[#allocation13 + $0x9] ss:$2 sm:$0x3] %vm8087_vm11, %v6354_v8 }
 0x944   :  { %6377 = vst.msk [vmem:[#allocation13 + $0x15] ss:$2 sm:$0x3] %vm8087_vm11, %v6353_v42  ;;  %6379 = vst.msk [vmem:[#allocation13 + $0x19] ss:$2 sm:$0x3] %vm8087_vm11, %v6355_v49 }
 0x945   :  { %6373 = vst.msk [vmem:[#allocation13 + $0xd] ss:$2 sm:$0x3] %vm8087_vm11, %v6356_v45  ;;  %6381 = vst.msk [vmem:[#allocation13 + $0x1d] ss:$2 sm:$0x3] %vm8087_vm11, %v6357_v62 }
 0x946   :  { %7451 = shalt.err (!%p7448_p11)
}
 0x947   :  { %6393 = dma.vmem_to_hbm [thread:$0]  %s6388_s29, 512, %s8354_s8, [#allocation4], %s7474_s14, %s7474_s14, %s7475_s15  }
 0x948   :  { %7468 = dma.done.wait [#allocation4], 512  }
 0x949   :  { %7469 = vsyncadd [#allocation4], 4294966784 }
 0x94a   :  { %7470 = dma.done.wait [#allocation15], 256  }
 0x94b   :  { %7471 = vsyncadd [#allocation15], 4294967040 }
 0x94c   :  { %6412 = vsyncpa [#allocation3], 1 }
 0x94d   :  { %6413 = vsyncpa [#allocation6], 1 }
 0x94e   :  { %6414 = vsyncpa [#allocation9], 1 }
 0x94f   :  { %6415 = vsyncpa [#allocation12], 1 }
 0x950   :  { %6416 = vsyncpa [#allocation4], 1 }
 0x951   :  { %6417 = vsyncpa [#allocation15], 1 }

</bundles_post_ra>
